<compile_context>
chip_gen: v7x
topology: tpu7x:2x2x1
jax: 0.10.0
libtpu: 0.0.40
codegen_flags: <defaults>
</compile_context>

<pallas_src>
import math

import jax
import jax.numpy as jnp
from jax.experimental import pallas as pl
from jax.experimental.pallas import tpu as pltpu

LANE = 128  # logits lane-padded to 128 for an unmasked, lane-dense output store


# ----------------------------- kernel helpers -------------------------------

def _layernorm(x, g, b, eps=1e-12):
    mu = jnp.mean(x, axis=-1, keepdims=True)
    var = jnp.mean((x - mu) ** 2, axis=-1, keepdims=True)
    return (x - mu) * jax.lax.rsqrt(var + eps) * g + b


def _gelu(x):
    # TODO(synk): tanh-approx GELU; switch to exact erf GELU if the reference
    # HuggingFace transformer uses the exact variant.
    c = math.sqrt(2.0 / math.pi)
    return 0.5 * x * (1.0 + jnp.tanh(c * (x + 0.044715 * x * x * x)))


# --------------- fused kernel: encoder layer + CLS + fusion head -------------

def fused_climate_kernel(
        x_ref, mask_ref, bias_ref,
        wqkv_ref, bqkv_ref, wo_ref, bo_ref,
        ln1g_ref, ln1b_ref,
        w1_ref, b1_ref, w2_ref, b2_ref,
        ln2g_ref, ln2b_ref,
        wcls_ref,
        out_ref):
    Bblk, S, H = x_ref.shape

    x = x_ref[...]                                   # (Bblk, S, H) bf16
    x2 = x.reshape(Bblk * S, H)

    # Fused QKV projection (1/sqrt(H) already folded into Wq / bq).
    qkv = jnp.dot(x2, wqkv_ref[...],
                  preferred_element_type=jnp.float32) + bqkv_ref[...]   # (Bblk*S, 3H) f32
    q = qkv[:, 0 * H:1 * H].reshape(Bblk, S, H).astype(jnp.bfloat16)
    k = qkv[:, 1 * H:2 * H].reshape(Bblk, S, H).astype(jnp.bfloat16)
    v = qkv[:, 2 * H:3 * H].reshape(Bblk, S, H).astype(jnp.bfloat16)

    # Additive key mask built in-kernel from the 0/1 attention mask.
    add_mask = jnp.where(mask_ref[...] == 0.0, -1e9, 0.0)[:, None, :]   # (Bblk, 1, S)

    scores = jnp.einsum('bqd,bkd->bqk', q, k,
                        preferred_element_type=jnp.float32) + add_mask  # (Bblk, S, S)
    scores = scores - jnp.max(scores, axis=-1, keepdims=True)
    p = jnp.exp(scores)
    attn = p * pl.reciprocal(jnp.sum(p, axis=-1, keepdims=True), approx=True)

    ctx = jnp.einsum('bqk,bkd->bqd', attn.astype(jnp.bfloat16), v,
                     preferred_element_type=jnp.float32)                # (Bblk, S, H)
    ctx2 = ctx.reshape(Bblk * S, H).astype(jnp.bfloat16)
    attn_out = jnp.dot(ctx2, wo_ref[...],
                       preferred_element_type=jnp.float32) + bo_ref[...]

    y = _layernorm(x2.astype(jnp.float32) + attn_out, ln1g_ref[...], ln1b_ref[...])

    h = _gelu(jnp.dot(y.astype(jnp.bfloat16), w1_ref[...],
                      preferred_element_type=jnp.float32) + b1_ref[...])
    ff = jnp.dot(h.astype(jnp.bfloat16), w2_ref[...],
                 preferred_element_type=jnp.float32) + b2_ref[...]
    h2 = _layernorm(y + ff, ln2g_ref[...], ln2b_ref[...])               # (Bblk*S, H) f32

    # CLS rows only; dropout(0.3) is identity at inference.
    cls = h2.reshape(Bblk, S, H)[:, 0, :].astype(jnp.bfloat16)          # (Bblk, H)

    # tfidf/keyword head + bias already folded into bias_ref (precomputed in XLA).
    logits = jnp.dot(cls, wcls_ref[...],
                     preferred_element_type=jnp.float32) + bias_ref[...]
    out_ref[...] = logits                                               # (Bblk, LANE) dense store


# ------------------------------ wrapper ---------------------------------------

def climate_model_forward(params, input_ids, attention_mask, tfidf, kw, *, block_b=8):
    B, S = input_ids.shape
    H = params["tok_emb"].shape[1]
    F = params["w1"].shape[1]
    T = tfidf.shape[1]
    K = kw.shape[1]
    L = params["fc_w"].shape[1]
    scale = 1.0 / math.sqrt(H)

    # ---- one-time weight prep (would be hoisted out of the hot path in production) ----
    wqkv = jnp.concatenate(
        [params["wq"] * scale, params["wk"], params["wv"]], axis=1).astype(jnp.bfloat16)
    bqkv = jnp.concatenate([params["bq"] * scale, params["bk"], params["bv"]], axis=1)
    wo = params["wo"].astype(jnp.bfloat16)
    w1 = params["w1"].astype(jnp.bfloat16)
    w2 = params["w2"].astype(jnp.bfloat16)

    pad_l = LANE - L
    fc_w_p = jnp.pad(params["fc_w"], ((0, 0), (0, pad_l)))              # (H+T+K, LANE)
    fc_b_p = jnp.pad(params["fc_b"], ((0, 0), (0, pad_l)))              # (1, LANE)
    w_cls = fc_w_p[:H].astype(jnp.bfloat16)                             # in-kernel
    w_tf, w_kw = fc_w_p[H:H + T], fc_w_p[H + T:]                        # XLA precompute

    # tfidf/keyword contributions: tiny 1-row dots -> do once, batched, in XLA.
    head_bias = (tfidf.astype(jnp.float32) @ w_tf
                 + kw.astype(jnp.float32) @ w_kw
                 + fc_b_p)                                              # (B, LANE) f32

    # Embedding gather stays in XLA; activations enter the kernel as bf16.
    emb = (params["tok_emb"][input_ids] + params["pos_emb"][None]).astype(jnp.bfloat16)

    # ---- batch blocking & padding ----
    Bblk = block_b
    nblk = max(2, pl.cdiv(B, Bblk))     # >=2 grid steps so both v7x TensorCores get work
    Bpad = nblk * Bblk
    pad_b = Bpad - B
    emb_p = jnp.pad(emb, ((0, pad_b), (0, 0), (0, 0)))
    mask_p = jnp.pad(attention_mask.astype(jnp.float32), ((0, pad_b), (0, 0)))
    bias_p = jnp.pad(head_bias, ((0, pad_b), (0, 0)))

    per_batch = (emb_p, mask_p, bias_p)
    resident = (wqkv, bqkv, wo, params["bo"],
                params["ln1_g"], params["ln1_b"],
                w1, params["b1"], w2, params["b2"],
                params["ln2_g"], params["ln2_b"],
                w_cls)

    def batch_spec(a):
        tail = tuple(a.shape[1:])
        zeros = (0,) * len(tail)
        return pl.BlockSpec((Bblk,) + tail, lambda b, zeros=zeros: (b,) + zeros)

    def resident_spec(a, single_buffer):
        nd = a.ndim
        if single_buffer:
            # Constant index_map: block never changes -> single-buffer to halve VMEM use.
            return pl.BlockSpec(tuple(a.shape), lambda b, nd=nd: (0,) * nd,
                                pipeline_mode=pl.Buffered(1))
        return pl.BlockSpec(tuple(a.shape), lambda b, nd=nd: (0,) * nd)

    out_spec = pl.BlockSpec((Bblk, LANE), lambda b: (b, 0))

    # VMEM budget from actual working set (clamped so it is also valid on v7x's 64 MiB).
    nbytes = lambda a: a.size * a.dtype.itemsize
    weight_bytes = sum(nbytes(a) for a in resident)
    block_bytes = 2 * (sum(nbytes(a) for a in per_batch) // nblk + Bblk * LANE * 4)
    scratch_bytes = 4 * Bblk * S * (3 * H + S + 4 * H + F + LANE)       # f32 intermediates
    vmem_limit = int(min(max(2 * weight_bytes + block_bytes + 2 * scratch_bytes + (4 << 20),
                             16 << 20),
                         64 << 20))

    # Advisory cost estimate for XLA's scheduler.
    flops = int(Bpad * (2 * S * H * 3 * H          # fused QKV
                        + 2 * 2 * S * S * H        # scores + context
                        + 2 * S * H * H            # output projection
                        + 2 * 2 * S * H * F        # FFN
                        + 2 * H * LANE))           # CLS head
    transcend = int(Bpad * (S * S + S * F + S))
    bytes_accessed = int(sum(nbytes(a) for a in per_batch) + weight_bytes + Bpad * LANE * 4)

    def build(single_buffer_weights):
        return pl.pallas_call(
            fused_climate_kernel,
            out_shape=jax.ShapeDtypeStruct((Bpad, LANE), jnp.float32),
            grid=(nblk,),
            in_specs=([batch_spec(a) for a in per_batch]
                      + [resident_spec(a, single_buffer_weights) for a in resident]),
            out_specs=out_spec,
            compiler_params=pltpu.CompilerParams(
                dimension_semantics=("parallel",),
                vmem_limit_bytes=vmem_limit),
            cost_estimate=pl.CostEstimate(flops=flops, transcendentals=transcend,
                                          bytes_accessed=bytes_accessed),
        )

    args = per_batch + resident
    try:
        out = build(True)(*args)
        jax.block_until_ready(out)
    except Exception:
        # pl.Buffered(1) support varies across JAX versions; fall back to default buffering.
        out = build(False)(*args)

    return out[:B, :L]                                                   # (B, num_labels)


# ------------------------------ parameters ------------------------------------

def init_params(key, vocab, S, H, F, tfidf_dim, keyword_dim, num_labels):
    ks = jax.random.split(key, 12)
    n = lambda k, shp: (0.02 * jax.random.normal(k, shp)).astype(jnp.float32)
    D = H + tfidf_dim + keyword_dim
    return {
        "tok_emb": n(ks[0], (vocab, H)),
        "pos_emb": n(ks[1], (S, H)),
        "wq": n(ks[2], (H, H)), "bq": jnp.zeros((1, H), jnp.float32),
        "wk": n(ks[3], (H, H)), "bk": jnp.zeros((1, H), jnp.float32),
        "wv": n(ks[4], (H, H)), "bv": jnp.zeros((1, H), jnp.float32),
        "wo": n(ks[5], (H, H)), "bo": jnp.zeros((1, H), jnp.float32),
        "ln1_g": jnp.ones((1, H), jnp.float32), "ln1_b": jnp.zeros((1, H), jnp.float32),
        "w1": n(ks[6], (H, F)), "b1": jnp.zeros((1, F), jnp.float32),
        "w2": n(ks[7], (F, H)), "b2": jnp.zeros((1, H), jnp.float32),
        "ln2_g": jnp.ones((1, H), jnp.float32), "ln2_b": jnp.zeros((1, H), jnp.float32),
        "fc_w": n(ks[8], (D, num_labels)),
        "fc_b": jnp.zeros((1, num_labels), jnp.float32),
    }


# --------------------------------- main ---------------------------------------

if __name__ == "__main__":
    B, S, H, F = 2, 8, 32, 64
    VOCAB, TFIDF_DIM, KEYWORD_DIM, NUM_LABELS = 100, 16, 4, 3

    root = jax.random.PRNGKey(0)
    k_ids, k_tfidf, k_kw, k_params = jax.random.split(root, 4)

    input_ids = jax.random.randint(k_ids, (B, S), 0, VOCAB, dtype=jnp.int32)
    # first row fully valid, second row has 3 padding tokens
    attention_mask = jnp.stack([
        jnp.ones((S,), jnp.float32),
        jnp.concatenate([jnp.ones((S - 3,), jnp.float32), jnp.zeros((3,), jnp.float32)]),
    ])
    tfidf_features = jax.random.uniform(k_tfidf, (B, TFIDF_DIM), jnp.float32)
    keyword_feats = jax.random.randint(k_kw, (B, KEYWORD_DIM), 0, 5).astype(jnp.float32)

    params = init_params(k_params, VOCAB, S, H, F, TFIDF_DIM, KEYWORD_DIM, NUM_LABELS)

    logits = climate_model_forward(params, input_ids, attention_mask,
                                   tfidf_features, keyword_feats)
    jax.block_until_ready(logits)
    assert logits.shape == (B, NUM_LABELS) and logits.dtype == jnp.float32
    print("KERNEL_OK")
</pallas_src>

<mosaic_0001>
module attributes {stable_mosaic.version = 11 : i64} {
  func.func @fused_climate_kernel(%arg0: i32, %arg1: memref<8x8x32xbf16, #tpu.memory_space<vmem>>, %arg2: memref<8x8xf32, #tpu.memory_space<vmem>>, %arg3: memref<8x128xf32, #tpu.memory_space<vmem>>, %arg4: memref<32x96xbf16, #tpu.memory_space<vmem>>, %arg5: memref<1x96xf32, #tpu.memory_space<vmem>>, %arg6: memref<32x32xbf16, #tpu.memory_space<vmem>>, %arg7: memref<1x32xf32, #tpu.memory_space<vmem>>, %arg8: memref<1x32xf32, #tpu.memory_space<vmem>>, %arg9: memref<1x32xf32, #tpu.memory_space<vmem>>, %arg10: memref<32x64xbf16, #tpu.memory_space<vmem>>, %arg11: memref<1x64xf32, #tpu.memory_space<vmem>>, %arg12: memref<64x32xbf16, #tpu.memory_space<vmem>>, %arg13: memref<1x32xf32, #tpu.memory_space<vmem>>, %arg14: memref<1x32xf32, #tpu.memory_space<vmem>>, %arg15: memref<1x32xf32, #tpu.memory_space<vmem>>, %arg16: memref<32x128xbf16, #tpu.memory_space<vmem>>, %arg17: memref<8x128xf32, #tpu.memory_space<vmem>>) attributes {dimension_semantics = [#tpu.dimension_semantics<parallel>], iteration_bounds = array<i64: 2>, scalar_prefetch = 0 : i64, scratch_operands = 0 : i64, tpu.core_type = #tpu.core_type<tc>, window_params = [{transform_indices = @transform_0, window_bounds = array<i64: 8, 8, 32>}, {transform_indices = @transform_1, window_bounds = array<i64: 8, 8>}, {transform_indices = @transform_2, window_bounds = array<i64: 8, 128>}, {pipeline_mode = #tpu.pipeline_mode<synchronous>, transform_indices = @transform_3, window_bounds = array<i64: 32, 96>}, {pipeline_mode = #tpu.pipeline_mode<synchronous>, transform_indices = @transform_4, window_bounds = array<i64: 1, 96>}, {pipeline_mode = #tpu.pipeline_mode<synchronous>, transform_indices = @transform_5, window_bounds = array<i64: 32, 32>}, {pipeline_mode = #tpu.pipeline_mode<synchronous>, transform_indices = @transform_6, window_bounds = array<i64: 1, 32>}, {pipeline_mode = #tpu.pipeline_mode<synchronous>, transform_indices = @transform_7, window_bounds = array<i64: 1, 32>}, {pipeline_mode = #tpu.pipeline_mode<synchronous>, transform_indices = @transform_8, window_bounds = array<i64: 1, 32>}, {pipeline_mode = #tpu.pipeline_mode<synchronous>, transform_indices = @transform_9, window_bounds = array<i64: 32, 64>}, {pipeline_mode = #tpu.pipeline_mode<synchronous>, transform_indices = @transform_10, window_bounds = array<i64: 1, 64>}, {pipeline_mode = #tpu.pipeline_mode<synchronous>, transform_indices = @transform_11, window_bounds = array<i64: 64, 32>}, {pipeline_mode = #tpu.pipeline_mode<synchronous>, transform_indices = @transform_12, window_bounds = array<i64: 1, 32>}, {pipeline_mode = #tpu.pipeline_mode<synchronous>, transform_indices = @transform_13, window_bounds = array<i64: 1, 32>}, {pipeline_mode = #tpu.pipeline_mode<synchronous>, transform_indices = @transform_14, window_bounds = array<i64: 1, 32>}, {pipeline_mode = #tpu.pipeline_mode<synchronous>, transform_indices = @transform_15, window_bounds = array<i64: 32, 128>}, {transform_indices = @transform_16, window_bounds = array<i64: 8, 128>}]} {
    %c0 = arith.constant 0 : index
    %c0_0 = arith.constant 0 : index
    %c0_1 = arith.constant 0 : index
    %0 = vector.load %arg1[%c0, %c0_0, %c0_1] : memref<8x8x32xbf16, #tpu.memory_space<vmem>>, vector<8x8x32xbf16>
    %1 = vector.shape_cast %0 : vector<8x8x32xbf16> to vector<64x32xbf16>
    %c0_2 = arith.constant 0 : index
    %c0_3 = arith.constant 0 : index
    %2 = vector.load %arg4[%c0_2, %c0_3] : memref<32x96xbf16, #tpu.memory_space<vmem>>, vector<32x96xbf16>
    %cst = arith.constant dense<0.000000e+00> : vector<64x96xf32>
    %3 = tpu.matmul %1, %2, %cst {dimension_numbers = #tpu.dot_dimension_numbers<[1], [0], [0], [1], [0, 0, 1, 1], [], []>} : vector<64x32xbf16>, vector<32x96xbf16>, vector<64x96xf32> -> vector<64x96xf32>
    %c0_4 = arith.constant 0 : index
    %c0_5 = arith.constant 0 : index
    %4 = vector.load %arg5[%c0_4, %c0_5] : memref<1x96xf32, #tpu.memory_space<vmem>>, vector<1x96xf32>
    %5 = vector.broadcast %4 : vector<1x96xf32> to vector<64x96xf32>
    %6 = arith.addf %3, %5 : vector<64x96xf32>
    %7 = vector.extract_strided_slice %6 {offsets = [0, 0], sizes = [64, 32], strides = [1, 1]} : vector<64x96xf32> to vector<64x32xf32>
    %8 = vector.shape_cast %7 : vector<64x32xf32> to vector<8x8x32xf32>
    %9 = arith.truncf %8 : vector<8x8x32xf32> to vector<8x8x32xbf16>
    %10 = vector.extract_strided_slice %6 {offsets = [0, 32], sizes = [64, 32], strides = [1, 1]} : vector<64x96xf32> to vector<64x32xf32>
    %11 = vector.shape_cast %10 : vector<64x32xf32> to vector<8x8x32xf32>
    %12 = arith.truncf %11 : vector<8x8x32xf32> to vector<8x8x32xbf16>
    %13 = vector.extract_strided_slice %6 {offsets = [0, 64], sizes = [64, 32], strides = [1, 1]} : vector<64x96xf32> to vector<64x32xf32>
    %14 = vector.shape_cast %13 : vector<64x32xf32> to vector<8x8x32xf32>
    %15 = arith.truncf %14 : vector<8x8x32xf32> to vector<8x8x32xbf16>
    %c0_6 = arith.constant 0 : index
    %c0_7 = arith.constant 0 : index
    %16 = vector.load %arg2[%c0_6, %c0_7] : memref<8x8xf32, #tpu.memory_space<vmem>>, vector<8x8xf32>
    %cst_8 = arith.constant 0.000000e+00 : f32
    %17 = vector.broadcast %cst_8 : f32 to vector<8x8xf32>
    %18 = arith.cmpf oeq, %16, %17 : vector<8x8xf32>
    %cst_9 = arith.constant -1.000000e+09 : f32
    %cst_10 = arith.constant 0.000000e+00 : f32
    %19 = vector.broadcast %cst_9 : f32 to vector<8x8xf32>
    %20 = vector.broadcast %cst_10 : f32 to vector<8x8xf32>
    %21 = arith.select %18, %19, %20 : vector<8x8xi1>, vector<8x8xf32>
    %22 = vector.shape_cast %21 : vector<8x8xf32> to vector<8x1x8xf32>
    "tpu.trace_start"() <{level = 10 : i32, message = "bqd,bkd->bqk"}> : () -> ()
    %cst_11 = arith.constant dense<0.000000e+00> : vector<8x8x8xf32>
    %23 = tpu.matmul %9, %12, %cst_11 {dimension_numbers = #tpu.dot_dimension_numbers<[2], [2], [1], [1], [0, 0, 0, 1, 1, 1], [0], [0]>} : vector<8x8x32xbf16>, vector<8x8x32xbf16>, vector<8x8x8xf32> -> vector<8x8x8xf32>
    "tpu.trace_stop"() : () -> ()
    %24 = vector.broadcast %22 : vector<8x1x8xf32> to vector<8x8x8xf32>
    %25 = arith.addf %23, %24 : vector<8x8x8xf32>
    %cst_12 = arith.constant dense<0xFF800000> : vector<8x8xf32>
    %26 = vector.multi_reduction <maximumf>, %25, %cst_12 [2] : vector<8x8x8xf32> to vector<8x8xf32>
    %27 = vector.shape_cast %26 : vector<8x8xf32> to vector<8x8x1xf32>
    %28 = vector.broadcast %27 : vector<8x8x1xf32> to vector<8x8x8xf32>
    %29 = arith.subf %25, %28 : vector<8x8x8xf32>
    %30 = math.exp %29 : vector<8x8x8xf32>
    %cst_13 = arith.constant dense<0.000000e+00> : vector<8x8xf32>
    %31 = vector.multi_reduction <add>, %30, %cst_13 [2] : vector<8x8x8xf32> to vector<8x8xf32>
    %32 = vector.shape_cast %31 : vector<8x8xf32> to vector<8x8x1xf32>
    %33 = tpu.reciprocal %32 {approx = true} : vector<8x8x1xf32> -> vector<8x8x1xf32>
    %34 = vector.broadcast %33 : vector<8x8x1xf32> to vector<8x8x8xf32>
    %35 = arith.mulf %30, %34 : vector<8x8x8xf32>
    %36 = arith.truncf %35 : vector<8x8x8xf32> to vector<8x8x8xbf16>
    "tpu.trace_start"() <{level = 10 : i32, message = "bqk,bkd->bqd"}> : () -> ()
    %cst_14 = arith.constant dense<0.000000e+00> : vector<8x8x32xf32>
    %37 = tpu.matmul %36, %15, %cst_14 {dimension_numbers = #tpu.dot_dimension_numbers<[2], [1], [1], [2], [0, 0, 0, 1, 1, 2], [0], [0]>} : vector<8x8x8xbf16>, vector<8x8x32xbf16>, vector<8x8x32xf32> -> vector<8x8x32xf32>
    "tpu.trace_stop"() : () -> ()
    %38 = vector.shape_cast %37 : vector<8x8x32xf32> to vector<64x32xf32>
    %39 = arith.truncf %38 : vector<64x32xf32> to vector<64x32xbf16>
    %c0_15 = arith.constant 0 : index
    %c0_16 = arith.constant 0 : index
    %40 = vector.load %arg6[%c0_15, %c0_16] : memref<32x32xbf16, #tpu.memory_space<vmem>>, vector<32x32xbf16>
    %cst_17 = arith.constant dense<0.000000e+00> : vector<64x32xf32>
    %41 = tpu.matmul %39, %40, %cst_17 {dimension_numbers = #tpu.dot_dimension_numbers<[1], [0], [0], [1], [0, 0, 1, 1], [], []>} : vector<64x32xbf16>, vector<32x32xbf16>, vector<64x32xf32> -> vector<64x32xf32>
    %c0_18 = arith.constant 0 : index
    %c0_19 = arith.constant 0 : index
    %42 = vector.load %arg7[%c0_18, %c0_19] : memref<1x32xf32, #tpu.memory_space<vmem>>, vector<1x32xf32>
    %43 = vector.broadcast %42 : vector<1x32xf32> to vector<64x32xf32>
    %44 = arith.addf %41, %43 : vector<64x32xf32>
    %45 = arith.extf %1 : vector<64x32xbf16> to vector<64x32xf32>
    %46 = arith.addf %45, %44 : vector<64x32xf32>
    %c0_20 = arith.constant 0 : index
    %c0_21 = arith.constant 0 : index
    %47 = vector.load %arg8[%c0_20, %c0_21] : memref<1x32xf32, #tpu.memory_space<vmem>>, vector<1x32xf32>
    %c0_22 = arith.constant 0 : index
    %c0_23 = arith.constant 0 : index
    %48 = vector.load %arg9[%c0_22, %c0_23] : memref<1x32xf32, #tpu.memory_space<vmem>>, vector<1x32xf32>
    %cst_24 = arith.constant dense<0.000000e+00> : vector<64xf32>
    %49 = vector.multi_reduction <add>, %46, %cst_24 [1] : vector<64x32xf32> to vector<64xf32>
    %50 = vector.shape_cast %49 : vector<64xf32> to vector<64x1xf32>
    %cst_25 = arith.constant 3.200000e+01 : f32
    %51 = vector.broadcast %cst_25 : f32 to vector<64x1xf32>
    %52 = arith.divf %50, %51 : vector<64x1xf32>
    %53 = vector.broadcast %52 : vector<64x1xf32> to vector<64x32xf32>
    %54 = arith.subf %46, %53 : vector<64x32xf32>
    %55 = arith.mulf %54, %54 : vector<64x32xf32>
    %cst_26 = arith.constant dense<0.000000e+00> : vector<64xf32>
    %56 = vector.multi_reduction <add>, %55, %cst_26 [1] : vector<64x32xf32> to vector<64xf32>
    %57 = vector.shape_cast %56 : vector<64xf32> to vector<64x1xf32>
    %cst_27 = arith.constant 3.200000e+01 : f32
    %58 = vector.broadcast %cst_27 : f32 to vector<64x1xf32>
    %59 = arith.divf %57, %58 : vector<64x1xf32>
    %60 = vector.broadcast %52 : vector<64x1xf32> to vector<64x32xf32>
    %61 = arith.subf %46, %60 : vector<64x32xf32>
    %cst_28 = arith.constant 9.99999996E-13 : f32
    %62 = vector.broadcast %cst_28 : f32 to vector<64x1xf32>
    %63 = arith.addf %59, %62 : vector<64x1xf32>
    %64 = math.rsqrt %63 : vector<64x1xf32>
    %65 = vector.broadcast %64 : vector<64x1xf32> to vector<64x32xf32>
    %66 = arith.mulf %61, %65 : vector<64x32xf32>
    %67 = vector.broadcast %47 : vector<1x32xf32> to vector<64x32xf32>
    %68 = arith.mulf %66, %67 : vector<64x32xf32>
    %69 = vector.broadcast %48 : vector<1x32xf32> to vector<64x32xf32>
    %70 = arith.addf %68, %69 : vector<64x32xf32>
    %71 = arith.truncf %70 : vector<64x32xf32> to vector<64x32xbf16>
    %c0_29 = arith.constant 0 : index
    %c0_30 = arith.constant 0 : index
    %72 = vector.load %arg10[%c0_29, %c0_30] : memref<32x64xbf16, #tpu.memory_space<vmem>>, vector<32x64xbf16>
    %cst_31 = arith.constant dense<0.000000e+00> : vector<64x64xf32>
    %73 = tpu.matmul %71, %72, %cst_31 {dimension_numbers = #tpu.dot_dimension_numbers<[1], [0], [0], [1], [0, 0, 1, 1], [], []>} : vector<64x32xbf16>, vector<32x64xbf16>, vector<64x64xf32> -> vector<64x64xf32>
    %c0_32 = arith.constant 0 : index
    %c0_33 = arith.constant 0 : index
    %74 = vector.load %arg11[%c0_32, %c0_33] : memref<1x64xf32, #tpu.memory_space<vmem>>, vector<1x64xf32>
    %75 = vector.broadcast %74 : vector<1x64xf32> to vector<64x64xf32>
    %76 = arith.addf %73, %75 : vector<64x64xf32>
    %cst_34 = arith.constant 5.000000e-01 : f32
    %77 = vector.broadcast %cst_34 : f32 to vector<64x64xf32>
    %78 = arith.mulf %77, %76 : vector<64x64xf32>
    %cst_35 = arith.constant 4.471500e-02 : f32
    %79 = vector.broadcast %cst_35 : f32 to vector<64x64xf32>
    %80 = arith.mulf %79, %76 : vector<64x64xf32>
    %81 = arith.mulf %80, %76 : vector<64x64xf32>
    %82 = arith.mulf %81, %76 : vector<64x64xf32>
    %83 = arith.addf %76, %82 : vector<64x64xf32>
    %cst_36 = arith.constant 0.797884583 : f32
    %84 = vector.broadcast %cst_36 : f32 to vector<64x64xf32>
    %85 = arith.mulf %84, %83 : vector<64x64xf32>
    %86 = math.tanh %85 : vector<64x64xf32>
    %cst_37 = arith.constant 1.000000e+00 : f32
    %87 = vector.broadcast %cst_37 : f32 to vector<64x64xf32>
    %88 = arith.addf %87, %86 : vector<64x64xf32>
    %89 = arith.mulf %78, %88 : vector<64x64xf32>
    %90 = arith.truncf %89 : vector<64x64xf32> to vector<64x64xbf16>
    %c0_38 = arith.constant 0 : index
    %c0_39 = arith.constant 0 : index
    %91 = vector.load %arg12[%c0_38, %c0_39] : memref<64x32xbf16, #tpu.memory_space<vmem>>, vector<64x32xbf16>
    %cst_40 = arith.constant dense<0.000000e+00> : vector<64x32xf32>
    %92 = tpu.matmul %90, %91, %cst_40 {dimension_numbers = #tpu.dot_dimension_numbers<[1], [0], [0], [1], [0, 0, 1, 1], [], []>} : vector<64x64xbf16>, vector<64x32xbf16>, vector<64x32xf32> -> vector<64x32xf32>
    %c0_41 = arith.constant 0 : index
    %c0_42 = arith.constant 0 : index
    %93 = vector.load %arg13[%c0_41, %c0_42] : memref<1x32xf32, #tpu.memory_space<vmem>>, vector<1x32xf32>
    %94 = vector.broadcast %93 : vector<1x32xf32> to vector<64x32xf32>
    %95 = arith.addf %92, %94 : vector<64x32xf32>
    %96 = arith.addf %70, %95 : vector<64x32xf32>
    %c0_43 = arith.constant 0 : index
    %c0_44 = arith.constant 0 : index
    %97 = vector.load %arg14[%c0_43, %c0_44] : memref<1x32xf32, #tpu.memory_space<vmem>>, vector<1x32xf32>
    %c0_45 = arith.constant 0 : index
    %c0_46 = arith.constant 0 : index
    %98 = vector.load %arg15[%c0_45, %c0_46] : memref<1x32xf32, #tpu.memory_space<vmem>>, vector<1x32xf32>
    %cst_47 = arith.constant dense<0.000000e+00> : vector<64xf32>
    %99 = vector.multi_reduction <add>, %96, %cst_47 [1] : vector<64x32xf32> to vector<64xf32>
    %100 = vector.shape_cast %99 : vector<64xf32> to vector<64x1xf32>
    %cst_48 = arith.constant 3.200000e+01 : f32
    %101 = vector.broadcast %cst_48 : f32 to vector<64x1xf32>
    %102 = arith.divf %100, %101 : vector<64x1xf32>
    %103 = vector.broadcast %102 : vector<64x1xf32> to vector<64x32xf32>
    %104 = arith.subf %96, %103 : vector<64x32xf32>
    %105 = arith.mulf %104, %104 : vector<64x32xf32>
    %cst_49 = arith.constant dense<0.000000e+00> : vector<64xf32>
    %106 = vector.multi_reduction <add>, %105, %cst_49 [1] : vector<64x32xf32> to vector<64xf32>
    %107 = vector.shape_cast %106 : vector<64xf32> to vector<64x1xf32>
    %cst_50 = arith.constant 3.200000e+01 : f32
    %108 = vector.broadcast %cst_50 : f32 to vector<64x1xf32>
    %109 = arith.divf %107, %108 : vector<64x1xf32>
    %110 = vector.broadcast %102 : vector<64x1xf32> to vector<64x32xf32>
    %111 = arith.subf %96, %110 : vector<64x32xf32>
    %cst_51 = arith.constant 9.99999996E-13 : f32
    %112 = vector.broadcast %cst_51 : f32 to vector<64x1xf32>
    %113 = arith.addf %109, %112 : vector<64x1xf32>
    %114 = math.rsqrt %113 : vector<64x1xf32>
    %115 = vector.broadcast %114 : vector<64x1xf32> to vector<64x32xf32>
    %116 = arith.mulf %111, %115 : vector<64x32xf32>
    %117 = vector.broadcast %97 : vector<1x32xf32> to vector<64x32xf32>
    %118 = arith.mulf %116, %117 : vector<64x32xf32>
    %119 = vector.broadcast %98 : vector<1x32xf32> to vector<64x32xf32>
    %120 = arith.addf %118, %119 : vector<64x32xf32>
    %121 = vector.shape_cast %120 : vector<64x32xf32> to vector<8x8x32xf32>
    %122 = vector.extract_strided_slice %121 {offsets = [0, 0, 0], sizes = [8, 1, 32], strides = [1, 1, 1]} : vector<8x8x32xf32> to vector<8x1x32xf32>
    %123 = vector.shape_cast %122 : vector<8x1x32xf32> to vector<8x32xf32>
    %124 = arith.truncf %123 : vector<8x32xf32> to vector<8x32xbf16>
    %c0_52 = arith.constant 0 : index
    %c0_53 = arith.constant 0 : index
    %125 = vector.load %arg16[%c0_52, %c0_53] : memref<32x128xbf16, #tpu.memory_space<vmem>>, vector<32x128xbf16>
    %cst_54 = arith.constant dense<0.000000e+00> : vector<8x128xf32>
    %126 = tpu.matmul %124, %125, %cst_54 {dimension_numbers = #tpu.dot_dimension_numbers<[1], [0], [0], [1], [0, 0, 1, 1], [], []>} : vector<8x32xbf16>, vector<32x128xbf16>, vector<8x128xf32> -> vector<8x128xf32>
    %c0_55 = arith.constant 0 : index
    %c0_56 = arith.constant 0 : index
    %127 = vector.load %arg3[%c0_55, %c0_56] : memref<8x128xf32, #tpu.memory_space<vmem>>, vector<8x128xf32>
    %128 = arith.addf %126, %127 : vector<8x128xf32>
    %c0_57 = arith.constant 0 : index
    %c0_58 = arith.constant 0 : index
    %129 = vector.load %arg17[%c0_57, %c0_58] : memref<8x128xf32, #tpu.memory_space<vmem>>, vector<8x128xf32>
    tpu.vector_store %arg17[%c0_57, %c0_58], %128 {strides = array<i32>} : memref<8x128xf32, #tpu.memory_space<vmem>>, vector<8x128xf32>,
    return
  }
  func.func @transform_0(%arg0: i32) -> (i32, i32, i32) {
    %c0_i32 = arith.constant 0 : i32
    %c0_i32_0 = arith.constant 0 : i32
    %c0_i32_1 = arith.constant 0 : i32
    return %arg0, %c0_i32, %c0_i32_0 : i32, i32, i32
  }
  func.func @transform_1(%arg0: i32) -> (i32, i32) {
    %c0_i32 = arith.constant 0 : i32
    %c0_i32_0 = arith.constant 0 : i32
    return %arg0, %c0_i32 : i32, i32
  }
  func.func @transform_2(%arg0: i32) -> (i32, i32) {
    %c0_i32 = arith.constant 0 : i32
    %c0_i32_0 = arith.constant 0 : i32
    return %arg0, %c0_i32 : i32, i32
  }
  func.func @transform_3(%arg0: i32) -> (i32, i32) {
    %c0_i32 = arith.constant 0 : i32
    %c0_i32_0 = arith.constant 0 : i32
    %c0_i32_1 = arith.constant 0 : i32
    return %c0_i32, %c0_i32_0 : i32, i32
  }
  func.func @transform_4(%arg0: i32) -> (i32, i32) {
    %c0_i32 = arith.constant 0 : i32
    %c0_i32_0 = arith.constant 0 : i32
    %c0_i32_1 = arith.constant 0 : i32
    return %c0_i32, %c0_i32_0 : i32, i32
  }
  func.func @transform_5(%arg0: i32) -> (i32, i32) {
    %c0_i32 = arith.constant 0 : i32
    %c0_i32_0 = arith.constant 0 : i32
    %c0_i32_1 = arith.constant 0 : i32
    return %c0_i32, %c0_i32_0 : i32, i32
  }
  func.func @transform_6(%arg0: i32) -> (i32, i32) {
    %c0_i32 = arith.constant 0 : i32
    %c0_i32_0 = arith.constant 0 : i32
    %c0_i32_1 = arith.constant 0 : i32
    return %c0_i32, %c0_i32_0 : i32, i32
  }
  func.func @transform_7(%arg0: i32) -> (i32, i32) {
    %c0_i32 = arith.constant 0 : i32
    %c0_i32_0 = arith.constant 0 : i32
    %c0_i32_1 = arith.constant 0 : i32
    return %c0_i32, %c0_i32_0 : i32, i32
  }
  func.func @transform_8(%arg0: i32) -> (i32, i32) {
    %c0_i32 = arith.constant 0 : i32
    %c0_i32_0 = arith.constant 0 : i32
    %c0_i32_1 = arith.constant 0 : i32
    return %c0_i32, %c0_i32_0 : i32, i32
  }
  func.func @transform_9(%arg0: i32) -> (i32, i32) {
    %c0_i32 = arith.constant 0 : i32
    %c0_i32_0 = arith.constant 0 : i32
    %c0_i32_1 = arith.constant 0 : i32
    return %c0_i32, %c0_i32_0 : i32, i32
  }
  func.func @transform_10(%arg0: i32) -> (i32, i32) {
    %c0_i32 = arith.constant 0 : i32
    %c0_i32_0 = arith.constant 0 : i32
    %c0_i32_1 = arith.constant 0 : i32
    return %c0_i32, %c0_i32_0 : i32, i32
  }
  func.func @transform_11(%arg0: i32) -> (i32, i32) {
    %c0_i32 = arith.constant 0 : i32
    %c0_i32_0 = arith.constant 0 : i32
    %c0_i32_1 = arith.constant 0 : i32
    return %c0_i32, %c0_i32_0 : i32, i32
  }
  func.func @transform_12(%arg0: i32) -> (i32, i32) {
    %c0_i32 = arith.constant 0 : i32
    %c0_i32_0 = arith.constant 0 : i32
    %c0_i32_1 = arith.constant 0 : i32
    return %c0_i32, %c0_i32_0 : i32, i32
  }
  func.func @transform_13(%arg0: i32) -> (i32, i32) {
    %c0_i32 = arith.constant 0 : i32
    %c0_i32_0 = arith.constant 0 : i32
    %c0_i32_1 = arith.constant 0 : i32
    return %c0_i32, %c0_i32_0 : i32, i32
  }
  func.func @transform_14(%arg0: i32) -> (i32, i32) {
    %c0_i32 = arith.constant 0 : i32
    %c0_i32_0 = arith.constant 0 : i32
    %c0_i32_1 = arith.constant 0 : i32
    return %c0_i32, %c0_i32_0 : i32, i32
  }
  func.func @transform_15(%arg0: i32) -> (i32, i32) {
    %c0_i32 = arith.constant 0 : i32
    %c0_i32_0 = arith.constant 0 : i32
    %c0_i32_1 = arith.constant 0 : i32
    return %c0_i32, %c0_i32_0 : i32, i32
  }
  func.func @transform_16(%arg0: i32) -> (i32, i32) {
    %c0_i32 = arith.constant 0 : i32
    %c0_i32_0 = arith.constant 0 : i32
    return %arg0, %c0_i32 : i32, i32
  }
}

module attributes {stable_mosaic.version = 11 : i64} {
  func.func @fused_climate_kernel(%arg0: i32, %arg1: memref<8x8x32xbf16, #tpu.memory_space<vmem>>, %arg2: memref<8x8xf32, #tpu.memory_space<vmem>>, %arg3: memref<8x128xf32, #tpu.memory_space<vmem>>, %arg4: memref<32x96xbf16, #tpu.memory_space<vmem>>, %arg5: memref<1x96xf32, #tpu.memory_space<vmem>>, %arg6: memref<32x32xbf16, #tpu.memory_space<vmem>>, %arg7: memref<1x32xf32, #tpu.memory_space<vmem>>, %arg8: memref<1x32xf32, #tpu.memory_space<vmem>>, %arg9: memref<1x32xf32, #tpu.memory_space<vmem>>, %arg10: memref<32x64xbf16, #tpu.memory_space<vmem>>, %arg11: memref<1x64xf32, #tpu.memory_space<vmem>>, %arg12: memref<64x32xbf16, #tpu.memory_space<vmem>>, %arg13: memref<1x32xf32, #tpu.memory_space<vmem>>, %arg14: memref<1x32xf32, #tpu.memory_space<vmem>>, %arg15: memref<1x32xf32, #tpu.memory_space<vmem>>, %arg16: memref<32x128xbf16, #tpu.memory_space<vmem>>, %arg17: memref<8x128xf32, #tpu.memory_space<vmem>>) attributes {dimension_semantics = [#tpu.dimension_semantics<parallel>], iteration_bounds = array<i64: 2>, scalar_prefetch = 0 : i64, scratch_operands = 0 : i64, tpu.core_type = #tpu.core_type<tc>, window_params = [{transform_indices = @transform_0, window_bounds = array<i64: 8, 8, 32>}, {transform_indices = @transform_1, window_bounds = array<i64: 8, 8>}, {transform_indices = @transform_2, window_bounds = array<i64: 8, 128>}, {pipeline_mode = #tpu.pipeline_mode<synchronous>, transform_indices = @transform_3, window_bounds = array<i64: 32, 96>}, {pipeline_mode = #tpu.pipeline_mode<synchronous>, transform_indices = @transform_4, window_bounds = array<i64: 1, 96>}, {pipeline_mode = #tpu.pipeline_mode<synchronous>, transform_indices = @transform_5, window_bounds = array<i64: 32, 32>}, {pipeline_mode = #tpu.pipeline_mode<synchronous>, transform_indices = @transform_6, window_bounds = array<i64: 1, 32>}, {pipeline_mode = #tpu.pipeline_mode<synchronous>, transform_indices = @transform_7, window_bounds = array<i64: 1, 32>}, {pipeline_mode = #tpu.pipeline_mode<synchronous>, transform_indices = @transform_8, window_bounds = array<i64: 1, 32>}, {pipeline_mode = #tpu.pipeline_mode<synchronous>, transform_indices = @transform_9, window_bounds = array<i64: 32, 64>}, {pipeline_mode = #tpu.pipeline_mode<synchronous>, transform_indices = @transform_10, window_bounds = array<i64: 1, 64>}, {pipeline_mode = #tpu.pipeline_mode<synchronous>, transform_indices = @transform_11, window_bounds = array<i64: 64, 32>}, {pipeline_mode = #tpu.pipeline_mode<synchronous>, transform_indices = @transform_12, window_bounds = array<i64: 1, 32>}, {pipeline_mode = #tpu.pipeline_mode<synchronous>, transform_indices = @transform_13, window_bounds = array<i64: 1, 32>}, {pipeline_mode = #tpu.pipeline_mode<synchronous>, transform_indices = @transform_14, window_bounds = array<i64: 1, 32>}, {pipeline_mode = #tpu.pipeline_mode<synchronous>, transform_indices = @transform_15, window_bounds = array<i64: 32, 128>}, {transform_indices = @transform_16, window_bounds = array<i64: 8, 128>}]} {
    %c0 = arith.constant 0 : index
    %c0_0 = arith.constant 0 : index
    %c0_1 = arith.constant 0 : index
    %0 = vector.load %arg1[%c0, %c0_0, %c0_1] : memref<8x8x32xbf16, #tpu.memory_space<vmem>>, vector<8x8x32xbf16>
    %1 = vector.shape_cast %0 : vector<8x8x32xbf16> to vector<64x32xbf16>
    %c0_2 = arith.constant 0 : index
    %c0_3 = arith.constant 0 : index
    %2 = vector.load %arg4[%c0_2, %c0_3] : memref<32x96xbf16, #tpu.memory_space<vmem>>, vector<32x96xbf16>
    %cst = arith.constant dense<0.000000e+00> : vector<64x96xf32>
    %3 = tpu.matmul %1, %2, %cst {dimension_numbers = #tpu.dot_dimension_numbers<[1], [0], [0], [1], [0, 0, 1, 1], [], []>} : vector<64x32xbf16>, vector<32x96xbf16>, vector<64x96xf32> -> vector<64x96xf32>
    %c0_4 = arith.constant 0 : index
    %c0_5 = arith.constant 0 : index
    %4 = vector.load %arg5[%c0_4, %c0_5] : memref<1x96xf32, #tpu.memory_space<vmem>>, vector<1x96xf32>
    %5 = vector.broadcast %4 : vector<1x96xf32> to vector<64x96xf32>
    %6 = arith.addf %3, %5 : vector<64x96xf32>
    %7 = vector.extract_strided_slice %6 {offsets = [0, 0], sizes = [64, 32], strides = [1, 1]} : vector<64x96xf32> to vector<64x32xf32>
    %8 = vector.shape_cast %7 : vector<64x32xf32> to vector<8x8x32xf32>
    %9 = arith.truncf %8 : vector<8x8x32xf32> to vector<8x8x32xbf16>
    %10 = vector.extract_strided_slice %6 {offsets = [0, 32], sizes = [64, 32], strides = [1, 1]} : vector<64x96xf32> to vector<64x32xf32>
    %11 = vector.shape_cast %10 : vector<64x32xf32> to vector<8x8x32xf32>
    %12 = arith.truncf %11 : vector<8x8x32xf32> to vector<8x8x32xbf16>
    %13 = vector.extract_strided_slice %6 {offsets = [0, 64], sizes = [64, 32], strides = [1, 1]} : vector<64x96xf32> to vector<64x32xf32>
    %14 = vector.shape_cast %13 : vector<64x32xf32> to vector<8x8x32xf32>
    %15 = arith.truncf %14 : vector<8x8x32xf32> to vector<8x8x32xbf16>
    %c0_6 = arith.constant 0 : index
    %c0_7 = arith.constant 0 : index
    %16 = vector.load %arg2[%c0_6, %c0_7] : memref<8x8xf32, #tpu.memory_space<vmem>>, vector<8x8xf32>
    %cst_8 = arith.constant 0.000000e+00 : f32
    %17 = vector.broadcast %cst_8 : f32 to vector<8x8xf32>
    %18 = arith.cmpf oeq, %16, %17 : vector<8x8xf32>
    %cst_9 = arith.constant -1.000000e+09 : f32
    %cst_10 = arith.constant 0.000000e+00 : f32
    %19 = vector.broadcast %cst_9 : f32 to vector<8x8xf32>
    %20 = vector.broadcast %cst_10 : f32 to vector<8x8xf32>
    %21 = arith.select %18, %19, %20 : vector<8x8xi1>, vector<8x8xf32>
    %22 = vector.shape_cast %21 : vector<8x8xf32> to vector<8x1x8xf32>
    "tpu.trace_start"() <{level = 10 : i32, message = "bqd,bkd->bqk"}> : () -> ()
    %cst_11 = arith.constant dense<0.000000e+00> : vector<8x8x8xf32>
    %23 = tpu.matmul %9, %12, %cst_11 {dimension_numbers = #tpu.dot_dimension_numbers<[2], [2], [1], [1], [0, 0, 0, 1, 1, 1], [0], [0]>} : vector<8x8x32xbf16>, vector<8x8x32xbf16>, vector<8x8x8xf32> -> vector<8x8x8xf32>
    "tpu.trace_stop"() : () -> ()
    %24 = vector.broadcast %22 : vector<8x1x8xf32> to vector<8x8x8xf32>
    %25 = arith.addf %23, %24 : vector<8x8x8xf32>
    %cst_12 = arith.constant dense<0xFF800000> : vector<8x8xf32>
    %26 = vector.multi_reduction <maximumf>, %25, %cst_12 [2] : vector<8x8x8xf32> to vector<8x8xf32>
    %27 = vector.shape_cast %26 : vector<8x8xf32> to vector<8x8x1xf32>
    %28 = vector.broadcast %27 : vector<8x8x1xf32> to vector<8x8x8xf32>
    %29 = arith.subf %25, %28 : vector<8x8x8xf32>
    %30 = math.exp %29 : vector<8x8x8xf32>
    %cst_13 = arith.constant dense<0.000000e+00> : vector<8x8xf32>
    %31 = vector.multi_reduction <add>, %30, %cst_13 [2] : vector<8x8x8xf32> to vector<8x8xf32>
    %32 = vector.shape_cast %31 : vector<8x8xf32> to vector<8x8x1xf32>
    %33 = tpu.reciprocal %32 {approx = true} : vector<8x8x1xf32> -> vector<8x8x1xf32>
    %34 = vector.broadcast %33 : vector<8x8x1xf32> to vector<8x8x8xf32>
    %35 = arith.mulf %30, %34 : vector<8x8x8xf32>
    %36 = arith.truncf %35 : vector<8x8x8xf32> to vector<8x8x8xbf16>
    "tpu.trace_start"() <{level = 10 : i32, message = "bqk,bkd->bqd"}> : () -> ()
    %cst_14 = arith.constant dense<0.000000e+00> : vector<8x8x32xf32>
    %37 = tpu.matmul %36, %15, %cst_14 {dimension_numbers = #tpu.dot_dimension_numbers<[2], [1], [1], [2], [0, 0, 0, 1, 1, 2], [0], [0]>} : vector<8x8x8xbf16>, vector<8x8x32xbf16>, vector<8x8x32xf32> -> vector<8x8x32xf32>
    "tpu.trace_stop"() : () -> ()
    %38 = vector.shape_cast %37 : vector<8x8x32xf32> to vector<64x32xf32>
    %39 = arith.truncf %38 : vector<64x32xf32> to vector<64x32xbf16>
    %c0_15 = arith.constant 0 : index
    %c0_16 = arith.constant 0 : index
    %40 = vector.load %arg6[%c0_15, %c0_16] : memref<32x32xbf16, #tpu.memory_space<vmem>>, vector<32x32xbf16>
    %cst_17 = arith.constant dense<0.000000e+00> : vector<64x32xf32>
    %41 = tpu.matmul %39, %40, %cst_17 {dimension_numbers = #tpu.dot_dimension_numbers<[1], [0], [0], [1], [0, 0, 1, 1], [], []>} : vector<64x32xbf16>, vector<32x32xbf16>, vector<64x32xf32> -> vector<64x32xf32>
    %c0_18 = arith.constant 0 : index
    %c0_19 = arith.constant 0 : index
    %42 = vector.load %arg7[%c0_18, %c0_19] : memref<1x32xf32, #tpu.memory_space<vmem>>, vector<1x32xf32>
    %43 = vector.broadcast %42 : vector<1x32xf32> to vector<64x32xf32>
    %44 = arith.addf %41, %43 : vector<64x32xf32>
    %45 = arith.extf %1 : vector<64x32xbf16> to vector<64x32xf32>
    %46 = arith.addf %45, %44 : vector<64x32xf32>
    %c0_20 = arith.constant 0 : index
    %c0_21 = arith.constant 0 : index
    %47 = vector.load %arg8[%c0_20, %c0_21] : memref<1x32xf32, #tpu.memory_space<vmem>>, vector<1x32xf32>
    %c0_22 = arith.constant 0 : index
    %c0_23 = arith.constant 0 : index
    %48 = vector.load %arg9[%c0_22, %c0_23] : memref<1x32xf32, #tpu.memory_space<vmem>>, vector<1x32xf32>
    %cst_24 = arith.constant dense<0.000000e+00> : vector<64xf32>
    %49 = vector.multi_reduction <add>, %46, %cst_24 [1] : vector<64x32xf32> to vector<64xf32>
    %50 = vector.shape_cast %49 : vector<64xf32> to vector<64x1xf32>
    %cst_25 = arith.constant 3.200000e+01 : f32
    %51 = vector.broadcast %cst_25 : f32 to vector<64x1xf32>
    %52 = arith.divf %50, %51 : vector<64x1xf32>
    %53 = vector.broadcast %52 : vector<64x1xf32> to vector<64x32xf32>
    %54 = arith.subf %46, %53 : vector<64x32xf32>
    %55 = arith.mulf %54, %54 : vector<64x32xf32>
    %cst_26 = arith.constant dense<0.000000e+00> : vector<64xf32>
    %56 = vector.multi_reduction <add>, %55, %cst_26 [1] : vector<64x32xf32> to vector<64xf32>
    %57 = vector.shape_cast %56 : vector<64xf32> to vector<64x1xf32>
    %cst_27 = arith.constant 3.200000e+01 : f32
    %58 = vector.broadcast %cst_27 : f32 to vector<64x1xf32>
    %59 = arith.divf %57, %58 : vector<64x1xf32>
    %60 = vector.broadcast %52 : vector<64x1xf32> to vector<64x32xf32>
    %61 = arith.subf %46, %60 : vector<64x32xf32>
    %cst_28 = arith.constant 9.99999996E-13 : f32
    %62 = vector.broadcast %cst_28 : f32 to vector<64x1xf32>
    %63 = arith.addf %59, %62 : vector<64x1xf32>
    %64 = math.rsqrt %63 : vector<64x1xf32>
    %65 = vector.broadcast %64 : vector<64x1xf32> to vector<64x32xf32>
    %66 = arith.mulf %61, %65 : vector<64x32xf32>
    %67 = vector.broadcast %47 : vector<1x32xf32> to vector<64x32xf32>
    %68 = arith.mulf %66, %67 : vector<64x32xf32>
    %69 = vector.broadcast %48 : vector<1x32xf32> to vector<64x32xf32>
    %70 = arith.addf %68, %69 : vector<64x32xf32>
    %71 = arith.truncf %70 : vector<64x32xf32> to vector<64x32xbf16>
    %c0_29 = arith.constant 0 : index
    %c0_30 = arith.constant 0 : index
    %72 = vector.load %arg10[%c0_29, %c0_30] : memref<32x64xbf16, #tpu.memory_space<vmem>>, vector<32x64xbf16>
    %cst_31 = arith.constant dense<0.000000e+00> : vector<64x64xf32>
    %73 = tpu.matmul %71, %72, %cst_31 {dimension_numbers = #tpu.dot_dimension_numbers<[1], [0], [0], [1], [0, 0, 1, 1], [], []>} : vector<64x32xbf16>, vector<32x64xbf16>, vector<64x64xf32> -> vector<64x64xf32>
    %c0_32 = arith.constant 0 : index
    %c0_33 = arith.constant 0 : index
    %74 = vector.load %arg11[%c0_32, %c0_33] : memref<1x64xf32, #tpu.memory_space<vmem>>, vector<1x64xf32>
    %75 = vector.broadcast %74 : vector<1x64xf32> to vector<64x64xf32>
    %76 = arith.addf %73, %75 : vector<64x64xf32>
    %cst_34 = arith.constant 5.000000e-01 : f32
    %77 = vector.broadcast %cst_34 : f32 to vector<64x64xf32>
    %78 = arith.mulf %77, %76 : vector<64x64xf32>
    %cst_35 = arith.constant 4.471500e-02 : f32
    %79 = vector.broadcast %cst_35 : f32 to vector<64x64xf32>
    %80 = arith.mulf %79, %76 : vector<64x64xf32>
    %81 = arith.mulf %80, %76 : vector<64x64xf32>
    %82 = arith.mulf %81, %76 : vector<64x64xf32>
    %83 = arith.addf %76, %82 : vector<64x64xf32>
    %cst_36 = arith.constant 0.797884583 : f32
    %84 = vector.broadcast %cst_36 : f32 to vector<64x64xf32>
    %85 = arith.mulf %84, %83 : vector<64x64xf32>
    %86 = math.tanh %85 : vector<64x64xf32>
    %cst_37 = arith.constant 1.000000e+00 : f32
    %87 = vector.broadcast %cst_37 : f32 to vector<64x64xf32>
    %88 = arith.addf %87, %86 : vector<64x64xf32>
    %89 = arith.mulf %78, %88 : vector<64x64xf32>
    %90 = arith.truncf %89 : vector<64x64xf32> to vector<64x64xbf16>
    %c0_38 = arith.constant 0 : index
    %c0_39 = arith.constant 0 : index
    %91 = vector.load %arg12[%c0_38, %c0_39] : memref<64x32xbf16, #tpu.memory_space<vmem>>, vector<64x32xbf16>
    %cst_40 = arith.constant dense<0.000000e+00> : vector<64x32xf32>
    %92 = tpu.matmul %90, %91, %cst_40 {dimension_numbers = #tpu.dot_dimension_numbers<[1], [0], [0], [1], [0, 0, 1, 1], [], []>} : vector<64x64xbf16>, vector<64x32xbf16>, vector<64x32xf32> -> vector<64x32xf32>
    %c0_41 = arith.constant 0 : index
    %c0_42 = arith.constant 0 : index
    %93 = vector.load %arg13[%c0_41, %c0_42] : memref<1x32xf32, #tpu.memory_space<vmem>>, vector<1x32xf32>
    %94 = vector.broadcast %93 : vector<1x32xf32> to vector<64x32xf32>
    %95 = arith.addf %92, %94 : vector<64x32xf32>
    %96 = arith.addf %70, %95 : vector<64x32xf32>
    %c0_43 = arith.constant 0 : index
    %c0_44 = arith.constant 0 : index
    %97 = vector.load %arg14[%c0_43, %c0_44] : memref<1x32xf32, #tpu.memory_space<vmem>>, vector<1x32xf32>
    %c0_45 = arith.constant 0 : index
    %c0_46 = arith.constant 0 : index
    %98 = vector.load %arg15[%c0_45, %c0_46] : memref<1x32xf32, #tpu.memory_space<vmem>>, vector<1x32xf32>
    %cst_47 = arith.constant dense<0.000000e+00> : vector<64xf32>
    %99 = vector.multi_reduction <add>, %96, %cst_47 [1] : vector<64x32xf32> to vector<64xf32>
    %100 = vector.shape_cast %99 : vector<64xf32> to vector<64x1xf32>
    %cst_48 = arith.constant 3.200000e+01 : f32
    %101 = vector.broadcast %cst_48 : f32 to vector<64x1xf32>
    %102 = arith.divf %100, %101 : vector<64x1xf32>
    %103 = vector.broadcast %102 : vector<64x1xf32> to vector<64x32xf32>
    %104 = arith.subf %96, %103 : vector<64x32xf32>
    %105 = arith.mulf %104, %104 : vector<64x32xf32>
    %cst_49 = arith.constant dense<0.000000e+00> : vector<64xf32>
    %106 = vector.multi_reduction <add>, %105, %cst_49 [1] : vector<64x32xf32> to vector<64xf32>
    %107 = vector.shape_cast %106 : vector<64xf32> to vector<64x1xf32>
    %cst_50 = arith.constant 3.200000e+01 : f32
    %108 = vector.broadcast %cst_50 : f32 to vector<64x1xf32>
    %109 = arith.divf %107, %108 : vector<64x1xf32>
    %110 = vector.broadcast %102 : vector<64x1xf32> to vector<64x32xf32>
    %111 = arith.subf %96, %110 : vector<64x32xf32>
    %cst_51 = arith.constant 9.99999996E-13 : f32
    %112 = vector.broadcast %cst_51 : f32 to vector<64x1xf32>
    %113 = arith.addf %109, %112 : vector<64x1xf32>
    %114 = math.rsqrt %113 : vector<64x1xf32>
    %115 = vector.broadcast %114 : vector<64x1xf32> to vector<64x32xf32>
    %116 = arith.mulf %111, %115 : vector<64x32xf32>
    %117 = vector.broadcast %97 : vector<1x32xf32> to vector<64x32xf32>
    %118 = arith.mulf %116, %117 : vector<64x32xf32>
    %119 = vector.broadcast %98 : vector<1x32xf32> to vector<64x32xf32>
    %120 = arith.addf %118, %119 : vector<64x32xf32>
    %121 = vector.shape_cast %120 : vector<64x32xf32> to vector<8x8x32xf32>
    %122 = vector.extract_strided_slice %121 {offsets = [0, 0, 0], sizes = [8, 1, 32], strides = [1, 1, 1]} : vector<8x8x32xf32> to vector<8x1x32xf32>
    %123 = vector.shape_cast %122 : vector<8x1x32xf32> to vector<8x32xf32>
    %124 = arith.truncf %123 : vector<8x32xf32> to vector<8x32xbf16>
    %c0_52 = arith.constant 0 : index
    %c0_53 = arith.constant 0 : index
    %125 = vector.load %arg16[%c0_52, %c0_53] : memref<32x128xbf16, #tpu.memory_space<vmem>>, vector<32x128xbf16>
    %cst_54 = arith.constant dense<0.000000e+00> : vector<8x128xf32>
    %126 = tpu.matmul %124, %125, %cst_54 {dimension_numbers = #tpu.dot_dimension_numbers<[1], [0], [0], [1], [0, 0, 1, 1], [], []>} : vector<8x32xbf16>, vector<32x128xbf16>, vector<8x128xf32> -> vector<8x128xf32>
    %c0_55 = arith.constant 0 : index
    %c0_56 = arith.constant 0 : index
    %127 = vector.load %arg3[%c0_55, %c0_56] : memref<8x128xf32, #tpu.memory_space<vmem>>, vector<8x128xf32>
    %128 = arith.addf %126, %127 : vector<8x128xf32>
    %c0_57 = arith.constant 0 : index
    %c0_58 = arith.constant 0 : index
    %129 = vector.load %arg17[%c0_57, %c0_58] : memref<8x128xf32, #tpu.memory_space<vmem>>, vector<8x128xf32>
    tpu.vector_store %arg17[%c0_57, %c0_58], %128 {strides = array<i32>} : memref<8x128xf32, #tpu.memory_space<vmem>>, vector<8x128xf32>,
    return
  }
  func.func @transform_0(%arg0: i32) -> (i32, i32, i32) {
    %c0_i32 = arith.constant 0 : i32
    %c0_i32_0 = arith.constant 0 : i32
    %c0_i32_1 = arith.constant 0 : i32
    return %arg0, %c0_i32, %c0_i32_0 : i32, i32, i32
  }
  func.func @transform_1(%arg0: i32) -> (i32, i32) {
    %c0_i32 = arith.constant 0 : i32
    %c0_i32_0 = arith.constant 0 : i32
    return %arg0, %c0_i32 : i32, i32
  }
  func.func @transform_2(%arg0: i32) -> (i32, i32) {
    %c0_i32 = arith.constant 0 : i32
    %c0_i32_0 = arith.constant 0 : i32
    return %arg0, %c0_i32 : i32, i32
  }
  func.func @transform_3(%arg0: i32) -> (i32, i32) {
    %c0_i32 = arith.constant 0 : i32
    %c0_i32_0 = arith.constant 0 : i32
    %c0_i32_1 = arith.constant 0 : i32
    return %c0_i32, %c0_i32_0 : i32, i32
  }
  func.func @transform_4(%arg0: i32) -> (i32, i32) {
    %c0_i32 = arith.constant 0 : i32
    %c0_i32_0 = arith.constant 0 : i32
    %c0_i32_1 = arith.constant 0 : i32
    return %c0_i32, %c0_i32_0 : i32, i32
  }
  func.func @transform_5(%arg0: i32) -> (i32, i32) {
    %c0_i32 = arith.constant 0 : i32
    %c0_i32_0 = arith.constant 0 : i32
    %c0_i32_1 = arith.constant 0 : i32
    return %c0_i32, %c0_i32_0 : i32, i32
  }
  func.func @transform_6(%arg0: i32) -> (i32, i32) {
    %c0_i32 = arith.constant 0 : i32
    %c0_i32_0 = arith.constant 0 : i32
    %c0_i32_1 = arith.constant 0 : i32
    return %c0_i32, %c0_i32_0 : i32, i32
  }
  func.func @transform_7(%arg0: i32) -> (i32, i32) {
    %c0_i32 = arith.constant 0 : i32
    %c0_i32_0 = arith.constant 0 : i32
    %c0_i32_1 = arith.constant 0 : i32
    return %c0_i32, %c0_i32_0 : i32, i32
  }
  func.func @transform_8(%arg0: i32) -> (i32, i32) {
    %c0_i32 = arith.constant 0 : i32
    %c0_i32_0 = arith.constant 0 : i32
    %c0_i32_1 = arith.constant 0 : i32
    return %c0_i32, %c0_i32_0 : i32, i32
  }
  func.func @transform_9(%arg0: i32) -> (i32, i32) {
    %c0_i32 = arith.constant 0 : i32
    %c0_i32_0 = arith.constant 0 : i32
    %c0_i32_1 = arith.constant 0 : i32
    return %c0_i32, %c0_i32_0 : i32, i32
  }
  func.func @transform_10(%arg0: i32) -> (i32, i32) {
    %c0_i32 = arith.constant 0 : i32
    %c0_i32_0 = arith.constant 0 : i32
    %c0_i32_1 = arith.constant 0 : i32
    return %c0_i32, %c0_i32_0 : i32, i32
  }
  func.func @transform_11(%arg0: i32) -> (i32, i32) {
    %c0_i32 = arith.constant 0 : i32
    %c0_i32_0 = arith.constant 0 : i32
    %c0_i32_1 = arith.constant 0 : i32
    return %c0_i32, %c0_i32_0 : i32, i32
  }
  func.func @transform_12(%arg0: i32) -> (i32, i32) {
    %c0_i32 = arith.constant 0 : i32
    %c0_i32_0 = arith.constant 0 : i32
    %c0_i32_1 = arith.constant 0 : i32
    return %c0_i32, %c0_i32_0 : i32, i32
  }
  func.func @transform_13(%arg0: i32) -> (i32, i32) {
    %c0_i32 = arith.constant 0 : i32
    %c0_i32_0 = arith.constant 0 : i32
    %c0_i32_1 = arith.constant 0 : i32
    return %c0_i32, %c0_i32_0 : i32, i32
  }
  func.func @transform_14(%arg0: i32) -> (i32, i32) {
    %c0_i32 = arith.constant 0 : i32
    %c0_i32_0 = arith.constant 0 : i32
    %c0_i32_1 = arith.constant 0 : i32
    return %c0_i32, %c0_i32_0 : i32, i32
  }
  func.func @transform_15(%arg0: i32) -> (i32, i32) {
    %c0_i32 = arith.constant 0 : i32
    %c0_i32_0 = arith.constant 0 : i32
    %c0_i32_1 = arith.constant 0 : i32
    return %c0_i32, %c0_i32_0 : i32, i32
  }
  func.func @transform_16(%arg0: i32) -> (i32, i32) {
    %c0_i32 = arith.constant 0 : i32
    %c0_i32_0 = arith.constant 0 : i32
    return %arg0, %c0_i32 : i32, i32
  }
}

</mosaic_0001>

<bundles_post_ra>
// kernel: tpu_custom_call.1
= control target key start
LH: loop header
LB: loop body
LE: loop exit
PB: predicated region body
PF: predicated region fallthrough
CT: control target
= control target key end

     0   :  { %s4379_s0 = inlined_call_operand.vmem [shape: bf16[16,8,32], index: 0, kind: input, shape index: {}]   ;;  %s4380_s1 = inlined_call_operand.vmem [shape: f32[16,8], index: 1, kind: input, shape index: {}]   ;;  %s4381_s2 = inlined_call_operand.hbm [shape: f32[16,128], index: 2, kind: input, shape index: {}]   ;;  %s4382_s3 = inlined_call_operand.hbm [shape: bf16[32,96], index: 3, kind: input, shape index: {}]   ;;  %s4383_s4 = inlined_call_operand.vmem [shape: f32[1,96], index: 4, kind: input, shape index: {}]   ;;  %s4384_s5 = inlined_call_operand.hbm [shape: bf16[32,32], index: 5, kind: input, shape index: {}]   ;;  %s4385_s6 = inlined_call_operand.hbm [shape: f32[1,32], index: 6, kind: input, shape index: {}]   ;;  %s4386_s7 = inlined_call_operand.hbm [shape: f32[1,32], index: 7, kind: input, shape index: {}]   ;;  %s4387_s8 = inlined_call_operand.hbm [shape: f32[1,32], index: 8, kind: input, shape index: {}]   ;;  %s4388_s9 = inlined_call_operand.vmem [shape: bf16[32,64], index: 9, kind: input, shape index: {}]   ;;  %s4389_s10 = inlined_call_operand.hbm [shape: f32[1,64], index: 10, kind: input, shape index: {}]   ;;  %s4390_s11 = inlined_call_operand.vmem [shape: bf16[64,32], index: 11, kind: input, shape index: {}]   ;;  %s4391_s12 = inlined_call_operand.vmem [shape: f32[1,32], index: 12, kind: input, shape index: {}]   ;;  %s4392_s13 = inlined_call_operand.vmem [shape: f32[1,32], index: 13, kind: input, shape index: {}]   ;;  %s4393_s14 = inlined_call_operand.vmem [shape: f32[1,32], index: 14, kind: input, shape index: {}]   ;;  %s4394_s15 = inlined_call_operand.vmem [shape: bf16[32,128], index: 15, kind: input, shape index: {}]   ;;  %s4395_s16 = inlined_call_operand.hbm [shape: f32[16,128], index: 16, kind: output, shape index: {}]  }
   0x1   :  { %4404 = sst [smem:[#allocation20_spill]] %s4379_s0 }
   0x2   :  { %4405 = sst [smem:[#allocation21_spill]] %s4382_s3 }
   0x3   :  { %4406 = sst [smem:[#allocation22_spill]] %s4388_s9 }
   0x4   :  { %4407 = sst [smem:[#allocation23_spill]] %s4390_s11 }
   0x5   :  { %4408 = sst [smem:[#allocation24_spill]] %s4391_s12 }
   0x6   :  { %4409 = sst [smem:[#allocation25_spill]] %s4392_s13 }
   0x7   :  { %4410 = sst [smem:[#allocation26_spill]] %s4393_s14 }
   0x8   :  { %4411 = sst [smem:[#allocation27_spill]] %s4394_s15 }
   0x9   :  { %4412 = sst [smem:[#allocation28_spill]] %s4395_s16 }
   0xa   :  { %21 = vsyncpa [#allocation3], 0 }
   0xb   :  { %23 = vsyncpa [#allocation3 + $0x1], 0 }
   0xc   :  { %24 = vsyncpa [#allocation6], 0 }
   0xd   :  { %25 = vsyncpa [#allocation9], 0 }
   0xe   :  { %26 = vsyncpa [#allocation12], 0 }
   0xf   :  { %27 = vsyncpa [#allocation4], 0 }
  0x10   :  { %29 = vsyncpa [#allocation4 + $0x1], 0  ;;  %s3619_s21 = smov 0   ;;  %s3621_s22 = smov 0  }
  0x11   :  { %s3623_s23 = smov 0   ;;  %s3625_s24 = smov 0  }
  0x12 LB: > { %s3519_s25 = smov [#allocation5]   ;;  %s3640_s27 = sadd.s32 4294967295, %s3517_s24   ;;  %s3517_s24 = sphi %s3625_s24, %s4445_s24   ;;  %s3513_s23 = sphi %s3623_s23, %s4444_s23   ;;  %s3509_s22 = sphi %s3621_s22, %s4443_s22   ;;  %s3505_s21 = sphi %s3619_s21, %s4442_s21  }
  0x13   : > { %s429_s26 = sshll.u32 %s3519_s25, 4  ;;  %p2727_p0 = scmp.ge.s32.totalorder %s3517_s24, 1  ;;  %s3645_s26 = int_to_ptr.vmem [resolvable:$true] %s429_s26 }
  0x14   : > { %p4401_p1 = scmp.eq.s32.totalorder %s3640_s27, 0  ;;  %p417_p2 = scmp.lt.s32.totalorder %s3517_s24, 3 }
  0x15   : > { %s3520_s29 = smov [#allocation8]   ;;  %s3521_s17 = smov [#allocation11]  }
  0x16   : > { %p3647_p3 = pnand %p2727_p0, %p417_p2  ;;  %s459_s30 = sshll.u32 %s3520_s29, 4  ;;  %s3660_s30 = int_to_ptr.vmem [resolvable:$true] %s459_s30 }
  0x17   : > { %s481_s18 = sshll.u32 %s3521_s17, 4  ;;  %s4415_s3 = sld [smem:[#allocation21_spill]]  ;;  %s3662_s18 = int_to_ptr.vmem [resolvable:$true] %s481_s18 }
  0x18   : > { %s4413_s28 = scalar_select %p3647_p3, 1, 0 }
  0x19   : > { %p3055_p5 = pneg %p3647_p3 }
  0x1b   : > { %p3656_p6 = pnand %p3055_p5, %p4401_p1 }
  0x1d   : > { %s3241_s25 = scalar_lea.hbm %s4415_s3, 256  ;;  %p3672_p8 = pneg %p3656_p6 }
  0x1e   : > { %p3242_p7 = scmp.ne.s32.totalorder %s4415_s3, %s3241_s25  ;;  %p3248_p11 = scmp.lt.u32.totalorder %s3241_s25, %s4415_s3 }
  0x20   : > { %p3244_p9 = pnand %p3672_p8, %p3242_p7 }
  0x22   : > { %p3245_p10 = pneg %p3244_p9 }
  0x24   : > { %p3250_p12 = pnand %p3248_p11, %p3245_p10 }
  0x26   : > { %3253 = shalt.err (!%p3250_p12)
}
  0x27   : > { %s3254_s14 = scalar_lea.vmem %s3645_s26, 256  ;;  %p3262_p5 = scmp.lt.s32.totalorder %s3645_s26, %s3645_s26 }
  0x28   : > { %p3255_p13 = scmp.ne.s32.totalorder %s3645_s26, %s3254_s14  ;;  %p3263_p4 = scmp.lt.s32.totalorder %s3254_s14, %s3254_s14 }
  0x2a   : > { %p3257_p0 = pnand %p3255_p13, %p3672_p8  ;;  %p3264_p7 = por %p3263_p4, %p3262_p5 }
  0x2c   : > { %p3258_p2 = pneg %p3257_p0 }
  0x2e   : > { %p3265_p9 = pnand %p3264_p7, %p3258_p2 }
  0x30   : > { %3268 = shalt.err (!%p3265_p9)
}
  0x31   : > { %s4400_s16 = smov 64   ;;  %s3523_s13 = smov 4  }
  0x32   : > { %3058 = dma.hbm_to_vmem [thread:$0]  (!%p3656_p6), %s4415_s3, 256, %s3645_s26, [#allocation6], %s4400_s16, %s4400_s16, %s3523_s13  }
  0x33   : > { %s3269_s14 = scalar_lea.hbm %s4385_s6, 16 }
  0x34   : > { %p3270_p4 = scmp.ne.s32.totalorder %s4385_s6, %s3269_s14  ;;  %p3276_p12 = scmp.lt.u32.totalorder %s3269_s14, %s4385_s6 }
  0x36   : > { %p3272_p10 = pnand %p3270_p4, %p3672_p8 }
  0x38   : > { %p3273_p11 = pneg %p3272_p10 }
  0x3a   : > { %p3278_p13 = pnand %p3276_p12, %p3273_p11 }
  0x3c   : > { %3281 = shalt.err (!%p3278_p13)
}
  0x3d   : > { %s3282_s26 = scalar_lea.vmem %s3660_s30, 16  ;;  %s3289_s12 = scalar_lea.vmem %s3660_s30, 32 }
  0x3e   : > { %p3283_p0 = scmp.ne.s32.totalorder %s3660_s30, %s3282_s26  ;;  %p3290_p7 = scmp.lt.s32.totalorder %s3660_s30, %s3660_s30 }
  0x3f   : > { %p3291_p9 = scmp.lt.s32.totalorder %s3289_s12, %s3282_s26 }
  0x40   : > { %p3285_p2 = pnand %p3283_p0, %p3672_p8 }
  0x41   : > { %p3292_p4 = por %p3291_p9, %p3290_p7 }
  0x42   : > { %p3286_p5 = pneg %p3285_p2 }
  0x44   : > { %p3293_p10 = pnand %p3292_p4, %p3286_p5 }
  0x46   : > { %3296 = shalt.err (!%p3293_p10)
}
  0x47   : > { %3064 = dma.hbm_to_vmem [thread:$0]  (!%p3656_p6), %s4385_s6, 16, %s3660_s30, [#allocation9]  }
  0x48   : > { %s3297_s20 = scalar_lea.hbm %s4387_s8, 16 }
  0x49   : > { %p3298_p11 = scmp.ne.s32.totalorder %s4387_s8, %s3297_s20  ;;  %p3304_p0 = scmp.lt.u32.totalorder %s3297_s20, %s4387_s8 }
  0x4b   : > { %p3300_p12 = pnand %p3298_p11, %p3672_p8 }
  0x4d   : > { %p3301_p13 = pneg %p3300_p12 }
  0x4f   : > { %p3306_p2 = pnand %p3304_p0, %p3301_p13 }
  0x51   : > { %3309 = shalt.err (!%p3306_p2)
}
  0x52   : > { %s3310_s30 = scalar_lea.vmem %s3662_s18, 16  ;;  %s3317_s12 = scalar_lea.vmem %s3662_s18, 32 }
  0x53   : > { %p3311_p5 = scmp.ne.s32.totalorder %s3662_s18, %s3310_s30  ;;  %p3318_p4 = scmp.lt.s32.totalorder %s3662_s18, %s3662_s18 }
  0x54   : > { %p3319_p10 = scmp.lt.s32.totalorder %s3317_s12, %s3310_s30 }
  0x55   : > { %p3313_p7 = pnand %p3311_p5, %p3672_p8 }
  0x56   : > { %p3320_p11 = por %p3319_p10, %p3318_p4 }
  0x57   : > { %p3314_p9 = pneg %p3313_p7 }
  0x59   : > { %p3321_p12 = pnand %p3320_p11, %p3314_p9 }
  0x5b   : > { %3324 = shalt.err (!%p3321_p12)
}
  0x5c   : > { %3070 = dma.hbm_to_vmem [thread:$0]  (!%p3656_p6), %s4387_s8, 16, %s3662_s18, [#allocation12]  }
  0x5d   : > { %s3524_s15 = smov [#allocation7]   ;;  %s3525_s20 = smov [#allocation10]  }
  0x5e   : > { %s445_s19 = sshll.u32 %s3524_s15, 4  ;;  %s470_s25 = sshll.u32 %s3525_s20, 4  ;;  %s446_s19 = int_to_ptr.vmem [resolvable:$true] %s445_s19  ;;  %s471_s25 = int_to_ptr.vmem [resolvable:$true] %s470_s25 }
  0x5f   : > { %s3325_s26 = scalar_lea.hbm %s4384_s5, 256 }
  0x60   : > { %p3326_p13 = scmp.ne.s32.totalorder %s4384_s5, %s3325_s26  ;;  %p3332_p5 = scmp.lt.u32.totalorder %s3325_s26, %s4384_s5 }
  0x62   : > { %p3328_p0 = pnand %p3326_p13, %p3672_p8 }
  0x64   : > { %p3329_p2 = pneg %p3328_p0 }
  0x66   : > { %p3334_p7 = pnand %p3332_p5, %p3329_p2 }
  0x68   : > { %3337 = shalt.err (!%p3334_p7)
}
  0x69   : > { %s3338_s18 = scalar_lea.vmem %s446_s19, 256  ;;  %p3346_p11 = scmp.lt.s32.totalorder %s446_s19, %s446_s19 }
  0x6a   : > { %p3339_p9 = scmp.ne.s32.totalorder %s446_s19, %s3338_s18  ;;  %p3347_p12 = scmp.lt.s32.totalorder %s3338_s18, %s3338_s18 }
  0x6c   : > { %p3341_p4 = pnand %p3339_p9, %p3672_p8  ;;  %p3348_p1 = por %p3347_p12, %p3346_p11 }
  0x6e   : > { %p3342_p10 = pneg %p3341_p4 }
  0x70   : > { %p3349_p3 = pnand %p3348_p1, %p3342_p10 }
  0x72   : > { %3352 = shalt.err (!%p3349_p3)
}
  0x73   : > { %s4417_s11 = smov 64   ;;  %s3353_s14 = scalar_lea.hbm %s4386_s7, 16 }
  0x74   : > { %3061 = dma.hbm_to_vmem [thread:$0]  (!%p3656_p6), %s4384_s5, 256, %s446_s19, [#allocation6], %s4417_s11, %s4417_s11, %s3523_s13  }
  0x75   : > { %p3354_p1 = scmp.ne.s32.totalorder %s4386_s7, %s3353_s14  ;;  %p3360_p0 = scmp.lt.u32.totalorder %s3353_s14, %s4386_s7 }
  0x77   : > { %p3356_p3 = pnand %p3354_p1, %p3672_p8 }
  0x79   : > { %p3357_p13 = pneg %p3356_p3 }
  0x7b   : > { %p3362_p2 = pnand %p3360_p0, %p3357_p13 }
  0x7d   : > { %3365 = shalt.err (!%p3362_p2)
}
  0x7e   : > { %s3366_s18 = scalar_lea.vmem %s471_s25, 16  ;;  %s3373_s13 = scalar_lea.vmem %s471_s25, 32 }
  0x7f   : > { %p3367_p5 = scmp.ne.s32.totalorder %s471_s25, %s3366_s18  ;;  %p3374_p4 = scmp.lt.s32.totalorder %s471_s25, %s471_s25 }
  0x80   : > { %p3375_p10 = scmp.lt.s32.totalorder %s3373_s13, %s3366_s18 }
  0x81   : > { %p3369_p7 = pnand %p3367_p5, %p3672_p8 }
  0x82   : > { %p3376_p11 = por %p3375_p10, %p3374_p4 }
  0x83   : > { %p3370_p9 = pneg %p3369_p7 }
  0x85   : > { %p3377_p12 = pnand %p3376_p11, %p3370_p9 }
  0x87   : > { %3380 = shalt.err (!%p3377_p12)
}
  0x88   : > { %3067 = dma.hbm_to_vmem [thread:$0]  (!%p3656_p6), %s4386_s7, 16, %s471_s25, [#allocation9]  }
  0x89   : > { %s3526_s16 = smov [#allocation13]   ;;  %s3381_s14 = scalar_lea.hbm %s4389_s10, 16 }
  0x8a   : > { %s495_s15 = sshll.u32 %s3526_s16, 4  ;;  %p3382_p1 = scmp.ne.s32.totalorder %s4389_s10, %s3381_s14  ;;  %s496_s15 = int_to_ptr.vmem [resolvable:$true] %s495_s15 }
  0x8b   : > { %p3388_p0 = scmp.lt.u32.totalorder %s3381_s14, %s4389_s10 }
  0x8c   : > { %p3384_p3 = pnand %p3382_p1, %p3672_p8 }
  0x8e   : > { %p3385_p13 = pneg %p3384_p3 }
  0x90   : > { %p3390_p2 = pnand %p3388_p0, %p3385_p13 }
  0x92   : > { %3393 = shalt.err (!%p3390_p2)
}
  0x93   : > { %s3394_s25 = scalar_lea.vmem %s496_s15, 16  ;;  %s3401_s18 = scalar_lea.vmem %s496_s15, 32 }
  0x94   : > { %p3395_p5 = scmp.ne.s32.totalorder %s496_s15, %s3394_s25  ;;  %p3402_p4 = scmp.lt.s32.totalorder %s496_s15, %s496_s15 }
  0x95   : > { %p3403_p10 = scmp.lt.s32.totalorder %s3401_s18, %s3394_s25 }
  0x96   : > { %p3397_p7 = pnand %p3395_p5, %p3672_p8 }
  0x97   : > { %p3404_p11 = por %p3403_p10, %p3402_p4 }
  0x98   : > { %p3398_p9 = pneg %p3397_p7 }
  0x9a   : > { %p3405_p12 = pnand %p3404_p11, %p3398_p9 }
  0x9c   : > { %3408 = shalt.err (!%p3405_p12)
}
  0x9d   : > { %3073 = dma.hbm_to_vmem [thread:$0]  (!%p3656_p6), %s4389_s10, 16, %s496_s15, [#allocation12]  }
  0x9e   : > { %s2726_s29 = sadd.s32 4294967294, %s3517_s24   ;;  %s3803_s0 = sadd.s32 1, %s3517_s24  }
  0x9f   : > { %s91_s11 = ssub.s32 %s3517_s24, %s3803_s0  ;;  %s94_s16 = sadd.s32 1, %s3513_s23 }
  0xa0   : > { %p92_p8 = scmp.eq.s32.totalorder %s91_s11, 0  ;;  %p101_p1 = scmp.ne.s32.totalorder %s3513_s23, %s3509_s22 }
  0xa1   : > { %p102_p3 = scmp.eq.s32.totalorder %s3517_s24, 0  ;;  %p107_p13 = scmp.ne.s32.totalorder %s3509_s22, %s3505_s21 }
  0xa2   : > { %s3814_s20 = scalar_select %p92_p8, %s3513_s23, %s94_s16  }
  0xa3   : > { %p3816_p0 = por %p102_p3, %p101_p1  ;;  %p4419_p2 = scmp.eq.s32.totalorder %s3640_s27, 0 }
  0xa4   : > { %p404_p5 = scmp.eq.s32.totalorder %s3640_s27, 1  ;;  %p410_p7 = scmp.eq.s32.totalorder %s2726_s29, 1 }
  0xa5   : > { %p3822_p6 = por %p4419_p2, %p107_p13  ;;  %p3088_p9 = scmp.lt.s32.totalorder %s3517_s24, 2 }
  0xa6   : > { %s537_s14 = sand.u32 1, %s3513_s23   ;;  %p3829_p4 = por %p404_p5, %p101_p1 }
  0xa7   : > { %p3833_p10 = por %p410_p7, %p107_p13  ;;  %s2735_s12 = sshll.u32 %s537_s14, 3 }
  0xa8   : > { %s4421_s26 = scalar_select %p3829_p4, 1, 0 }
  0xa9   : > { %s4422_s30 = scalar_select %p3833_p10, 1, 0 }
  0xaa   : > { %s2736_s9 = sshll.u32 %s3517_s24, 7  ;;  %s541_s19 = scalar_lea.vmem [#allocation2], %s2735_s12 }
  0xab   : > { %s3841_s13 = scalar_lea.hbm %s4381_s2, %s2736_s9  ;;  %s548_s29 = sshll.u32 %s541_s19, 4  ;;  %s3843_s29 = int_to_ptr.vmem [resolvable:$true] %s548_s29 }
  0xac   : > { %p3847_p11 = pnand %p3088_p9, %p3816_p0  ;;  %s538_s16 = scalar_lea.sflag [#allocation3], %s537_s14 }
  0xad   : > { %s3409_s3 = scalar_lea.hbm %s3841_s13, 128  ;;  %s3414_s25 = scalar_lea.hbm %s4381_s2, 256 }
  0xae   : > { %p3410_p12 = scmp.ne.s32.totalorder %s3841_s13, %s3409_s3  ;;  %p3411_p8 = pneg %p3847_p11 }
  0xaf   : > { %p3415_p13 = scmp.lt.u32.totalorder %s3841_s13, %s4381_s2  ;;  %p3416_p0 = scmp.lt.u32.totalorder %s3414_s25, %s3409_s3 }
  0xb0   : > { %p3412_p1 = pnand %p3411_p8, %p3410_p12  ;;  %p3418_p5 = scmp.lt.u32.totalorder %s3409_s3, %s3841_s13 }
  0xb1   : > { %p3417_p2 = por %p3416_p0, %p3415_p13 }
  0xb2   : > { %p3413_p3 = pneg %p3412_p1 }
  0xb3   : > { %p3419_p7 = por %p3418_p5, %p3417_p2 }
  0xb5   : > { %p3420_p9 = pnand %p3419_p7, %p3413_p3 }
  0xb7   : > { %3423 = shalt.err (!%p3420_p9)
}
  0xb8   : > { %s3424_s14 = scalar_lea.vmem %s3843_s29, 128  ;;  %s3527_s19 = smov [#allocation2]  }
  0xb9   : > { %p3425_p12 = scmp.ne.s32.totalorder %s3843_s29, %s3424_s14  ;;  %s3429_s12 = sshll.u32 %s3527_s19, 4  ;;  %s3430_s12 = int_to_ptr.vmem [resolvable:$false] %s3429_s12 }
  0xba   : > { %s3431_s9 = scalar_lea.vmem %s3430_s12, 256  ;;  %p3432_p4 = scmp.lt.s32.totalorder %s3843_s29, %s3430_s12 }
  0xbb   : > { %p3427_p1 = pnand %p3425_p12, %p3411_p8  ;;  %p3433_p13 = scmp.lt.s32.totalorder %s3431_s9, %s3424_s14 }
  0xbd   : > { %p3428_p10 = pneg %p3427_p1  ;;  %p3434_p0 = por %p3433_p13, %p3432_p4 }
  0xbf   : > { %p3435_p2 = pnand %p3434_p0, %p3428_p10 }
  0xc1   : > { %3438 = shalt.err (!%p3435_p2)
}
  0xc2   : > { %3077 = dma.hbm_to_vmem [thread:$0]  (!%p3847_p11), %s3841_s13, 128, %s3843_s29, %s538_s16  }
  0xc3   : > { %p4424_p3 = scmp.ne.s32.totalorder %s4413_s28, 0 }
  0xc4   : > { %s3879_s3 = sand.u32 (!%p4424_p3), 1, %s3509_s22  }
  0xc5   : > { %557 = sbr.rel (%p4424_p3) target bundleno = 2940 (0xb7c), region = 84  ;;  %s2738_s25 = sshll.u32 (!%p4424_p3), %s3879_s3, 3 }
  0xc6   : > { %s560_s17 = scalar_lea.sflag (!%p4424_p3), [#allocation3], %s3879_s3  ;;  %s3885_s18 = scalar_lea.vmem (!%p4424_p3), [#allocation2], %s2738_s25 }
  0xcc   : > { %3484 = dma.done.wait (%p3822_p6), %s560_s17, 128  }
  0xcd   : > { %3486 = vsyncadd (%p3822_p6), %s560_s17, 4294967168  ;;  %p4425_p4 = scmp.eq.s32.totalorder %s3640_s27, 0 }
  0xcf   : > { %3488 = dma.done.wait (%p4425_p4), [#allocation6], 512   ;;  %p4426_p10 = pmov %p4425_p4 }
  0xd0   : > { %p4427_p11 = pmov %p4425_p4 }
  0xd1   : > { %3490 = vsyncadd (%p4426_p10), [#allocation6], 4294966784 }
  0xd2   : > { %3492 = dma.done.wait (%p4427_p11), [#allocation9], 32   ;;  %p4428_p8 = pmov %p4425_p4 }
  0xd3   : > { %p4429_p5 = pmov %p4425_p4 }
  0xd4   : > { %3494 = vsyncadd (%p4428_p8), [#allocation9], 4294967264 }
  0xd5   : > { %3496 = dma.done.wait (%p4429_p5), [#allocation12], 32   ;;  %p4430_p7 = pmov %p4425_p4 }
  0xd6   : > { %s2746_s28 = sshll.u32 %s3640_s27, 3  ;;  %s4431_s11 = sld [smem:[#allocation20_spill]]  ;;  %v3141_v0 = vld [vmem:[#allocation5] sm:$0xff]   ;;  %v3142_v1 = vld [vmem:[#allocation5 + $0x8] sm:$0xff]   ;;  %vm707_vm0 = vcmask 261120   ;;  %v3528_v6 = vmov 0.0   ;;  %v801_v52 = vlaneseq }
  0xd7   : > { %3498 = vsyncadd (%p4430_p7), [#allocation12], 4294967264  ;;  %p646_p6 = scmp.lt.s32.totalorder %s2746_s28, 15  ;;  %2871 = vmatprep.subr.bf16.mxu0 %v3141_v0  ;;  %2883 = vmatprep.subr.bf16.mxu1 %v3528_v6  ;;  %v2749_v7 = vld [vmem:[%s4383_s4] ss:$0 sm:$0xff]  ;;  %vm3529_vm1 = vmmov 0  }
  0xd8   : > { %2872 = vmatpush3.bf16.msra.mxu0 %v3141_v0  ;;  %2885 = vmatprep.mubr.msk.bf16.mxu1 %vm3529_vm1, %v3528_v6  ;;  %s3530_s12 = smov 96   ;;  %s3531_s9 = smov 64   ;;  %vm1380_vm2 = vcmask 1043456   ;;  %v3532_v50 = vmov 1966171168   ;;  %v802_v55 = vshrl.u32 %v801_v52, 7 }
  0xd9   : > { %s4447_s28 = smov (!%p646_p6, %s2746_s28), 15  ;;  %2873 = vmatprep.subr.bf16.mxu0 %v3142_v1  ;;  %p651_p9 = scmp.lt.s32.totalorder %s3640_s27, 1  ;;  %v799_v51 = vunpack.c.l.s4 %v3532_v50  ;;  %vm1278_vm4 = vcmask 64512   ;;  %vm2234_vm5 = vcmask 523264   ;;  %vm2484_vm6 = vcmask 1041409  }
  0xda   : > { %s2747_s15 = sshll.u32 %s4447_s28, 2  ;;  %v4009_v61 = vsub.s32 0, %v802_v55  ;;  %s4432_s14 = sld [smem:[#allocation22_spill]]  ;;  %vm2487_vm7 = vcmask 1042434   ;;  %vm2490_vm8 = vcmask 1043459   ;;  %vm2493_vm9 = vcmask 1044484  }
  0xdb   : > { %s652_s17 = scalar_select %p651_p9, %s3640_s27, 1  ;;  %v800_v54 = vunpack.c.0.s8 %v799_v51  ;;  %vm2496_vm10 = vcmask 1045509   ;;  %vm2499_vm11 = vcmask 1046534   ;;  %vm2502_vm12 = vcmask 1047559  }
  0xdc   : > { %s649_s16 = scalar_lea.vmem %s4431_s11, %s2747_s15  ;;  %2874 = vmatpush3.bf16.msra.mxu0 %v3142_v1  ;;  %s4437_s13 = sld [smem:[#allocation26_spill]] }
  0xdd   : > { %v3907_v2 = vld [vmem:[%s649_s16] sm:$0xff]   ;;  %v3909_v3 = vld [vmem:[%s649_s16 + $0x8] sm:$0xff]   ;;  %v3911_v4 = vld [vmem:[%s649_s16 + $0x10] sm:$0xff]   ;;  %2895 = vmatprep.subr.bf16.mxu0 %v3528_v6  ;;  %s2748_s28 = sshll.u32 %s652_s17, 3  ;;  %v803_v56 = vsub.s32 %v800_v54, %v802_v55  ;;  %s4434_s17 = sld [smem:[#allocation24_spill]] }
  0xde   : > { %2875 = vmatprep.mubr.msk.bf16.mxu0 %vm707_vm0, %v3907_v2  ;;  %v3919_v5 = vld [vmem:[%s649_s16 + $0x18] sm:$0xff]   ;;  %s654_s29 = scalar_lea.vmem %s4380_s1, %s2748_s28  ;;  %s4433_s28 = sld [smem:[#allocation23_spill]] }
  0xdf   : > { %2876 = vmatmul.mubr.msk.bf16.vlgmr.msra.gmra.mrb[0].mxu0 %vm707_vm0, %v3909_v3  ;;  %v793_v53 = vld [vmem:[%s654_s29] sm:$0xff]  ;;  %s4435_s29 = sld [smem:[#allocation27_spill]]  ;;  %s2807_s11 = sshll.u32 %s3640_s27, 7 }
  0xe0   : > { %2879 = vmatprep.mubr.msk.bf16.mxu0 %vm707_vm0, %v3911_v4  ;;  %vm794_vm3 = vcmp.eq.f32.partialorder %v793_v53, 0.0  ;;  %s644_s16 = scalar_lea.vmem [#allocation14], %s2738_s25  ;;  %s2562_s27 = scalar_lea.sflag [#allocation4], %s3879_s3 }
  0xe1   : > { %v795_v57 = vsel %vm794_vm3, -1e+09, %v3528_v6  ;;  %s2575_s19 = sshll.u32 %s644_s16, 4  ;;  %p4439_p1 = scmp.ne.s32.totalorder %s4421_s26, 0  ;;  %s4337_s19 = int_to_ptr.vmem [resolvable:$true] %s2575_s19 }
  0xe2   : > { %v804_v58 = vrot.slane %v795_v57, %v803_v56  ;;  %v797_v62 = vcombine.high %v795_v57, %v795_v57  ;;  %s3533_s25 = smov [#allocation14]  }
  0xe4   : > { %v820_v59 = vrot.slane %v804_v58, %v803_v56  ;;  %v812_v0 = vcombine.high %v804_v58, %v804_v58 }
  0xe6   : > { %v842_v60 = vcombine.high %v820_v59, %v820_v59  ;;  %v849_v1 = vrot.slane %v820_v59, %v4009_v61 }
  0xe7   : > { %2880 = vmatmul.mubr.msk.bf16.gmra.mrb[4].mxu0 %vm707_vm0, %v3919_v5 }
  0xe8   : > { %2897 = vmatprep.mubr.msk.bf16.mxu0 %vm3529_vm1, %v3528_v6  ;;  %v857_v63 = vrot.slane %v842_v60, %v4009_v61 }
 0x1b2   : > { %v2877_v8 = vpop.f32.mrb[0].mxu0 }
 0x1b3   : > { %v763_v9 = vadd.f32 %v2877_v8, %v2749_v7  ;;  %v754_v10 = vpop.f32.mrb[1].mxu0  ;;  %v811_v8 = vrot.slane %v797_v62, %v803_v56 }
 0x1b4   : > { %v755_v11 = vadd.f32 %v2749_v7, %v754_v10  ;;  %v2878_v12 = vpop.f32.mrb[2].mxu0 }
 0x1b5   : > { %v3932_v13 = vpack.c.bf16 %v763_v9, %v763_v9  ;;  %v766_v14 = vadd.f32 %v2878_v12, %v2749_v7  ;;  %v757_v15 = vpop.f32.mrb[3].mxu0 }
 0x1b6   : > { %v785_v16 = vpack.c.bf16 %v755_v11, %v755_v11  ;;  %v758_v17 = vadd.f32 %v2749_v7, %v757_v15  ;;  %v834_v15 = vrot.slane %v812_v0, %v803_v56 }
 0x1b7   : > { %985 = vrot.lane.b32.xlu1 %v3932_v13, %s3530_s12  ;;  %v3935_v18 = vpack.c.bf16 %v766_v14, %v766_v14 }
 0x1b8   : > { %887 = vrot.lane.b32.xlu0 %v785_v16, %s3530_s12  ;;  %v3937_v19 = vpack.c.bf16 %v758_v17, %v758_v17 }
 0x1ba   : > { %v2881_v20 = vpop.f32.mrb[4].mxu0 }
 0x1bb   : > { %1034 = vrot.lane.b32.xlu1 %v3935_v18, %s3530_s12  ;;  %v770_v21 = vpop.f32.mrb[5].mxu0  ;;  %v779_v22 = vadd.f32 %v2881_v20, %v2749_v7 }
 0x1bc   : > { %v771_v23 = vadd.f32 %v2749_v7, %v770_v21  ;;  %v2882_v24 = vpop.f32.mrb[6].mxu0  ;;  %936 = vrot.lane.b32.xlu0 %v3937_v19, %s3530_s12 }
 0x1bd   : > { %v773_v25 = vpop.f32.mrb[7].mxu0  ;;  %v782_v27 = vadd.f32 %v2882_v24, %v2749_v7  ;;  %v3943_v29 = vpack.c.bf16 %v779_v22, %v779_v22  ;;  %v853_v24 = vrot.slane %v834_v15, %v4009_v61 }
 0x1be   : > { %v3941_v26 = vpack.c.bf16 %v771_v23, %v771_v23  ;;  %v774_v28 = vadd.f32 %v2749_v7, %v773_v25  ;;  %v827_v23 = vrot.slane %v811_v8, %v803_v56 }
 0x1bf   : > { %v3948_v31 = vpack.c.bf16 %v782_v27, %v782_v27 }
 0x1c0   : > { %v3945_v30 = vpack.c.bf16 %v774_v28, %v774_v28  ;;  %1083 = vrot.lane.b32.xlu0 %v3941_v26, %s3530_s12  ;;  %v865_v27 = vrot.slane %v827_v23, %v4009_v61 }
 0x1c2   : > { %1132 = vrot.lane.b32.xlu1 %v3945_v30, %s3530_s12 }
 0x1c4   : > { %1181 = vrot.lane.b32.xlu0 %v3943_v29, %s3530_s12 }
 0x1c6   : > { %1230 = vrot.lane.b32.xlu1 %v3948_v31, %s3530_s12 }
 0x1ca   : > { %1375 = vrot.lane.b32.xlu1 %v785_v16, %s3531_s9 }
 0x229   : > { %v986_v32 = vpop.permute.xlu1 %985 }
 0x22a   : > { %v991_v33 = vsel %vm707_vm0, %v986_v32, 0  ;;  %v888_v34 = vpop.permute.xlu0 %887 }
 0x22b   : > { %2896 = vmatpush3.bf16.xpose.msra.mxu0 %v991_v33  ;;  %v893_v35 = vsel %vm707_vm0, %v888_v34, 0 }
 0x22c   : > { %2884 = vmatpush3.bf16.xpose.msra.mxu1 %v893_v35  ;;  %2907 = vmatprep.subr.bf16.mxu0 %v3528_v6 }
 0x22d   : > { %2889 = vmatprep.subr.bf16.mxu1 %v3528_v6  ;;  %v1035_v37 = vpop.permute.xlu1 %1034 }
 0x22e   : > { %v937_v36 = vpop.permute.xlu0 %936  ;;  %v1040_v45 = vsel %vm707_vm0, %v1035_v37, 0  ;;  %v843_v37 = vcombine.high %v827_v23, %v827_v23 }
 0x22f   : > { %v942_v39 = vsel %vm707_vm0, %v937_v36, 0  ;;  %v844_v36 = vcombine.high %v834_v15, %v834_v15 }
 0x232   : > { %2898 = vmatmul.mubr.msk.bf16.vlgmr.msra.gmra.mrb[8].mxu0 %vm707_vm0, %v3932_v13  ;;  %v1084_v38 = vpop.permute.xlu0 %1083 }
 0x233   : > { %v1089_v40 = vsel %vm707_vm0, %v1084_v38, 0  ;;  %2886 = vmatmul.mubr.msk.bf16.vlgmr.msra.gmra.mrb[0].mxu1 %vm707_vm0, %v785_v16  ;;  %2909 = vmatprep.mubr.msk.bf16.mxu0 %vm3529_vm1, %v3528_v6 }
 0x234   : > { %v1133_v41 = vpop.permute.xlu1 %1132  ;;  %2890 = vmatpush3.bf16.xpose.msra.mxu1 %v942_v39  ;;  %2908 = vmatpush3.bf16.xpose.msra.mxu0 %v1089_v40 }
 0x235   : > { %2891 = vmatprep.mubr.msk.bf16.mxu1 %vm3529_vm1, %v3528_v6  ;;  %2901 = vmatprep.subr.bf16.mxu1 %v3528_v6  ;;  %v1138_v47 = vsel %vm707_vm0, %v1133_v41, 0 }
 0x236   : > { %v1182_v42 = vpop.permute.xlu0 %1181  ;;  %2919 = vmatprep.subr.bf16.mxu0 %v3528_v6 }
 0x237   : > { %v1187_v43 = vsel %vm707_vm0, %v1182_v42, 0 }
 0x238   : > { %v1231_v44 = vpop.permute.xlu1 %1230 }
 0x239   : > { %v1236_v49 = vsel %vm707_vm0, %v1231_v44, 0  ;;  %v861_v44 = vrot.slane %v844_v36, %v4009_v61 }
 0x23b   : > { %2892 = vmatmul.mubr.msk.bf16.vlgmr.msra.gmra.mrb[4].mxu1 %vm707_vm0, %v3937_v19  ;;  %2910 = vmatmul.mubr.msk.bf16.vlgmr.msra.gmra.mrb[12].mxu0 %vm707_vm0, %v3941_v26 }
 0x23c   : > { %2902 = vmatpush3.bf16.xpose.msra.mxu1 %v1040_v45  ;;  %2920 = vmatpush3.bf16.xpose.msra.mxu0 %v1187_v43  ;;  %v1376_v46 = vpop.permute.xlu1 %1375  ;;  %v873_v45 = vrot.slane %v843_v37, %v4009_v61 }
 0x23d   : > { %2903 = vmatprep.mubr.msk.bf16.mxu1 %vm3529_vm1, %v3528_v6  ;;  %2921 = vmatprep.mubr.msk.bf16.mxu0 %vm3529_vm1, %v3528_v6  ;;  %v1382_v48 = vsel %vm1380_vm2, %v1376_v46, 0  ;;  %v813_v46 = vcombine.high %v811_v8, %v811_v8 }
 0x23e   : > { %2913 = vmatprep.subr.bf16.mxu1 %v3528_v6  ;;  %2931 = vmatprep.subr.bf16.mxu0 %v3528_v6 }
 0x23f   : > { %v841_v54 = vrot.slane %v813_v46, %v803_v56 }
 0x241   : > { %v845_v8 = vcombine.high %v841_v54, %v841_v54 }
 0x243   : > { %2904 = vmatmul.mubr.msk.bf16.vlgmr.msra.gmra.mrb[8].mxu1 %vm707_vm0, %v3935_v18  ;;  %2922 = vmatmul.mubr.msk.bf16.vlgmr.msra.gmra.mrb[16].mxu0 %vm707_vm0, %v3943_v29 }
 0x244   : > { %2914 = vmatpush3.bf16.xpose.msra.mxu1 %v1138_v47  ;;  %2932 = vmatpush3.bf16.msra.mxu0 %v1382_v48 }
 0x245   : > { %2915 = vmatprep.mubr.msk.bf16.mxu1 %vm3529_vm1, %v3528_v6  ;;  %2925 = vmatprep.subr.bf16.mxu1 %v3528_v6 }
 0x246   : > { %2933 = vmatprep.mubr.msk.bf16.mxu0 %vm3529_vm1, %v3528_v6  ;;  %2943 = vmatprep.subr.bf16.mxu0 %v3528_v6 }
 0x24b   : > { %2916 = vmatmul.mubr.msk.bf16.vlgmr.msra.gmra.mrb[12].mxu1 %vm707_vm0, %v3945_v30 }
 0x24c   : > { %2926 = vmatpush3.bf16.xpose.msra.mxu1 %v1236_v49  ;;  %2927 = vmatprep.mubr.msk.bf16.mxu1 %vm3529_vm1, %v3528_v6 }
 0x24d   : > { %2937 = vmatprep.subr.bf16.mxu1 %v3528_v6 }
 0x253   : > { %2928 = vmatmul.mubr.msk.bf16.vlgmr.msra.gmra.mrb[16].mxu1 %vm707_vm0, %v3948_v31 }
 0x254   : > { %2939 = vmatprep.mubr.msk.bf16.mxu1 %vm3529_vm1, %v3528_v6 }
 0x305   : > { %v1027_v7 = vpop.f32.mrb[8].mxu0 }
 0x306   : > { %v4013_v9 = vadd.f32 %v1027_v7, %v857_v63  ;;  %v929_v10 = vpop.f32.mrb[0].mxu1  ;;  %v2899_v11 = vpop.f32.mrb[9].mxu0  ;;  %v869_v63 = vrot.slane %v841_v54, %v4009_v61 }
 0x307   : > { %v2887_v12 = vpop.f32.mrb[1].mxu1  ;;  %v1030_v14 = vpop.f32.mrb[10].mxu0  ;;  %v4015_v16 = vadd.f32 %v929_v10, %v849_v1 }
 0x308   : > { %v932_v17 = vpop.f32.mrb[2].mxu1  ;;  %v2900_v20 = vpop.f32.mrb[11].mxu0  ;;  %v1285_v21 = vsel %vm1278_vm4, %v4013_v9, -inf  ;;  %v877_v12 = vrot.slane %v845_v8, %v4009_v61 }
 0x309   : > { %1286 = vmax.xlane.f32.xlu0 %v1285_v21  ;;  %v2888_v22 = vpop.f32.mrb[3].mxu1  ;;  %v1279_v25 = vsel %vm1278_vm4, %v4015_v16, -inf }
 0x30d   : > { %1280 = vmax.xlane.f32.xlu0 %v1279_v25 }
 0x30e   : > { %v978_v28 = vpop.f32.mrb[4].mxu1  ;;  %v1125_v32 = vpop.f32.mrb[12].mxu0 }
 0x30f   : > { %v979_v33 = vadd.f32 %v978_v28, %v853_v24  ;;  %v2893_v34 = vpop.f32.mrb[5].mxu1  ;;  %v2911_v35 = vpop.f32.mrb[13].mxu0  ;;  %v1126_v40 = vadd.f32 %v1125_v32, %v865_v27 }
 0x310   : > { %v981_v38 = vpop.f32.mrb[6].mxu1  ;;  %v1128_v39 = vpop.f32.mrb[14].mxu0 }
 0x311   : > { %v2894_v41 = vpop.f32.mrb[7].mxu1  ;;  %v2912_v42 = vpop.f32.mrb[15].mxu0  ;;  %v1282_v43 = vsel %vm1278_vm4, %v979_v33, -inf  ;;  %v1291_v47 = vsel %vm1278_vm4, %v1126_v40, -inf }
 0x312   : > { %1283 = vmax.xlane.f32.xlu1 %v1282_v43 }
 0x316   : > { %v1076_v48 = vpop.f32.mrb[8].mxu1  ;;  %1292 = vmax.xlane.f32.xlu1 %v1291_v47  ;;  %v1223_v49 = vpop.f32.mrb[16].mxu0 }
 0x317   : > { %v1077_v50 = vadd.f32 %v1076_v48, %v861_v44  ;;  %v4027_v51 = vadd.f32 %v1223_v49, %v873_v45  ;;  %v2905_v52 = vpop.f32.mrb[9].mxu1  ;;  %v2923_v53 = vpop.f32.mrb[17].mxu0 }
 0x318   : > { %v1079_v55 = vpop.f32.mrb[10].mxu1  ;;  %v1226_v57 = vpop.f32.mrb[18].mxu0 }
 0x319   : > { %v2906_v58 = vpop.f32.mrb[11].mxu1  ;;  %v2924_v59 = vpop.f32.mrb[19].mxu0  ;;  %v1288_v60 = vsel %vm1278_vm4, %v1077_v50, -inf  ;;  %v1297_v62 = vsel %vm1278_vm4, %v4027_v51, -inf }
 0x31a   : > { %1289 = vmax.xlane.f32.xlu0 %v1288_v60  ;;  %1298 = vmax.xlane.f32.xlu1 %v1297_v62 }
 0x31e   : > { %v1174_v0 = vpop.f32.mrb[12].mxu1 }
 0x31f   : > { %v4033_v1 = vadd.f32 %v1174_v0, %v869_v63  ;;  %v2917_v7 = vpop.f32.mrb[13].mxu1 }
 0x320   : > { %v1177_v10 = vpop.f32.mrb[14].mxu1 }
 0x321   : > { %v2918_v56 = vpop.f32.mrb[15].mxu1  ;;  %v1294_v11 = vsel %vm1278_vm4, %v4033_v1, -inf }
 0x322   : > { %1295 = vmax.xlane.f32.xlu0 %v1294_v11 }
 0x326   : > { %v1272_v14 = vpop.f32.mrb[16].mxu1 }
 0x327   : > { %v1273_v15 = vadd.f32 %v1272_v14, %v877_v12  ;;  %v2929_v17 = vpop.f32.mrb[17].mxu1 }
 0x328   : > { %v1275_v20 = vpop.f32.mrb[18].mxu1 }
 0x329   : > { %v2930_v21 = vpop.f32.mrb[19].mxu1  ;;  %v1300_v22 = vsel %vm1278_vm4, %v1273_v15, -inf }
 0x32a   : > { %1301 = vmax.xlane.f32.xlu0 %v1300_v22 }
 0x32b   : > { %1472 = vrot.lane.b32.xlu1 %v3932_v13, %s3531_s9 }
 0x32f   : > { %1520 = vrot.lane.b32.xlu1 %v3935_v18, %s3531_s9 }
 0x340   : > { %1424 = vrot.lane.b32.xlu0 %v3937_v19, %s3531_s9 }
 0x396   : > { %v1287_v23 = vpop.xlane.xlu0 %1286 }
 0x397   : > { %v1305_v61 = vsub.f32 %v4013_v9, %v1287_v23 }
 0x399   : > { %v1315_v24 = vmul.f32 1.442695, %v1305_v61 }
 0x39a   : > { %v1281_v25 = vpop.xlane.xlu0 %1280 }
 0x39b   : > { %3161 = vpow2.f32 %v1315_v24  ;;  %v1303_v27 = vsub.f32 %v4015_v16, %v1281_v25 }
 0x39d   : > { %v1311_v28 = vmul.f32 1.442695, %v1303_v27 }
 0x39f   : > { %3163 = vpow2.f32 %v1311_v28  ;;  %v1284_v32 = vpop.xlane.xlu1 %1283 }
 0x3a0   : > { %v1304_v34 = vsub.f32 %v979_v33, %v1284_v32 }
 0x3a2   : > { %v1313_v35 = vmul.f32 1.442695, %v1304_v34 }
 0x3a3   : > { %v1293_v13 = vpop.xlane.xlu1 %1292 }
 0x3a4   : > { %3165 = vpow2.f32 %v1313_v35  ;;  %v1307_v36 = vsub.f32 %v1126_v40, %v1293_v13 }
 0x3a5   : > { %v4047_v18 = vpop.eup %3161 }
 0x3a6   : > { %v1319_v37 = vmul.f32 1.442695, %v1307_v36  ;;  %v1333_v19 = vsel %vm1278_vm4, %v4047_v18, 0.0 }
 0x3a7   : > { %1334 = vadd.xlane.f32.xlu1 %v1333_v19  ;;  %v1290_v9 = vpop.xlane.xlu0 %1289 }
 0x3a8   : > { %3167 = vpow2.f32 %v1319_v37  ;;  %v1306_v38 = vsub.f32 %v1077_v50, %v1290_v9  ;;  %v1299_v50 = vpop.xlane.xlu1 %1298 }
 0x3a9   : > { %v3164_v39 = vpop.eup %3163  ;;  %v1309_v52 = vsub.f32 %v4027_v51, %v1299_v50 }
 0x3aa   : > { %v1317_v16 = vmul.f32 1.442695, %v1306_v38  ;;  %v1327_v41 = vsel %vm1278_vm4, %v3164_v39, 0.0 }
 0x3ab   : > { %1328 = vadd.xlane.f32.xlu1 %v1327_v41  ;;  %v1323_v53 = vmul.f32 1.442695, %v1309_v52 }
 0x3ac   : > { %3169 = vpow2.f32 %v1317_v16  ;;  %v1473_v63 = vpop.permute.xlu1 %1472 }
 0x3ad   : > { %3171 = vpow2.f32 %v1323_v53  ;;  %v1478_v17 = vsel %vm1380_vm2, %v1473_v63, 0 }
 0x3ae   : > { %v3166_v33 = vpop.eup %3165 }
 0x3af   : > { %v1330_v42 = vsel %vm1278_vm4, %v3166_v33, 0.0  ;;  %v1296_v43 = vpop.xlane.xlu0 %1295 }
 0x3b0   : > { %1331 = vadd.xlane.f32.xlu0 %v1330_v42  ;;  %v1308_v54 = vsub.f32 %v4033_v1, %v1296_v43  ;;  %v1521_v0 = vpop.permute.xlu1 %1520 }
 0x3b1   : > { %v1526_v22 = vsel %vm1380_vm2, %v1521_v0, 0 }
 0x3b2   : > { %v4053_v40 = vpop.eup %3167  ;;  %v1321_v55 = vmul.f32 1.442695, %v1308_v54 }
 0x3b3   : > { %v1339_v44 = vsel %vm1278_vm4, %v4053_v40, 0.0 }
 0x3b4   : > { %1340 = vadd.xlane.f32.xlu1 %v1339_v44  ;;  %3173 = vpow2.f32 %v1321_v55 }
 0x3b6   : > { %v4057_v45 = vpop.eup %3169 }
 0x3b7   : > { %v1302_v46 = vpop.xlane.xlu0 %1301  ;;  %v1336_v47 = vsel %vm1278_vm4, %v4057_v45, 0.0  ;;  %v4069_v59 = vpop.eup %3171 }
 0x3b8   : > { %1337 = vadd.xlane.f32.xlu0 %v1336_v47  ;;  %v1310_v57 = vsub.f32 %v1273_v15, %v1302_v46 }
 0x3ba   : > { %v1325_v58 = vmul.f32 1.442695, %v1310_v57 }
 0x3bb   : > { %v1425_v48 = vpop.permute.xlu0 %1424 }
 0x3bc   : > { %v1430_v49 = vsel %vm1380_vm2, %v1425_v48, 0  ;;  %3175 = vpow2.f32 %v1325_v58  ;;  %v3147_v48 = vld [vmem:[#allocation7] sm:$0xff]  }
 0x3bd   : > { %2938 = vmatpush3.bf16.msra.mxu1 %v1430_v49  ;;  %v3148_v49 = vld [vmem:[#allocation7 + $0x8] sm:$0xff]  }
 0x3be   : > { %2949 = vmatprep.subr.bf16.mxu1 %v3528_v6  ;;  %v4073_v60 = vpop.eup %3173 }
 0x3c5   : > { %1616 = vrot.lane.b32.xlu1 %v3945_v30, %s3531_s9  ;;  %v1345_v30 = vsel %vm1278_vm4, %v4069_v59, 0.0 }
 0x3c6   : > { %v4077_v51 = vpop.eup %3175 }
 0x3c7   : > { %v1348_v62 = vsel %vm1278_vm4, %v4077_v51, 0.0 }
 0x3ce   : > { %1568 = vrot.lane.b32.xlu0 %v3941_v26, %s3531_s9  ;;  %v1342_v26 = vsel %vm1278_vm4, %v4073_v60, 0.0 }
 0x3e9   : > { %1346 = vadd.xlane.f32.xlu1 %v1345_v30 }
 0x3ed   : > { %1343 = vadd.xlane.f32.xlu0 %v1342_v26 }
 0x3f1   : > { %1349 = vadd.xlane.f32.xlu0 %v1348_v62 }
 0x3fa   : > { %1712 = vrot.lane.b32.xlu1 %v3948_v31, %s3531_s9 }
 0x407   : > { %1664 = vrot.lane.b32.xlu0 %v3943_v29, %s3531_s9  ;;  %s4436_s9 = sld [smem:[#allocation25_spill]] }
 0x434   : > { %v1335_v1 = vpop.xlane.xlu1 %1334 }
 0x438   : > { %v1329_v7 = vpop.xlane.xlu1 %1328 }
 0x439   : > { %3177 = vrcp.f32 %v1329_v7 }
 0x43a   : > { %3179 = vrcp.f32 %v1335_v1 }
 0x43d   : > { %v1332_v8 = vpop.xlane.xlu0 %1331 }
 0x43e   : > { %3181 = vrcp.f32 %v1332_v8 }
 0x441   : > { %v1341_v10 = vpop.xlane.xlu1 %1340 }
 0x442   : > { %3183 = vrcp.f32 %v1341_v10 }
 0x443   : > { %v3178_v56 = vpop.eup %3177 }
 0x444   : > { %v1359_v11 = vmul.f32 %v3178_v56, %v3164_v39  ;;  %v3180_v15 = vpop.eup %3179 }
 0x445   : > { %v1338_v12 = vpop.xlane.xlu0 %1337  ;;  %v1361_v20 = vmul.f32 %v3180_v15, %v4047_v18  ;;  %v1617_v34 = vpop.permute.xlu1 %1616 }
 0x446   : > { %v1367_v14 = vpack.c.bf16 %v1359_v11, %v1359_v11  ;;  %3185 = vrcp.f32 %v1338_v12  ;;  %v1622_v13 = vsel %vm1380_vm2, %v1617_v34, 0  ;;  %v1864_v34 = vunpack.c.l.bf16 %v3907_v2 }
 0x447   : > { %v1369_v61 = vpack.c.bf16 %v1361_v20, %v1361_v20 }
 0x448   : > { %v3182_v31 = vpop.eup %3181  ;;  %2934 = vmatmul.mubr.msk.bf16.vlgmr.msra.gmra.mrb[20].mxu0 %vm1278_vm4, %v1367_v14 }
 0x449   : > { %v1360_v29 = vmul.f32 %v3182_v31, %v3166_v33  ;;  %2944 = vmatpush3.bf16.msra.mxu0 %v1478_v17  ;;  %2945 = vmatprep.mubr.msk.bf16.mxu0 %vm3529_vm1, %v3528_v6  ;;  %v1569_v23 = vpop.permute.xlu0 %1568 }
 0x44a   : > { %2955 = vmatprep.subr.bf16.mxu0 %v3528_v6  ;;  %v1574_v25 = vsel %vm1380_vm2, %v1569_v23, 0 }
 0x44b   : > { %v1368_v21 = vpack.c.bf16 %v1360_v29, %v1360_v29 }
 0x44c   : > { %v3184_v24 = vpop.eup %3183 }
 0x44d   : > { %2940 = vmatmul.mubr.msk.bf16.vlgmr.msra.gmra.mrb[20].mxu1 %vm1278_vm4, %v1368_v21  ;;  %v1363_v28 = vmul.f32 %v3184_v24, %v4053_v40 }
 0x44e   : > { %2950 = vmatpush3.bf16.msra.mxu1 %v1526_v22  ;;  %2951 = vmatprep.mubr.msk.bf16.mxu1 %vm3529_vm1, %v3528_v6 }
 0x44f   : > { %2961 = vmatprep.subr.bf16.mxu1 %v3528_v6  ;;  %v1371_v36 = vpack.c.bf16 %v1363_v28, %v1363_v28 }
 0x450   : > { %2946 = vmatmul.mubr.msk.bf16.vlgmr.msra.gmra.mrb[24].mxu0 %vm1278_vm4, %v1369_v61  ;;  %v3186_v27 = vpop.eup %3185 }
 0x451   : > { %2956 = vmatpush3.bf16.msra.mxu0 %v1574_v25  ;;  %2957 = vmatprep.mubr.msk.bf16.mxu0 %vm3529_vm1, %v3528_v6  ;;  %v1362_v32 = vmul.f32 %v3186_v27, %v4057_v45 }
 0x452   : > { %2967 = vmatprep.subr.bf16.mxu0 %v3528_v6 }
 0x453   : > { %v1370_v35 = vpack.c.bf16 %v1362_v32, %v1362_v32  ;;  %v2776_v32 = vld [vmem:[#allocation8] ss:$0 sm:$0xff] }
 0x455   : > { %2952 = vmatmul.mubr.msk.bf16.vlgmr.msra.gmra.mrb[24].mxu1 %vm1278_vm4, %v1370_v35 }
 0x456   : > { %2962 = vmatpush3.bf16.msra.mxu1 %v1622_v13  ;;  %2963 = vmatprep.mubr.msk.bf16.mxu1 %vm3529_vm1, %v3528_v6 }
 0x457   : > { %2973 = vmatprep.subr.bf16.mxu1 %v3528_v6 }
 0x458   : > { %2958 = vmatmul.mubr.msk.bf16.vlgmr.msra.gmra.mrb[28].mxu0 %vm1278_vm4, %v1371_v36  ;;  %v1865_v36 = vunpack.c.h.bf16 %v3907_v2 }
 0x459   : > { %2969 = vmatprep.mubr.msk.bf16.mxu0 %vm3529_vm1, %v3528_v6 }
 0x476   : > { %v1347_v18 = vpop.xlane.xlu1 %1346 }
 0x477   : > { %3187 = vrcp.f32 %v1347_v18 }
 0x47a   : > { %v1344_v37 = vpop.xlane.xlu0 %1343  ;;  %v1713_v40 = vpop.permute.xlu1 %1712 }
 0x47b   : > { %3189 = vrcp.f32 %v1344_v37  ;;  %v1718_v45 = vsel %vm1380_vm2, %v1713_v40, 0 }
 0x47e   : > { %v1350_v19 = vpop.xlane.xlu0 %1349 }
 0x47f   : > { %3191 = vrcp.f32 %v1350_v19 }
 0x481   : > { %v3188_v9 = vpop.eup %3187 }
 0x482   : > { %v1365_v38 = vmul.f32 %v3188_v9, %v4069_v59  ;;  %v1665_v39 = vpop.permute.xlu0 %1664  ;;  %v1866_v9 = vunpack.c.l.bf16 %v3909_v3 }
 0x483   : > { %v1670_v16 = vsel %vm1380_vm2, %v1665_v39, 0 }
 0x484   : > { %v1373_v41 = vpack.c.bf16 %v1365_v38, %v1365_v38  ;;  %2968 = vmatpush3.bf16.msra.mxu0 %v1670_v16 }
 0x485   : > { %v3190_v33 = vpop.eup %3189  ;;  %2979 = vmatprep.subr.bf16.mxu0 %v3147_v48 }
 0x486   : > { %v1364_v42 = vmul.f32 %v3190_v33, %v4073_v60 }
 0x487   : > { %2970 = vmatmul.mubr.msk.bf16.vlgmr.msra.gmra.mrb[32].mxu0 %vm1278_vm4, %v1373_v41  ;;  %v1867_v41 = vunpack.c.h.bf16 %v3909_v3 }
 0x488   : > { %v1372_v43 = vpack.c.bf16 %v1364_v42, %v1364_v42  ;;  %2980 = vmatpush3.bf16.msra.mxu0 %v3147_v48  ;;  %v1868_v48 = vunpack.c.l.bf16 %v3911_v4 }
 0x489   : > { %v3192_v44 = vpop.eup %3191  ;;  %2981 = vmatprep.subr.bf16.mxu0 %v3148_v49 }
 0x48a   : > { %2964 = vmatmul.mubr.msk.bf16.vlgmr.msra.gmra.mrb[28].mxu1 %vm1278_vm4, %v1372_v43  ;;  %v1366_v46 = vmul.f32 %v3192_v44, %v4077_v51 }
 0x48b   : > { %2974 = vmatpush3.bf16.msra.mxu1 %v1718_v45  ;;  %2975 = vmatprep.mubr.msk.bf16.mxu1 %vm3529_vm1, %v3528_v6 }
 0x48c   : > { %v1374_v47 = vpack.c.bf16 %v1366_v46, %v1366_v46  ;;  %2982 = vmatpush3.bf16.msra.mxu0 %v3148_v49 }
 0x492   : > { %2976 = vmatmul.mubr.msk.bf16.vlgmr.msra.gmra.mrb[32].mxu1 %vm1278_vm4, %v1374_v47 }
 0x51b   : > { %v1418_v50 = vpop.f32.mrb[20].mxu0 }
 0x51c   : > { %v2935_v52 = vpop.f32.mrb[21].mxu0 }
 0x51d   : > { %v1421_v53 = vpop.f32.mrb[22].mxu0 }
 0x51e   : > { %v2936_v54 = vpop.f32.mrb[23].mxu0  ;;  %v1869_v53 = vunpack.c.h.bf16 %v3911_v4 }
 0x51f   : > { %v1870_v54 = vunpack.c.l.bf16 %v3919_v5 }
 0x520   : > { %v1466_v55 = vpop.f32.mrb[20].mxu1 }
 0x521   : > { %v1760_v57 = vpack.c.bf16 %v1466_v55, %v1418_v50  ;;  %v2941_v58 = vpop.f32.mrb[21].mxu1 }
 0x522   : > { %v1469_v59 = vpop.f32.mrb[22].mxu1 }
 0x523   : > { %v2942_v30 = vpop.f32.mrb[23].mxu1  ;;  %v1514_v60 = vpop.f32.mrb[24].mxu0  ;;  %2983 = vmatprep.mubr.msk.bf16.mxu0 %vm707_vm0, %v1760_v57 }
 0x524   : > { %v2947_v26 = vpop.f32.mrb[25].mxu0  ;;  %v1871_v30 = vunpack.c.h.bf16 %v3919_v5 }
 0x525   : > { %v1517_v51 = vpop.f32.mrb[26].mxu0 }
 0x526   : > { %v2948_v62 = vpop.f32.mrb[27].mxu0 }
 0x528   : > { %v1562_v63 = vpop.f32.mrb[24].mxu1 }
 0x529   : > { %v1761_v0 = vpack.c.bf16 %v1562_v63, %v1514_v60  ;;  %v2953_v1 = vpop.f32.mrb[25].mxu1 }
 0x52a   : > { %v1565_v7 = vpop.f32.mrb[26].mxu1 }
 0x52b   : > { %v1610_v8 = vpop.f32.mrb[28].mxu0  ;;  %v2954_v10 = vpop.f32.mrb[27].mxu1  ;;  %2984 = vmatmul.mubr.msk.bf16.vlgmr.msra.gmra.mrb[36].mxu0 %vm707_vm0, %v1761_v0 }
 0x52c   : > { %v2959_v56 = vpop.f32.mrb[29].mxu0 }
 0x52d   : > { %v1613_v11 = vpop.f32.mrb[30].mxu0 }
 0x52e   : > { %v2960_v12 = vpop.f32.mrb[31].mxu0 }
 0x55a   : > { %v1706_v14 = vpop.f32.mrb[32].mxu0 }
 0x55b   : > { %v2971_v15 = vpop.f32.mrb[33].mxu0 }
 0x55c   : > { %v1709_v31 = vpop.f32.mrb[34].mxu0 }
 0x55d   : > { %v1658_v17 = vpop.f32.mrb[28].mxu1  ;;  %v2972_v29 = vpop.f32.mrb[35].mxu0 }
 0x55e   : > { %v1762_v20 = vpack.c.bf16 %v1658_v17, %v1610_v8  ;;  %v2965_v21 = vpop.f32.mrb[29].mxu1 }
 0x55f   : > { %v1661_v22 = vpop.f32.mrb[30].mxu1 }
 0x560   : > { %v2966_v23 = vpop.f32.mrb[31].mxu1  ;;  %2987 = vmatprep.mubr.msk.bf16.mxu0 %vm707_vm0, %v1762_v20 }
 0x565   : > { %v1754_v61 = vpop.f32.mrb[32].mxu1 }
 0x566   : > { %v1763_v24 = vpack.c.bf16 %v1754_v61, %v1706_v14  ;;  %v2977_v25 = vpop.f32.mrb[33].mxu1 }
 0x567   : > { %v1757_v27 = vpop.f32.mrb[34].mxu1 }
 0x568   : > { %v2978_v28 = vpop.f32.mrb[35].mxu1  ;;  %2988 = vmatmul.mubr.msk.bf16.gmra.mrb[40].mxu0 %vm707_vm0, %v1763_v24  ;;  %v3149_v27 = vld [vmem:[%s4432_s14] sm:$0xff]  }
 0x569   : > { %2991 = vmatprep.subr.bf16.mxu1 %v3149_v27  ;;  %v3150_v28 = vld [vmem:[%s4432_s14 + $0x8] sm:$0xff]  }
 0x56a   : > { %2992 = vmatpush3.bf16.msra.mxu1 %v3149_v27 }
 0x56b   : > { %2993 = vmatprep.subr.bf16.mxu1 %v3150_v28 }
 0x56e   : > { %2994 = vmatpush3.bf16.msra.mxu1 %v3150_v28 }
 0x56f   : > { %3019 = vmatprep.subr.bf16.mxu1 %v3528_v6 }
 0x5fe   : > { %v2985_v35 = vpop.f32.mrb[36].mxu0 }
 0x5ff   : > { %v1833_v13 = vpop.f32.mrb[37].mxu0  ;;  %v1842_v18 = vadd.f32 %v2985_v35, %v2776_v32 }
 0x600   : > { %v1834_v37 = vadd.f32 %v2776_v32, %v1833_v13  ;;  %v2986_v19 = vpop.f32.mrb[38].mxu0 }
 0x601   : > { %v1836_v38 = vpop.f32.mrb[39].mxu0  ;;  %v1845_v33 = vadd.f32 %v2986_v19, %v2776_v32  ;;  %v1874_v43 = vadd.f32 %v1866_v9, %v1842_v18 }
 0x602   : > { %v1837_v39 = vadd.f32 %v2776_v32, %v1836_v38  ;;  %v1872_v16 = vadd.f32 %v1864_v34, %v1834_v37 }
 0x603   : > { %v1888_v2 = vsel %vm707_vm0, %v1874_v43, 0.0  ;;  %v1875_v45 = vadd.f32 %v1867_v41, %v1845_v33 }
 0x604   : > { %v1882_v42 = vsel %vm707_vm0, %v1872_v16, 0.0  ;;  %v1873_v40 = vadd.f32 %v1865_v36, %v1837_v39 }
 0x605   : > { %1883 = vadd.xlane.f32.xlu0 %v1882_v42  ;;  %v1891_v46 = vsel %vm707_vm0, %v1875_v45, 0.0 }
 0x606   : > { %v1885_v44 = vsel %vm707_vm0, %v1873_v40, 0.0 }
 0x607   : > { %1886 = vadd.xlane.f32.xlu1 %v1885_v44 }
 0x609   : > { %1889 = vadd.xlane.f32.xlu0 %v1888_v2 }
 0x60d   : > { %1892 = vadd.xlane.f32.xlu0 %v1891_v46 }
 0x63b   : > { %v2989_v47 = vpop.f32.mrb[40].mxu0 }
 0x63c   : > { %v1858_v3 = vadd.f32 %v2989_v47, %v2776_v32  ;;  %v1849_v49 = vpop.f32.mrb[41].mxu0 }
 0x63d   : > { %v1850_v50 = vadd.f32 %v2776_v32, %v1849_v49  ;;  %v2990_v52 = vpop.f32.mrb[42].mxu0 }
 0x63e   : > { %v1861_v55 = vadd.f32 %v2990_v52, %v2776_v32  ;;  %v1852_v57 = vpop.f32.mrb[43].mxu0  ;;  %v1878_v51 = vadd.f32 %v1870_v54, %v1858_v3 }
 0x63f   : > { %v1853_v58 = vadd.f32 %v2776_v32, %v1852_v57  ;;  %v1876_v59 = vadd.f32 %v1868_v48, %v1850_v50 }
 0x640   : > { %v1879_v63 = vadd.f32 %v1871_v30, %v1861_v55  ;;  %v1900_v0 = vsel %vm707_vm0, %v1878_v51, 0.0  ;;  %v2783_v30 = vld [vmem:[#allocation10] ss:$0 sm:$0xff] }
 0x641   : > { %v1894_v60 = vsel %vm707_vm0, %v1876_v59, 0.0  ;;  %v1877_v26 = vadd.f32 %v1869_v53, %v1853_v58 }
 0x642   : > { %1895 = vadd.xlane.f32.xlu1 %v1894_v60  ;;  %v1903_v4 = vsel %vm707_vm0, %v1879_v63, 0.0 }
 0x643   : > { %v1897_v62 = vsel %vm707_vm0, %v1877_v26, 0.0 }
 0x644   : > { %1898 = vadd.xlane.f32.xlu0 %v1897_v62 }
 0x646   : > { %1901 = vadd.xlane.f32.xlu1 %v1900_v0  ;;  %v2784_v0 = vld [vmem:[#allocation11] ss:$0 sm:$0xff] }
 0x648   : > { %1904 = vadd.xlane.f32.xlu0 %v1903_v4 }
 0x692   : > { %v1884_v1 = vpop.xlane.xlu0 %1883 }
 0x693   : > { %v1907_v7 = vmul.f32 0.03125, %v1884_v1 }
 0x694   : > { %v1887_v8 = vpop.xlane.xlu1 %1886 }
 0x695   : > { %v4141_v10 = vsub.f32 %v1872_v16, %v1907_v7  ;;  %v1908_v5 = vmul.f32 0.03125, %v1887_v8 }
 0x696   : > { %v1890_v56 = vpop.xlane.xlu0 %1889 }
 0x697   : > { %v4143_v11 = vsub.f32 %v1873_v40, %v1908_v5  ;;  %v1909_v12 = vmul.f32 0.03125, %v1890_v56  ;;  %v1923_v14 = vmul.f32 %v4141_v10, %v4141_v10 }
 0x699   : > { %v4147_v15 = vsub.f32 %v1874_v43, %v1909_v12  ;;  %v1931_v31 = vsel %vm707_vm0, %v1923_v14, 0.0  ;;  %v1924_v17 = vmul.f32 %v4143_v11, %v4143_v11 }
 0x69a   : > { %1932 = vadd.xlane.f32.xlu1 %v1931_v31  ;;  %v1893_v29 = vpop.xlane.xlu0 %1892 }
 0x69b   : > { %v1910_v20 = vmul.f32 0.03125, %v1893_v29  ;;  %v1934_v21 = vsel %vm707_vm0, %v1924_v17, 0.0  ;;  %v1925_v22 = vmul.f32 %v4147_v15, %v4147_v15 }
 0x69c   : > { %1935 = vadd.xlane.f32.xlu0 %v1934_v21 }
 0x69d   : > { %v4155_v23 = vsub.f32 %v1875_v45, %v1910_v20  ;;  %v1937_v61 = vsel %vm707_vm0, %v1925_v22, 0.0 }
 0x69e   : > { %1938 = vadd.xlane.f32.xlu1 %v1937_v61 }
 0x69f   : > { %v1926_v24 = vmul.f32 %v4155_v23, %v4155_v23 }
 0x6a1   : > { %v1940_v25 = vsel %vm707_vm0, %v1926_v24, 0.0 }
 0x6a2   : > { %1941 = vadd.xlane.f32.xlu0 %v1940_v25 }
 0x6cf   : > { %v1896_v32 = vpop.xlane.xlu1 %1895 }
 0x6d0   : > { %v1911_v34 = vmul.f32 0.03125, %v1896_v32 }
 0x6d1   : > { %v1899_v35 = vpop.xlane.xlu0 %1898 }
 0x6d2   : > { %v4168_v13 = vsub.f32 %v1876_v59, %v1911_v34  ;;  %v1912_v36 = vmul.f32 0.03125, %v1899_v35 }
 0x6d3   : > { %v1902_v18 = vpop.xlane.xlu1 %1901 }
 0x6d4   : > { %v4170_v37 = vsub.f32 %v1877_v26, %v1912_v36  ;;  %v1913_v19 = vmul.f32 0.03125, %v1902_v18  ;;  %v1927_v9 = vmul.f32 %v4168_v13, %v4168_v13 }
 0x6d5   : > { %v1905_v38 = vpop.xlane.xlu0 %1904 }
 0x6d6   : > { %v4174_v39 = vsub.f32 %v1878_v51, %v1913_v19  ;;  %v1914_v16 = vmul.f32 0.03125, %v1905_v38  ;;  %v1943_v41 = vsel %vm707_vm0, %v1927_v9, 0.0  ;;  %v1928_v33 = vmul.f32 %v4170_v37, %v4170_v37 }
 0x6d7   : > { %1944 = vadd.xlane.f32.xlu1 %v1943_v41 }
 0x6d8   : > { %v4179_v42 = vsub.f32 %v1879_v63, %v1914_v16  ;;  %v1946_v40 = vsel %vm707_vm0, %v1928_v33, 0.0  ;;  %v1929_v43 = vmul.f32 %v4174_v39, %v4174_v39 }
 0x6d9   : > { %1947 = vadd.xlane.f32.xlu0 %v1946_v40 }
 0x6da   : > { %v1949_v44 = vsel %vm707_vm0, %v1929_v43, 0.0  ;;  %v1930_v2 = vmul.f32 %v4179_v42, %v4179_v42 }
 0x6db   : > { %1950 = vadd.xlane.f32.xlu1 %v1949_v44 }
 0x6dc   : > { %v1952_v45 = vsel %vm707_vm0, %v1930_v2, 0.0 }
 0x6dd   : > { %1953 = vadd.xlane.f32.xlu0 %v1952_v45 }
 0x727   : > { %v1933_v46 = vpop.xlane.xlu1 %1932 }
 0x728   : > { %v1955_v47 = vmul.f32 0.03125, %v1933_v46  ;;  %v3152_v46 = vld [vmem:[%s4433_s28 + $0x8] sm:$0xff]  }
 0x729   : > { %v1936_v48 = vpop.xlane.xlu0 %1935 }
 0x72a   : > { %v1963_v3 = vadd.f32 1e-12, %v1955_v47  ;;  %v1956_v49 = vmul.f32 0.03125, %v1936_v48  ;;  %v3153_v47 = vld [vmem:[%s4433_s28 + $0x10] sm:$0xff]   ;;  %v3154_v48 = vld [vmem:[%s4433_s28 + $0x18] sm:$0xff]  }
 0x72b   : > { %v1939_v50 = vpop.xlane.xlu1 %1938 }
 0x72c   : > { %3193 = vrsqrt.f32 %v1963_v3  ;;  %v1964_v52 = vadd.f32 1e-12, %v1956_v49  ;;  %v1957_v53 = vmul.f32 0.03125, %v1939_v50  ;;  %v4238_v3 = vld [vmem:[#allocation13] ss:$0 sm:$0xff] }
 0x72e   : > { %3195 = vrsqrt.f32 %v1964_v52  ;;  %v1965_v54 = vadd.f32 1e-12, %v1957_v53 }
 0x72f   : > { %v1942_v55 = vpop.xlane.xlu0 %1941 }
 0x730   : > { %3197 = vrsqrt.f32 %v1965_v54  ;;  %v1958_v57 = vmul.f32 0.03125, %v1942_v55 }
 0x732   : > { %v1966_v58 = vadd.f32 1e-12, %v1958_v57 }
 0x734   : > { %3199 = vrsqrt.f32 %v1966_v58 }
 0x736   : > { %v3194_v59 = vpop.eup %3193 }
 0x737   : > { %v1979_v60 = vmul.f32 %v3194_v59, %v4141_v10 }
 0x738   : > { %v3196_v26 = vpop.eup %3195 }
 0x739   : > { %v1980_v51 = vmul.f32 %v3196_v26, %v4143_v11  ;;  %v1993_v62 = vmul.f32 %v2783_v30, %v1979_v60 }
 0x73a   : > { %v3198_v63 = vpop.eup %3197 }
 0x73b   : > { %v1981_v4 = vmul.f32 %v3198_v63, %v4147_v15  ;;  %v1994_v1 = vmul.f32 %v2783_v30, %v1980_v51  ;;  %v4191_v7 = vadd.f32 %v2784_v0, %v1993_v62 }
 0x73d   : > { %v4193_v8 = vadd.f32 %v2784_v0, %v1994_v1  ;;  %v1995_v56 = vmul.f32 %v2783_v30, %v1981_v4 }
 0x73e   : > { %v3200_v5 = vpop.eup %3199 }
 0x73f   : > { %v1982_v12 = vmul.f32 %v3200_v5, %v4155_v23  ;;  %v2015_v10 = vpack.c.bf16 %v4193_v8, %v4191_v7  ;;  %v4199_v11 = vadd.f32 %v2784_v0, %v1995_v56 }
 0x741   : > { %v1996_v14 = vmul.f32 %v2783_v30, %v1982_v12  ;;  %2995 = vmatprep.mubr.msk.bf16.mxu1 %vm707_vm0, %v2015_v10 }
 0x743   : > { %v4201_v31 = vadd.f32 %v2784_v0, %v1996_v14 }
 0x745   : > { %v2016_v15 = vpack.c.bf16 %v4201_v31, %v4199_v11 }
 0x747   : > { %2996 = vmatmul.mubr.msk.bf16.vlgmr.msra.gmra.mrb[36].mxu1 %vm707_vm0, %v2016_v15 }
 0x764   : > { %v1945_v17 = vpop.xlane.xlu1 %1944 }
 0x765   : > { %v1959_v29 = vmul.f32 0.03125, %v1945_v17 }
 0x766   : > { %v1948_v20 = vpop.xlane.xlu0 %1947 }
 0x767   : > { %v1967_v21 = vadd.f32 1e-12, %v1959_v29  ;;  %v1960_v22 = vmul.f32 0.03125, %v1948_v20 }
 0x768   : > { %v1951_v23 = vpop.xlane.xlu1 %1950 }
 0x769   : > { %3201 = vrsqrt.f32 %v1967_v21  ;;  %v1968_v61 = vadd.f32 1e-12, %v1960_v22  ;;  %v1961_v24 = vmul.f32 0.03125, %v1951_v23 }
 0x76a   : > { %v1954_v25 = vpop.xlane.xlu0 %1953 }
 0x76b   : > { %3203 = vrsqrt.f32 %v1968_v61  ;;  %v1969_v27 = vadd.f32 1e-12, %v1961_v24  ;;  %v1962_v28 = vmul.f32 0.03125, %v1954_v25 }
 0x76d   : > { %3205 = vrsqrt.f32 %v1969_v27  ;;  %v1970_v32 = vadd.f32 1e-12, %v1962_v28 }
 0x76f   : > { %3207 = vrsqrt.f32 %v1970_v32 }
 0x773   : > { %v3202_v34 = vpop.eup %3201 }
 0x774   : > { %v1983_v35 = vmul.f32 %v3202_v34, %v4168_v13 }
 0x775   : > { %v3204_v36 = vpop.eup %3203 }
 0x776   : > { %v1984_v18 = vmul.f32 %v3204_v36, %v4170_v37  ;;  %v1997_v19 = vmul.f32 %v2783_v30, %v1983_v35 }
 0x777   : > { %v3206_v9 = vpop.eup %3205 }
 0x778   : > { %v1985_v38 = vmul.f32 %v3206_v9, %v4174_v39  ;;  %v1998_v16 = vmul.f32 %v2783_v30, %v1984_v18  ;;  %v4210_v40 = vadd.f32 %v2784_v0, %v1997_v19 }
 0x779   : > { %v3208_v41 = vpop.eup %3207 }
 0x77a   : > { %v1986_v33 = vmul.f32 %v3208_v41, %v4179_v42  ;;  %v4212_v43 = vadd.f32 %v2784_v0, %v1998_v16  ;;  %v1999_v44 = vmul.f32 %v2783_v30, %v1985_v38  ;;  %v3151_v42 = vld [vmem:[%s4433_s28] sm:$0xff]  }
 0x77b   : > { %3003 = vmatprep.subr.bf16.mxu0 %v3151_v42 }
 0x77c   : > { %v2017_v2 = vpack.c.bf16 %v4212_v43, %v4210_v40  ;;  %v2000_v13 = vmul.f32 %v2783_v30, %v1986_v33  ;;  %v4217_v37 = vadd.f32 %v2784_v0, %v1999_v44  ;;  %3004 = vmatpush3.bf16.msra.mxu0 %v3151_v42 }
 0x77d   : > { %3005 = vmatprep.subr.bf16.mxu0 %v3152_v46 }
 0x77e   : > { %2999 = vmatprep.mubr.msk.bf16.mxu1 %vm707_vm0, %v2017_v2  ;;  %v4219_v45 = vadd.f32 %v2784_v0, %v2000_v13 }
 0x780   : > { %v2018_v39 = vpack.c.bf16 %v4219_v45, %v4217_v37  ;;  %3006 = vmatpush3.bf16.msra.mxu0 %v3152_v46 }
 0x781   : > { %3007 = vmatprep.subr.bf16.mxu0 %v3153_v47 }
 0x782   : > { %3000 = vmatmul.mubr.msk.bf16.gmra.mrb[40].mxu1 %vm707_vm0, %v2018_v39 }
 0x783   : > { %3023 = vmatprep.mubr.msk.bf16.mxu1 %vm3529_vm1, %v3528_v6 }
 0x784   : > { %3008 = vmatpush3.bf16.msra.mxu0 %v3153_v47 }
 0x785   : > { %3009 = vmatprep.subr.bf16.mxu0 %v3154_v48 }
 0x788   : > { %3010 = vmatpush3.bf16.msra.mxu0 %v3154_v48 }
 0x81a   : > { %v2997_v49 = vpop.f32.mrb[36].mxu1 }
 0x81b   : > { %v2097_v50 = vadd.f32 %v2997_v49, %v4238_v3  ;;  %v2088_v52 = vpop.f32.mrb[37].mxu1 }
 0x81c   : > { %v2089_v53 = vadd.f32 %v4238_v3, %v2088_v52  ;;  %v2998_v54 = vpop.f32.mrb[38].mxu1 }
 0x81d   : > { %v2129_v55 = vmul.f32 0.044715, %v2097_v50  ;;  %v2100_v57 = vadd.f32 %v2998_v54, %v4238_v3  ;;  %v2091_v58 = vpop.f32.mrb[39].mxu1  ;;  %v2121_v28 = vmul.f32 0.5, %v2097_v50 }
 0x81e   : > { %v2127_v59 = vmul.f32 0.044715, %v2089_v53  ;;  %v2092_v30 = vadd.f32 %v4238_v3, %v2091_v58  ;;  %v2119_v35 = vmul.f32 0.5, %v2089_v53 }
 0x81f   : > { %v2137_v60 = vmul.f32 %v2129_v55, %v2097_v50  ;;  %v2130_v26 = vmul.f32 0.044715, %v2100_v57  ;;  %v2122_v32 = vmul.f32 0.5, %v2100_v57 }
 0x820   : > { %v2135_v51 = vmul.f32 %v2127_v59, %v2089_v53  ;;  %v2128_v62 = vmul.f32 0.044715, %v2092_v30  ;;  %v2120_v36 = vmul.f32 0.5, %v2092_v30 }
 0x821   : > { %v2145_v63 = vmul.f32 %v2137_v60, %v2097_v50  ;;  %v2138_v0 = vmul.f32 %v2130_v26, %v2100_v57 }
 0x822   : > { %v2143_v4 = vmul.f32 %v2135_v51, %v2089_v53  ;;  %v2136_v1 = vmul.f32 %v2128_v62, %v2092_v30 }
 0x823   : > { %v2153_v5 = vadd.f32 %v2145_v63, %v2097_v50  ;;  %v2146_v56 = vmul.f32 %v2138_v0, %v2100_v57 }
 0x824   : > { %v2151_v12 = vadd.f32 %v2143_v4, %v2089_v53  ;;  %v2144_v10 = vmul.f32 %v2136_v1, %v2092_v30 }
 0x825   : > { %v2161_v14 = vmul.f32 0.7978846, %v2153_v5  ;;  %v2154_v15 = vadd.f32 %v2146_v56, %v2100_v57 }
 0x826   : > { %v2159_v17 = vmul.f32 0.7978846, %v2151_v12  ;;  %v2152_v29 = vadd.f32 %v2144_v10, %v2092_v30 }
 0x827   : > { %3209 = vtanh.f32 %v2161_v14  ;;  %v2162_v20 = vmul.f32 0.7978846, %v2154_v15 }
 0x828   : > { %3211 = vtanh.f32 %v2159_v17  ;;  %v2160_v21 = vmul.f32 0.7978846, %v2152_v29 }
 0x829   : > { %3213 = vtanh.f32 %v2162_v20 }
 0x82a   : > { %3215 = vtanh.f32 %v2160_v21 }
 0x831   : > { %v3210_v22 = vpop.eup %3209 }
 0x832   : > { %v3212_v23 = vpop.eup %3211  ;;  %v2177_v61 = vadd.f32 1.0, %v3210_v22 }
 0x833   : > { %v3214_v24 = vpop.eup %3213  ;;  %v2175_v25 = vadd.f32 1.0, %v3212_v23 }
 0x834   : > { %v3216_v27 = vpop.eup %3215  ;;  %v2178_v34 = vadd.f32 1.0, %v3214_v24  ;;  %v2185_v19 = vmul.f32 %v2177_v61, %v2121_v28 }
 0x835   : > { %v2176_v18 = vadd.f32 1.0, %v3216_v27  ;;  %v2183_v38 = vmul.f32 %v2175_v25, %v2119_v35  ;;  %v2792_v35 = vld [vmem:[%s4434_s17] ss:$0 sm:$0xff]  ;;  %s4438_s17 = sld [smem:[#allocation28_spill]] }
 0x836   : > { %v2186_v9 = vmul.f32 %v2178_v34, %v2122_v32 }
 0x837   : > { %v2184_v16 = vmul.f32 %v2176_v18, %v2120_v36 }
 0x838   : > { %v2192_v41 = vpack.c.bf16 %v2186_v9, %v2185_v19 }
 0x839   : > { %v2191_v33 = vpack.c.bf16 %v2184_v16, %v2183_v38 }
 0x83b   : > { %3011 = vmatprep.mubr.msk.bf16.mxu0 %vm2234_vm5, %v2191_v33  ;;  %s4335_s15 = scalar_lea.hbm %s4438_s17, %s2807_s11 }
 0x83c   : > { %3012 = vmatmul.mubr.msk.bf16.vlgmr.msra.gmra.mrb[44].mxu0 %vm2234_vm5, %v2192_v41 }
 0x855   : > { %v3001_v44 = vpop.f32.mrb[40].mxu1 }
 0x856   : > { %v2113_v2 = vadd.f32 %v3001_v44, %v4238_v3  ;;  %v2104_v13 = vpop.f32.mrb[41].mxu1 }
 0x857   : > { %v2105_v39 = vadd.f32 %v4238_v3, %v2104_v13  ;;  %v3002_v42 = vpop.f32.mrb[42].mxu1 }
 0x858   : > { %v2133_v46 = vmul.f32 0.044715, %v2113_v2  ;;  %v2116_v47 = vadd.f32 %v3002_v42, %v4238_v3  ;;  %v2107_v48 = vpop.f32.mrb[43].mxu1  ;;  %v2125_v29 = vmul.f32 0.5, %v2113_v2 }
 0x859   : > { %v2131_v49 = vmul.f32 0.044715, %v2105_v39  ;;  %v2108_v50 = vadd.f32 %v4238_v3, %v2107_v48  ;;  %v2123_v22 = vmul.f32 0.5, %v2105_v39 }
 0x85a   : > { %v2141_v52 = vmul.f32 %v2133_v46, %v2113_v2  ;;  %v2134_v53 = vmul.f32 0.044715, %v2116_v47  ;;  %v2126_v20 = vmul.f32 0.5, %v2116_v47 }
 0x85b   : > { %v2139_v54 = vmul.f32 %v2131_v49, %v2105_v39  ;;  %v2132_v55 = vmul.f32 0.044715, %v2108_v50  ;;  %v2124_v23 = vmul.f32 0.5, %v2108_v50 }
 0x85c   : > { %v2149_v57 = vmul.f32 %v2141_v52, %v2113_v2  ;;  %v2142_v58 = vmul.f32 %v2134_v53, %v2116_v47 }
 0x85d   : > { %v2147_v59 = vmul.f32 %v2139_v54, %v2105_v39  ;;  %v2140_v30 = vmul.f32 %v2132_v55, %v2108_v50 }
 0x85e   : > { %v2157_v60 = vadd.f32 %v2149_v57, %v2113_v2  ;;  %v2150_v26 = vmul.f32 %v2142_v58, %v2116_v47 }
 0x85f   : > { %v2155_v51 = vadd.f32 %v2147_v59, %v2105_v39  ;;  %v2148_v62 = vmul.f32 %v2140_v30, %v2108_v50 }
 0x860   : > { %v2165_v63 = vmul.f32 0.7978846, %v2157_v60  ;;  %v2158_v0 = vadd.f32 %v2150_v26, %v2116_v47 }
 0x861   : > { %v2163_v4 = vmul.f32 0.7978846, %v2155_v51  ;;  %v2156_v1 = vadd.f32 %v2148_v62, %v2108_v50 }
 0x862   : > { %3217 = vtanh.f32 %v2165_v63  ;;  %v2166_v5 = vmul.f32 0.7978846, %v2158_v0 }
 0x863   : > { %3219 = vtanh.f32 %v2163_v4  ;;  %v2164_v3 = vmul.f32 0.7978846, %v2156_v1 }
 0x864   : > { %3221 = vtanh.f32 %v2166_v5 }
 0x865   : > { %3223 = vtanh.f32 %v2164_v3 }
 0x86c   : > { %v3218_v56 = vpop.eup %3217 }
 0x86d   : > { %v3220_v12 = vpop.eup %3219  ;;  %v2181_v10 = vadd.f32 1.0, %v3218_v56 }
 0x86e   : > { %v3222_v14 = vpop.eup %3221  ;;  %v2179_v15 = vadd.f32 1.0, %v3220_v12 }
 0x86f   : > { %v3224_v17 = vpop.eup %3223  ;;  %v2182_v21 = vadd.f32 1.0, %v3222_v14  ;;  %v2189_v24 = vmul.f32 %v2181_v10, %v2125_v29 }
 0x870   : > { %v2180_v61 = vadd.f32 1.0, %v3224_v17  ;;  %v2187_v27 = vmul.f32 %v2179_v15, %v2123_v22 }
 0x871   : > { %v2190_v25 = vmul.f32 %v2182_v21, %v2126_v20 }
 0x872   : > { %v2188_v28 = vmul.f32 %v2180_v61, %v2124_v23 }
 0x873   : > { %v2194_v32 = vpack.c.bf16 %v2190_v25, %v2189_v24 }
 0x874   : > { %v2193_v34 = vpack.c.bf16 %v2188_v28, %v2187_v27 }
 0x876   : > { %3015 = vmatprep.mubr.msk.bf16.mxu0 %vm2234_vm5, %v2193_v34 }
 0x877   : > { %3016 = vmatmul.mubr.msk.bf16.gmra.mrb[48].mxu0 %vm2234_vm5, %v2194_v32 }
 0x90f   : > { %v3013_v36 = vpop.f32.mrb[44].mxu0 }
 0x910   : > { %v2290_v18 = vadd.f32 %v3013_v36, %v2792_v35  ;;  %v2281_v19 = vpop.f32.mrb[45].mxu0 }
 0x911   : > { %v2282_v9 = vadd.f32 %v2792_v35, %v2281_v19  ;;  %v3014_v38 = vpop.f32.mrb[46].mxu0 }
 0x912   : > { %v2293_v16 = vadd.f32 %v3014_v38, %v2792_v35  ;;  %v2284_v41 = vpop.f32.mrb[47].mxu0  ;;  %v2314_v33 = vadd.f32 %v2290_v18, %v4199_v11 }
 0x913   : > { %v2285_v44 = vadd.f32 %v2792_v35, %v2284_v41  ;;  %v2312_v2 = vadd.f32 %v2282_v9, %v4191_v7 }
 0x914   : > { %v2328_v13 = vsel %vm707_vm0, %v2314_v33, 0.0  ;;  %v2315_v39 = vadd.f32 %v2293_v16, %v4201_v31 }
 0x915   : > { %2329 = vadd.xlane.f32.xlu0 %v2328_v13  ;;  %v2322_v42 = vsel %vm707_vm0, %v2312_v2, 0.0  ;;  %v2313_v46 = vadd.f32 %v2285_v44, %v4193_v8  ;;  %v3156_v13 = vld [vmem:[%s4435_s29 + $0x8] sm:$0xff]  }
 0x916   : > { %2323 = vadd.xlane.f32.xlu1 %v2322_v42  ;;  %v2331_v47 = vsel %vm707_vm0, %v2315_v39, 0.0 }
 0x917   : > { %v2325_v48 = vsel %vm707_vm0, %v2313_v46, 0.0 }
 0x919   : > { %2332 = vadd.xlane.f32.xlu0 %v2331_v47 }
 0x91a   : > { %2326 = vadd.xlane.f32.xlu1 %v2325_v48 }
 0x94a   : > { %v3017_v11 = vpop.f32.mrb[48].mxu0 }
 0x94b   : > { %v2306_v49 = vadd.f32 %v3017_v11, %v2792_v35  ;;  %v2297_v50 = vpop.f32.mrb[49].mxu0 }
 0x94c   : > { %v2298_v7 = vadd.f32 %v2792_v35, %v2297_v50  ;;  %v3018_v52 = vpop.f32.mrb[50].mxu0 }
 0x94d   : > { %v2309_v53 = vadd.f32 %v3018_v52, %v2792_v35  ;;  %v2300_v54 = vpop.f32.mrb[51].mxu0  ;;  %v2318_v58 = vadd.f32 %v2306_v49, %v4217_v37 }
 0x94e   : > { %v2301_v31 = vadd.f32 %v2792_v35, %v2300_v54  ;;  %v2316_v55 = vadd.f32 %v2298_v7, %v4210_v40 }
 0x94f   : > { %v2319_v30 = vadd.f32 %v2309_v53, %v4219_v45  ;;  %v2340_v60 = vsel %vm707_vm0, %v2318_v58, 0.0 }
 0x950   : > { %v2334_v57 = vsel %vm707_vm0, %v2316_v55, 0.0  ;;  %v2317_v8 = vadd.f32 %v2301_v31, %v4212_v43 }
 0x951   : > { %2335 = vadd.xlane.f32.xlu1 %v2334_v57  ;;  %v2343_v26 = vsel %vm707_vm0, %v2319_v30, 0.0 }
 0x952   : > { %v2337_v59 = vsel %vm707_vm0, %v2317_v8, 0.0 }
 0x953   : > { %2338 = vadd.xlane.f32.xlu0 %v2337_v59 }
 0x955   : > { %2341 = vadd.xlane.f32.xlu1 %v2340_v60 }
 0x957   : > { %2344 = vadd.xlane.f32.xlu0 %v2343_v26 }
 0x9a2   : > { %v2330_v51 = vpop.xlane.xlu0 %2329 }
 0x9a3   : > { %v2348_v40 = vmul.f32 0.03125, %v2330_v51  ;;  %v2324_v62 = vpop.xlane.xlu1 %2323 }
 0x9a4   : > { %v2346_v63 = vmul.f32 0.03125, %v2324_v62  ;;  %v2802_v62 = vld [vmem:[%s4437_s13] ss:$0 sm:$0xff]  ;;  %s3443_s13 = sshll.u32 %s3533_s25, 4  ;;  %s3444_s13 = int_to_ptr.vmem [resolvable:$false] %s3443_s13 }
 0x9a5   : > { %v4271_v0 = vsub.f32 %v2314_v33, %v2348_v40  ;;  %s3445_s12 = scalar_lea.vmem %s3444_s13, 256  ;;  %p3446_p2 = scmp.lt.s32.totalorder %s4337_s19, %s3444_s13 }
 0x9a6   : > { %v4273_v43 = vsub.f32 %v2312_v2, %v2346_v63  ;;  %v2333_v37 = vpop.xlane.xlu0 %2332  ;;  %v3155_v2 = vld [vmem:[%s4435_s29] sm:$0xff]  }
 0x9a7   : > { %v2349_v4 = vmul.f32 0.03125, %v2333_v37  ;;  %v2327_v1 = vpop.xlane.xlu1 %2326  ;;  %v2364_v45 = vmul.f32 %v4271_v0, %v4271_v0  ;;  %3020 = vmatpush3.bf16.msra.mxu1 %v3155_v2 }
 0x9a8   : > { %v2347_v5 = vmul.f32 0.03125, %v2327_v1  ;;  %v2362_v3 = vmul.f32 %v4273_v43, %v4273_v43  ;;  %3021 = vmatprep.subr.bf16.mxu1 %v3528_v6 }
 0x9a9   : > { %v4279_v56 = vsub.f32 %v2315_v39, %v2349_v4  ;;  %v2376_v12 = vsel %vm707_vm0, %v2364_v45, 0.0 }
 0x9aa   : > { %v2355_v10 = vsub.f32 %v2313_v46, %v2347_v5  ;;  %2377 = vadd.xlane.f32.xlu0 %v2376_v12  ;;  %v2370_v14 = vsel %vm707_vm0, %v2362_v3, 0.0 }
 0x9ab   : > { %2371 = vadd.xlane.f32.xlu1 %v2370_v14  ;;  %v2365_v15 = vmul.f32 %v4279_v56, %v4279_v56  ;;  %3022 = vmatpush3.bf16.msra.mxu1 %v3156_v13 }
 0x9ac   : > { %v2363_v17 = vmul.f32 %v2355_v10, %v2355_v10 }
 0x9ad   : > { %v2379_v29 = vsel %vm707_vm0, %v2365_v15, 0.0 }
 0x9ae   : > { %2380 = vadd.xlane.f32.xlu0 %v2379_v29  ;;  %v2373_v20 = vsel %vm707_vm0, %v2363_v17, 0.0 }
 0x9af   : > { %2374 = vadd.xlane.f32.xlu1 %v2373_v20 }
 0x9de   : > { %v2336_v21 = vpop.xlane.xlu1 %2335 }
 0x9df   : > { %v2350_v22 = vmul.f32 0.03125, %v2336_v21 }
 0x9e0   : > { %v2339_v23 = vpop.xlane.xlu0 %2338 }
 0x9e1   : > { %v4287_v61 = vsub.f32 %v2316_v55, %v2350_v22  ;;  %v2351_v24 = vmul.f32 0.03125, %v2339_v23 }
 0x9e2   : > { %v2342_v25 = vpop.xlane.xlu1 %2341 }
 0x9e3   : > { %v4289_v27 = vsub.f32 %v2317_v8, %v2351_v24  ;;  %v2352_v28 = vmul.f32 0.03125, %v2342_v25  ;;  %v2366_v32 = vmul.f32 %v4287_v61, %v4287_v61  ;;  %v2801_v8 = vld [vmem:[%s4436_s9] ss:$0 sm:$0xff] }
 0x9e4   : > { %v2345_v34 = vpop.xlane.xlu0 %2344 }
 0x9e5   : > { %v4293_v35 = vsub.f32 %v2318_v58, %v2352_v28  ;;  %v2353_v36 = vmul.f32 0.03125, %v2345_v34  ;;  %v2382_v18 = vsel %vm707_vm0, %v2366_v32, 0.0  ;;  %v2367_v19 = vmul.f32 %v4289_v27, %v4289_v27 }
 0x9e6   : > { %2383 = vadd.xlane.f32.xlu1 %v2382_v18 }
 0x9e7   : > { %v4298_v9 = vsub.f32 %v2319_v30, %v2353_v36  ;;  %v2385_v38 = vsel %vm707_vm0, %v2367_v19, 0.0  ;;  %v2368_v16 = vmul.f32 %v4293_v35, %v4293_v35 }
 0x9e8   : > { %2386 = vadd.xlane.f32.xlu0 %v2385_v38 }
 0x9e9   : > { %v2388_v41 = vsel %vm707_vm0, %v2368_v16, 0.0  ;;  %v2369_v33 = vmul.f32 %v4298_v9, %v4298_v9 }
 0x9ea   : > { %2389 = vadd.xlane.f32.xlu1 %v2388_v41 }
 0x9eb   : > { %v2391_v44 = vsel %vm707_vm0, %v2369_v33, 0.0 }
 0x9ec   : > { %2392 = vadd.xlane.f32.xlu0 %v2391_v44 }
 0xa37   : > { %v2378_v46 = vpop.xlane.xlu0 %2377 }
 0xa38   : > { %v2372_v39 = vpop.xlane.xlu1 %2371  ;;  %v2396_v48 = vmul.f32 0.03125, %v2378_v46 }
 0xa39   : > { %v2394_v49 = vmul.f32 0.03125, %v2372_v39 }
 0xa3a   : > { %v2404_v7 = vadd.f32 1e-12, %v2396_v48 }
 0xa3b   : > { %v2381_v50 = vpop.xlane.xlu0 %2380  ;;  %v2402_v53 = vadd.f32 1e-12, %v2394_v49 }
 0xa3c   : > { %v2375_v42 = vpop.xlane.xlu1 %2374  ;;  %v2397_v52 = vmul.f32 0.03125, %v2381_v50 }
 0xa3d   : > { %v2395_v47 = vmul.f32 0.03125, %v2375_v42 }
 0xa3e   : > { %v2405_v54 = vadd.f32 1e-12, %v2397_v52 }
 0xa3f   : > { %v2403_v11 = vadd.f32 1e-12, %v2395_v47 }
 0xa41   : > { %3225 = vrsqrt.f32 %v2403_v11 }
 0xa42   : > { %3227 = vrsqrt.f32 %v2404_v7 }
 0xa43   : > { %3229 = vrsqrt.f32 %v2402_v53 }
 0xa44   : > { %3231 = vrsqrt.f32 %v2405_v54 }
 0xa4b   : > { %v3226_v6 = vpop.eup %3225 }
 0xa4c   : > { %v2419_v31 = vmul.f32 %v3226_v6, %v2355_v10  ;;  %v3228_v55 = vpop.eup %3227 }
 0xa4d   : > { %v3230_v57 = vpop.eup %3229  ;;  %v2420_v58 = vmul.f32 %v3228_v55, %v4271_v0 }
 0xa4e   : > { %v2433_v59 = vmul.f32 %v2801_v8, %v2419_v31  ;;  %v3232_v26 = vpop.eup %3231  ;;  %v2418_v51 = vmul.f32 %v3230_v57, %v4273_v43 }
 0xa4f   : > { %v2434_v4 = vmul.f32 %v2801_v8, %v2420_v58  ;;  %v2421_v5 = vmul.f32 %v3232_v26, %v4279_v56 }
 0xa50   : > { %v2447_v1 = vadd.f32 %v2802_v62, %v2433_v59  ;;  %v2432_v12 = vmul.f32 %v2801_v8, %v2418_v51 }
 0xa51   : > { %v2448_v17 = vadd.f32 %v2802_v62, %v2434_v4  ;;  %v2435_v29 = vmul.f32 %v2801_v8, %v2421_v5 }
 0xa52   : > { %v2455_v15 = vpack.c.bf16 %v2447_v1, %v2447_v1  ;;  %v2446_v21 = vadd.f32 %v2802_v62, %v2432_v12 }
 0xa53   : > { %v2456_v23 = vpack.c.bf16 %v2448_v17, %v2448_v17  ;;  %v2449_v24 = vadd.f32 %v2802_v62, %v2435_v29 }
 0xa54   : > { %v2476_v22 = vunpack.c.l.b16 %v2455_v15  ;;  %v2454_v25 = vpack.c.bf16 %v2446_v21, %v2446_v21 }
 0xa55   : > { %v2477_v36 = vunpack.c.l.b16 %v2456_v23  ;;  %v2457_v18 = vpack.c.bf16 %v2449_v24, %v2449_v24 }
 0xa56   : > { %v2483_v28 = vrot.slane %v2476_v22, 7  ;;  %v2475_v19 = vunpack.c.l.b16 %v2454_v25 }
 0xa57   : > { %v2486_v42 = vrot.slane %v2477_v36, 6  ;;  %v2478_v46 = vunpack.c.l.b16 %v2457_v18 }
 0xa58   : > { %v2485_v33 = vsel %vm2484_vm6, %v2483_v28, %v2475_v19 }
 0xa59   : > { %v2488_v49 = vsel %vm2487_vm7, %v2486_v42, %v2485_v33  ;;  %v2489_v53 = vrot.slane %v2478_v46, 5 }
 0xa5b   : > { %v2491_v55 = vsel %vm2490_vm8, %v2489_v53, %v2488_v49 }
 0xa73   : > { %v2384_v30 = vpop.xlane.xlu1 %2383 }
 0xa74   : > { %v2398_v60 = vmul.f32 0.03125, %v2384_v30 }
 0xa75   : > { %v2387_v40 = vpop.xlane.xlu0 %2386 }
 0xa76   : > { %v2406_v63 = vadd.f32 1e-12, %v2398_v60  ;;  %v2399_v37 = vmul.f32 0.03125, %v2387_v40 }
 0xa77   : > { %v2390_v45 = vpop.xlane.xlu1 %2389 }
 0xa78   : > { %3233 = vrsqrt.f32 %v2406_v63  ;;  %v2407_v0 = vadd.f32 1e-12, %v2399_v37  ;;  %v2400_v3 = vmul.f32 0.03125, %v2390_v45 }
 0xa79   : > { %v2393_v10 = vpop.xlane.xlu0 %2392 }
 0xa7a   : > { %3235 = vrsqrt.f32 %v2407_v0  ;;  %v2408_v14 = vadd.f32 1e-12, %v2400_v3  ;;  %v2401_v43 = vmul.f32 0.03125, %v2393_v10 }
 0xa7c   : > { %3237 = vrsqrt.f32 %v2408_v14  ;;  %v2409_v20 = vadd.f32 1e-12, %v2401_v43 }
 0xa7e   : > { %3239 = vrsqrt.f32 %v2409_v20 }
 0xa82   : > { %v3234_v56 = vpop.eup %3233 }
 0xa83   : > { %v2422_v32 = vmul.f32 %v3234_v56, %v4287_v61 }
 0xa84   : > { %v3236_v34 = vpop.eup %3235 }
 0xa85   : > { %v2436_v38 = vmul.f32 %v2801_v8, %v2422_v32  ;;  %v2423_v16 = vmul.f32 %v3236_v34, %v4289_v27 }
 0xa86   : > { %v3238_v41 = vpop.eup %3237 }
 0xa87   : > { %v2450_v44 = vadd.f32 %v2802_v62, %v2436_v38  ;;  %v2437_v2 = vmul.f32 %v2801_v8, %v2423_v16  ;;  %v2424_v13 = vmul.f32 %v3238_v41, %v4293_v35 }
 0xa88   : > { %v3240_v39 = vpop.eup %3239 }
 0xa89   : > { %v2458_v47 = vpack.c.bf16 %v2450_v44, %v2450_v44  ;;  %v2451_v61 = vadd.f32 %v2802_v62, %v2437_v2  ;;  %v2438_v48 = vmul.f32 %v2801_v8, %v2424_v13  ;;  %v2425_v11 = vmul.f32 %v3240_v39, %v4298_v9 }
 0xa8b   : > { %v2479_v50 = vunpack.c.l.b16 %v2458_v47  ;;  %v2459_v7 = vpack.c.bf16 %v2451_v61, %v2451_v61  ;;  %v2452_v27 = vadd.f32 %v2802_v62, %v2438_v48  ;;  %v2439_v52 = vmul.f32 %v2801_v8, %v2425_v11 }
 0xa8d   : > { %v2492_v54 = vrot.slane %v2479_v50, 4  ;;  %v2480_v6 = vunpack.c.l.b16 %v2459_v7  ;;  %v2460_v31 = vpack.c.bf16 %v2452_v27, %v2452_v27  ;;  %v2453_v35 = vadd.f32 %v2802_v62, %v2439_v52  ;;  %v2466_v62 = vld [vmem:[%s3885_s18] sm:$0xff]  ;;  %s3439_s18 = scalar_lea.vmem %s4337_s19, 128 }
 0xa8e   : > { %p3440_p12 = scmp.ne.s32.totalorder %s4337_s19, %s3439_s18  ;;  %p3447_p3 = scmp.lt.s32.totalorder %s3445_s12, %s3439_s18 }
 0xa8f   : > { %v2494_v57 = vsel %vm2493_vm9, %v2492_v54, %v2491_v55  ;;  %v2495_v58 = vrot.slane %v2480_v6, 3  ;;  %v2481_v9 = vunpack.c.l.b16 %v2460_v31  ;;  %v2461_v59 = vpack.c.bf16 %v2453_v35, %v2453_v35 }
 0xa90   : > { %p3441_p13 = pnand %p3440_p12, %p4439_p1  ;;  %p3448_p4 = por %p3447_p3, %p3446_p2 }
 0xa91   : > { %v2498_v30 = vrot.slane %v2481_v9, 2  ;;  %v2482_v60 = vunpack.c.l.b16 %v2461_v59  ;;  %v2497_v26 = vsel %vm2496_vm10, %v2495_v58, %v2494_v57 }
 0xa92   : > { %p3442_p0 = pneg %p3441_p13 }
 0xa93   : > { %v2501_v8 = vrot.slane %v2482_v60, 1  ;;  %v2500_v51 = vsel %vm2499_vm11, %v2498_v30, %v2497_v26 }
 0xa94   : > { %p3449_p10 = pnand %p3448_p4, %p3442_p0 }
 0xa95   : > { %v2503_v40 = vsel %vm2502_vm12, %v2501_v8, %v2500_v51 }
 0xa96   : > { %v2504_v63 = vpack.c.b16 %v2503_v40, %v2503_v40 }
 0xa98   : > { %3024 = vmatmul.mubr.msk.bf16.vlgmr.msra.gmra.mrb[44].mxu1 %vm707_vm0, %v2504_v63 }
 0xb6b   : > { %v2554_v37 = vpop.f32.mrb[44].mxu1 }
 0xb6c   : > { %v2555_v4 = vadd.f32 %v2554_v37, %v2466_v62  ;;  %v3025_v1 = vpop.f32.mrb[45].mxu1 }
 0xb6d   : > { %v2557_v45 = vpop.f32.mrb[46].mxu1 }
 0xb6e   : > { %2560 = vst [vmem:[%s644_s16] sm:$0xff] %v2555_v4  ;;  %v3026_v5 = vpop.f32.mrb[47].mxu1 }
 0xb6f   : > { %3452 = shalt.err (!%p3449_p10)
}
 0xb70   : > { %s3453_s3 = scalar_lea.hbm %s4335_s15, 128  ;;  %s3457_s9 = scalar_lea.hbm %s4438_s17, 256 }
 0xb71   : > { %p3454_p11 = scmp.ne.s32.totalorder %s4335_s15, %s3453_s3  ;;  %p3458_p7 = scmp.lt.u32.totalorder %s4335_s15, %s4438_s17 }
 0xb72   : > { %p3459_p6 = scmp.lt.u32.totalorder %s3457_s9, %s3453_s3  ;;  %p3461_p12 = scmp.lt.u32.totalorder %s3453_s3, %s4335_s15 }
 0xb73   : > { %p3455_p8 = pnand %p3454_p11, %p4439_p1 }
 0xb74   : > { %p3460_p9 = por %p3459_p6, %p3458_p7 }
 0xb75   : > { %p3456_p5 = pneg %p3455_p8 }
 0xb76   : > { %p3462_p13 = por %p3461_p12, %p3460_p9 }
 0xb78   : > { %p3463_p0 = pnand %p3462_p13, %p3456_p5 }
 0xb7a   : > { %3466 = shalt.err (!%p3463_p0)
}
 0xb7b   : > { %3053 = dma.vmem_to_hbm [thread:$0]  (%p4439_p1), %s4337_s19, 128, %s4335_s15, %s2562_s27  }
 0xb7c PF: > { %s2587_s18 = sand.u32 1, %s3505_s21   ;;  %p4440_p2 = scmp.ne.s32.totalorder %s4422_s30, 0 }
 0xb7d   : > { %p4441_p3 = scmp.ge.s32.totalorder %s3517_s24, 2  ;;  %s2588_s12 = scalar_lea.sflag [#allocation4], %s2587_s18 }
 0xb7f   : > { %p3079_p4 = pnand %p4441_p3, %p4440_p2 }
 0xb81   : > { %3500 = dma.done.wait (!%p3079_p4), %s2588_s12, 128  }
 0xb82   : > { %3502 = vsyncadd (!%p3079_p4), %s2588_s12, 4294967168  ;;  %p32_p10 = scmp.ge.s32.totalorder %s3803_s0, 4   ;;  %s4442_s21 = smov %s3509_s22 }
 0xb83   : > { %s4443_s22 = smov %s3513_s23  ;;  %s4444_s23 = smov %s3814_s20 }
 0xb84   : > { %s4445_s24 = smov %s3803_s0  ;;  %34 = sbr.rel (!%p32_p10) target bundleno = 18 (0x12), region = 159 }
 0xb8b   :  { %2593 = vsyncpa [#allocation3], 1 }
 0xb8c   :  { %2595 = vsyncpa [#allocation3 + $0x1], 1 }
 0xb8d   :  { %2596 = vsyncpa [#allocation6], 1 }
 0xb8e   :  { %2597 = vsyncpa [#allocation9], 1 }
 0xb8f   :  { %2598 = vsyncpa [#allocation12], 1 }
 0xb90   :  { %2599 = vsyncpa [#allocation4], 1 }
 0xb91   :  { %2601 = vsyncpa [#allocation4 + $0x1], 1 }

// kernel: tpu_custom_call.1
= control target key start
LH: loop header
LB: loop body
LE: loop exit
PB: predicated region body
PF: predicated region fallthrough
CT: control target
= control target key end

     0   :  { %s4379_s0 = inlined_call_operand.vmem [shape: bf16[16,8,32], index: 0, kind: input, shape index: {}]   ;;  %s4380_s1 = inlined_call_operand.vmem [shape: f32[16,8], index: 1, kind: input, shape index: {}]   ;;  %s4381_s2 = inlined_call_operand.hbm [shape: f32[16,128], index: 2, kind: input, shape index: {}]   ;;  %s4382_s3 = inlined_call_operand.hbm [shape: bf16[32,96], index: 3, kind: input, shape index: {}]   ;;  %s4383_s4 = inlined_call_operand.vmem [shape: f32[1,96], index: 4, kind: input, shape index: {}]   ;;  %s4384_s5 = inlined_call_operand.hbm [shape: bf16[32,32], index: 5, kind: input, shape index: {}]   ;;  %s4385_s6 = inlined_call_operand.hbm [shape: f32[1,32], index: 6, kind: input, shape index: {}]   ;;  %s4386_s7 = inlined_call_operand.hbm [shape: f32[1,32], index: 7, kind: input, shape index: {}]   ;;  %s4387_s8 = inlined_call_operand.hbm [shape: f32[1,32], index: 8, kind: input, shape index: {}]   ;;  %s4388_s9 = inlined_call_operand.vmem [shape: bf16[32,64], index: 9, kind: input, shape index: {}]   ;;  %s4389_s10 = inlined_call_operand.hbm [shape: f32[1,64], index: 10, kind: input, shape index: {}]   ;;  %s4390_s11 = inlined_call_operand.vmem [shape: bf16[64,32], index: 11, kind: input, shape index: {}]   ;;  %s4391_s12 = inlined_call_operand.vmem [shape: f32[1,32], index: 12, kind: input, shape index: {}]   ;;  %s4392_s13 = inlined_call_operand.vmem [shape: f32[1,32], index: 13, kind: input, shape index: {}]   ;;  %s4393_s14 = inlined_call_operand.vmem [shape: f32[1,32], index: 14, kind: input, shape index: {}]   ;;  %s4394_s15 = inlined_call_operand.vmem [shape: bf16[32,128], index: 15, kind: input, shape index: {}]   ;;  %s4395_s16 = inlined_call_operand.hbm [shape: f32[16,128], index: 16, kind: output, shape index: {}]  }
   0x1   :  { %4404 = sst [smem:[#allocation20_spill]] %s4379_s0 }
   0x2   :  { %4405 = sst [smem:[#allocation21_spill]] %s4382_s3 }
   0x3   :  { %4406 = sst [smem:[#allocation22_spill]] %s4388_s9 }
   0x4   :  { %4407 = sst [smem:[#allocation23_spill]] %s4390_s11 }
   0x5   :  { %4408 = sst [smem:[#allocation24_spill]] %s4391_s12 }
   0x6   :  { %4409 = sst [smem:[#allocation25_spill]] %s4392_s13 }
   0x7   :  { %4410 = sst [smem:[#allocation26_spill]] %s4393_s14 }
   0x8   :  { %4411 = sst [smem:[#allocation27_spill]] %s4394_s15 }
   0x9   :  { %4412 = sst [smem:[#allocation28_spill]] %s4395_s16 }
   0xa   :  { %21 = vsyncpa [#allocation3], 0 }
   0xb   :  { %23 = vsyncpa [#allocation3 + $0x1], 0 }
   0xc   :  { %24 = vsyncpa [#allocation6], 0 }
   0xd   :  { %25 = vsyncpa [#allocation9], 0 }
   0xe   :  { %26 = vsyncpa [#allocation12], 0 }
   0xf   :  { %27 = vsyncpa [#allocation4], 0 }
  0x10   :  { %29 = vsyncpa [#allocation4 + $0x1], 0  ;;  %s3619_s21 = smov 0   ;;  %s3621_s22 = smov 0  }
  0x11   :  { %s3623_s23 = smov 0   ;;  %s3625_s24 = smov 0  }
  0x12 LB: > { %s3519_s25 = smov [#allocation5]   ;;  %s3640_s27 = sadd.s32 4294967295, %s3517_s24   ;;  %s3517_s24 = sphi %s3625_s24, %s4445_s24   ;;  %s3513_s23 = sphi %s3623_s23, %s4444_s23   ;;  %s3509_s22 = sphi %s3621_s22, %s4443_s22   ;;  %s3505_s21 = sphi %s3619_s21, %s4442_s21  }
  0x13   : > { %s429_s26 = sshll.u32 %s3519_s25, 4  ;;  %p2727_p0 = scmp.ge.s32.totalorder %s3517_s24, 1  ;;  %s3645_s26 = int_to_ptr.vmem [resolvable:$true] %s429_s26 }
  0x14   : > { %p4401_p1 = scmp.eq.s32.totalorder %s3640_s27, 0  ;;  %p417_p2 = scmp.lt.s32.totalorder %s3517_s24, 3 }
  0x15   : > { %s3520_s29 = smov [#allocation8]   ;;  %s3521_s17 = smov [#allocation11]  }
  0x16   : > { %p3647_p3 = pnand %p2727_p0, %p417_p2  ;;  %s459_s30 = sshll.u32 %s3520_s29, 4  ;;  %s3660_s30 = int_to_ptr.vmem [resolvable:$true] %s459_s30 }
  0x17   : > { %s481_s18 = sshll.u32 %s3521_s17, 4  ;;  %s4415_s3 = sld [smem:[#allocation21_spill]]  ;;  %s3662_s18 = int_to_ptr.vmem [resolvable:$true] %s481_s18 }
  0x18   : > { %s4413_s28 = scalar_select %p3647_p3, 1, 0 }
  0x19   : > { %p3055_p5 = pneg %p3647_p3 }
  0x1b   : > { %p3656_p6 = pnand %p3055_p5, %p4401_p1 }
  0x1d   : > { %s3241_s25 = scalar_lea.hbm %s4415_s3, 256  ;;  %p3672_p8 = pneg %p3656_p6 }
  0x1e   : > { %p3242_p7 = scmp.ne.s32.totalorder %s4415_s3, %s3241_s25  ;;  %p3248_p11 = scmp.lt.u32.totalorder %s3241_s25, %s4415_s3 }
  0x20   : > { %p3244_p9 = pnand %p3672_p8, %p3242_p7 }
  0x22   : > { %p3245_p10 = pneg %p3244_p9 }
  0x24   : > { %p3250_p12 = pnand %p3248_p11, %p3245_p10 }
  0x26   : > { %3253 = shalt.err (!%p3250_p12)
}
  0x27   : > { %s3254_s14 = scalar_lea.vmem %s3645_s26, 256  ;;  %p3262_p5 = scmp.lt.s32.totalorder %s3645_s26, %s3645_s26 }
  0x28   : > { %p3255_p13 = scmp.ne.s32.totalorder %s3645_s26, %s3254_s14  ;;  %p3263_p4 = scmp.lt.s32.totalorder %s3254_s14, %s3254_s14 }
  0x2a   : > { %p3257_p0 = pnand %p3255_p13, %p3672_p8  ;;  %p3264_p7 = por %p3263_p4, %p3262_p5 }
  0x2c   : > { %p3258_p2 = pneg %p3257_p0 }
  0x2e   : > { %p3265_p9 = pnand %p3264_p7, %p3258_p2 }
  0x30   : > { %3268 = shalt.err (!%p3265_p9)
}
  0x31   : > { %s4400_s16 = smov 64   ;;  %s3523_s13 = smov 4  }
  0x32   : > { %3058 = dma.hbm_to_vmem [thread:$0]  (!%p3656_p6), %s4415_s3, 256, %s3645_s26, [#allocation6], %s4400_s16, %s4400_s16, %s3523_s13  }
  0x33   : > { %s3269_s14 = scalar_lea.hbm %s4385_s6, 16 }
  0x34   : > { %p3270_p4 = scmp.ne.s32.totalorder %s4385_s6, %s3269_s14  ;;  %p3276_p12 = scmp.lt.u32.totalorder %s3269_s14, %s4385_s6 }
  0x36   : > { %p3272_p10 = pnand %p3270_p4, %p3672_p8 }
  0x38   : > { %p3273_p11 = pneg %p3272_p10 }
  0x3a   : > { %p3278_p13 = pnand %p3276_p12, %p3273_p11 }
  0x3c   : > { %3281 = shalt.err (!%p3278_p13)
}
  0x3d   : > { %s3282_s26 = scalar_lea.vmem %s3660_s30, 16  ;;  %s3289_s12 = scalar_lea.vmem %s3660_s30, 32 }
  0x3e   : > { %p3283_p0 = scmp.ne.s32.totalorder %s3660_s30, %s3282_s26  ;;  %p3290_p7 = scmp.lt.s32.totalorder %s3660_s30, %s3660_s30 }
  0x3f   : > { %p3291_p9 = scmp.lt.s32.totalorder %s3289_s12, %s3282_s26 }
  0x40   : > { %p3285_p2 = pnand %p3283_p0, %p3672_p8 }
  0x41   : > { %p3292_p4 = por %p3291_p9, %p3290_p7 }
  0x42   : > { %p3286_p5 = pneg %p3285_p2 }
  0x44   : > { %p3293_p10 = pnand %p3292_p4, %p3286_p5 }
  0x46   : > { %3296 = shalt.err (!%p3293_p10)
}
  0x47   : > { %3064 = dma.hbm_to_vmem [thread:$0]  (!%p3656_p6), %s4385_s6, 16, %s3660_s30, [#allocation9]  }
  0x48   : > { %s3297_s20 = scalar_lea.hbm %s4387_s8, 16 }
  0x49   : > { %p3298_p11 = scmp.ne.s32.totalorder %s4387_s8, %s3297_s20  ;;  %p3304_p0 = scmp.lt.u32.totalorder %s3297_s20, %s4387_s8 }
  0x4b   : > { %p3300_p12 = pnand %p3298_p11, %p3672_p8 }
  0x4d   : > { %p3301_p13 = pneg %p3300_p12 }
  0x4f   : > { %p3306_p2 = pnand %p3304_p0, %p3301_p13 }
  0x51   : > { %3309 = shalt.err (!%p3306_p2)
}
  0x52   : > { %s3310_s30 = scalar_lea.vmem %s3662_s18, 16  ;;  %s3317_s12 = scalar_lea.vmem %s3662_s18, 32 }
  0x53   : > { %p3311_p5 = scmp.ne.s32.totalorder %s3662_s18, %s3310_s30  ;;  %p3318_p4 = scmp.lt.s32.totalorder %s3662_s18, %s3662_s18 }
  0x54   : > { %p3319_p10 = scmp.lt.s32.totalorder %s3317_s12, %s3310_s30 }
  0x55   : > { %p3313_p7 = pnand %p3311_p5, %p3672_p8 }
  0x56   : > { %p3320_p11 = por %p3319_p10, %p3318_p4 }
  0x57   : > { %p3314_p9 = pneg %p3313_p7 }
  0x59   : > { %p3321_p12 = pnand %p3320_p11, %p3314_p9 }
  0x5b   : > { %3324 = shalt.err (!%p3321_p12)
}
  0x5c   : > { %3070 = dma.hbm_to_vmem [thread:$0]  (!%p3656_p6), %s4387_s8, 16, %s3662_s18, [#allocation12]  }
  0x5d   : > { %s3524_s15 = smov [#allocation7]   ;;  %s3525_s20 = smov [#allocation10]  }
  0x5e   : > { %s445_s19 = sshll.u32 %s3524_s15, 4  ;;  %s470_s25 = sshll.u32 %s3525_s20, 4  ;;  %s446_s19 = int_to_ptr.vmem [resolvable:$true] %s445_s19  ;;  %s471_s25 = int_to_ptr.vmem [resolvable:$true] %s470_s25 }
  0x5f   : > { %s3325_s26 = scalar_lea.hbm %s4384_s5, 256 }
  0x60   : > { %p3326_p13 = scmp.ne.s32.totalorder %s4384_s5, %s3325_s26  ;;  %p3332_p5 = scmp.lt.u32.totalorder %s3325_s26, %s4384_s5 }
  0x62   : > { %p3328_p0 = pnand %p3326_p13, %p3672_p8 }
  0x64   : > { %p3329_p2 = pneg %p3328_p0 }
  0x66   : > { %p3334_p7 = pnand %p3332_p5, %p3329_p2 }
  0x68   : > { %3337 = shalt.err (!%p3334_p7)
}
  0x69   : > { %s3338_s18 = scalar_lea.vmem %s446_s19, 256  ;;  %p3346_p11 = scmp.lt.s32.totalorder %s446_s19, %s446_s19 }
  0x6a   : > { %p3339_p9 = scmp.ne.s32.totalorder %s446_s19, %s3338_s18  ;;  %p3347_p12 = scmp.lt.s32.totalorder %s3338_s18, %s3338_s18 }
  0x6c   : > { %p3341_p4 = pnand %p3339_p9, %p3672_p8  ;;  %p3348_p1 = por %p3347_p12, %p3346_p11 }
  0x6e   : > { %p3342_p10 = pneg %p3341_p4 }
  0x70   : > { %p3349_p3 = pnand %p3348_p1, %p3342_p10 }
  0x72   : > { %3352 = shalt.err (!%p3349_p3)
}
  0x73   : > { %s4417_s11 = smov 64   ;;  %s3353_s14 = scalar_lea.hbm %s4386_s7, 16 }
  0x74   : > { %3061 = dma.hbm_to_vmem [thread:$0]  (!%p3656_p6), %s4384_s5, 256, %s446_s19, [#allocation6], %s4417_s11, %s4417_s11, %s3523_s13  }
  0x75   : > { %p3354_p1 = scmp.ne.s32.totalorder %s4386_s7, %s3353_s14  ;;  %p3360_p0 = scmp.lt.u32.totalorder %s3353_s14, %s4386_s7 }
  0x77   : > { %p3356_p3 = pnand %p3354_p1, %p3672_p8 }
  0x79   : > { %p3357_p13 = pneg %p3356_p3 }
  0x7b   : > { %p3362_p2 = pnand %p3360_p0, %p3357_p13 }
  0x7d   : > { %3365 = shalt.err (!%p3362_p2)
}
  0x7e   : > { %s3366_s18 = scalar_lea.vmem %s471_s25, 16  ;;  %s3373_s13 = scalar_lea.vmem %s471_s25, 32 }
  0x7f   : > { %p3367_p5 = scmp.ne.s32.totalorder %s471_s25, %s3366_s18  ;;  %p3374_p4 = scmp.lt.s32.totalorder %s471_s25, %s471_s25 }
  0x80   : > { %p3375_p10 = scmp.lt.s32.totalorder %s3373_s13, %s3366_s18 }
  0x81   : > { %p3369_p7 = pnand %p3367_p5, %p3672_p8 }
  0x82   : > { %p3376_p11 = por %p3375_p10, %p3374_p4 }
  0x83   : > { %p3370_p9 = pneg %p3369_p7 }
  0x85   : > { %p3377_p12 = pnand %p3376_p11, %p3370_p9 }
  0x87   : > { %3380 = shalt.err (!%p3377_p12)
}
  0x88   : > { %3067 = dma.hbm_to_vmem [thread:$0]  (!%p3656_p6), %s4386_s7, 16, %s471_s25, [#allocation9]  }
  0x89   : > { %s3526_s16 = smov [#allocation13]   ;;  %s3381_s14 = scalar_lea.hbm %s4389_s10, 16 }
  0x8a   : > { %s495_s15 = sshll.u32 %s3526_s16, 4  ;;  %p3382_p1 = scmp.ne.s32.totalorder %s4389_s10, %s3381_s14  ;;  %s496_s15 = int_to_ptr.vmem [resolvable:$true] %s495_s15 }
  0x8b   : > { %p3388_p0 = scmp.lt.u32.totalorder %s3381_s14, %s4389_s10 }
  0x8c   : > { %p3384_p3 = pnand %p3382_p1, %p3672_p8 }
  0x8e   : > { %p3385_p13 = pneg %p3384_p3 }
  0x90   : > { %p3390_p2 = pnand %p3388_p0, %p3385_p13 }
  0x92   : > { %3393 = shalt.err (!%p3390_p2)
}
  0x93   : > { %s3394_s25 = scalar_lea.vmem %s496_s15, 16  ;;  %s3401_s18 = scalar_lea.vmem %s496_s15, 32 }
  0x94   : > { %p3395_p5 = scmp.ne.s32.totalorder %s496_s15, %s3394_s25  ;;  %p3402_p4 = scmp.lt.s32.totalorder %s496_s15, %s496_s15 }
  0x95   : > { %p3403_p10 = scmp.lt.s32.totalorder %s3401_s18, %s3394_s25 }
  0x96   : > { %p3397_p7 = pnand %p3395_p5, %p3672_p8 }
  0x97   : > { %p3404_p11 = por %p3403_p10, %p3402_p4 }
  0x98   : > { %p3398_p9 = pneg %p3397_p7 }
  0x9a   : > { %p3405_p12 = pnand %p3404_p11, %p3398_p9 }
  0x9c   : > { %3408 = shalt.err (!%p3405_p12)
}
  0x9d   : > { %3073 = dma.hbm_to_vmem [thread:$0]  (!%p3656_p6), %s4389_s10, 16, %s496_s15, [#allocation12]  }
  0x9e   : > { %s2726_s29 = sadd.s32 4294967294, %s3517_s24   ;;  %s3803_s0 = sadd.s32 1, %s3517_s24  }
  0x9f   : > { %s91_s11 = ssub.s32 %s3517_s24, %s3803_s0  ;;  %s94_s16 = sadd.s32 1, %s3513_s23 }
  0xa0   : > { %p92_p8 = scmp.eq.s32.totalorder %s91_s11, 0  ;;  %p101_p1 = scmp.ne.s32.totalorder %s3513_s23, %s3509_s22 }
  0xa1   : > { %p102_p3 = scmp.eq.s32.totalorder %s3517_s24, 0  ;;  %p107_p13 = scmp.ne.s32.totalorder %s3509_s22, %s3505_s21 }
  0xa2   : > { %s3814_s20 = scalar_select %p92_p8, %s3513_s23, %s94_s16  }
  0xa3   : > { %p3816_p0 = por %p102_p3, %p101_p1  ;;  %p4419_p2 = scmp.eq.s32.totalorder %s3640_s27, 0 }
  0xa4   : > { %p404_p5 = scmp.eq.s32.totalorder %s3640_s27, 1  ;;  %p410_p7 = scmp.eq.s32.totalorder %s2726_s29, 1 }
  0xa5   : > { %p3822_p6 = por %p4419_p2, %p107_p13  ;;  %p3088_p9 = scmp.lt.s32.totalorder %s3517_s24, 2 }
  0xa6   : > { %s537_s14 = sand.u32 1, %s3513_s23   ;;  %p3829_p4 = por %p404_p5, %p101_p1 }
  0xa7   : > { %p3833_p10 = por %p410_p7, %p107_p13  ;;  %s2735_s12 = sshll.u32 %s537_s14, 3 }
  0xa8   : > { %s4421_s26 = scalar_select %p3829_p4, 1, 0 }
  0xa9   : > { %s4422_s30 = scalar_select %p3833_p10, 1, 0 }
  0xaa   : > { %s2736_s9 = sshll.u32 %s3517_s24, 7  ;;  %s541_s19 = scalar_lea.vmem [#allocation2], %s2735_s12 }
  0xab   : > { %s3841_s13 = scalar_lea.hbm %s4381_s2, %s2736_s9  ;;  %s548_s29 = sshll.u32 %s541_s19, 4  ;;  %s3843_s29 = int_to_ptr.vmem [resolvable:$true] %s548_s29 }
  0xac   : > { %p3847_p11 = pnand %p3088_p9, %p3816_p0  ;;  %s538_s16 = scalar_lea.sflag [#allocation3], %s537_s14 }
  0xad   : > { %s3409_s3 = scalar_lea.hbm %s3841_s13, 128  ;;  %s3414_s25 = scalar_lea.hbm %s4381_s2, 256 }
  0xae   : > { %p3410_p12 = scmp.ne.s32.totalorder %s3841_s13, %s3409_s3  ;;  %p3411_p8 = pneg %p3847_p11 }
  0xaf   : > { %p3415_p13 = scmp.lt.u32.totalorder %s3841_s13, %s4381_s2  ;;  %p3416_p0 = scmp.lt.u32.totalorder %s3414_s25, %s3409_s3 }
  0xb0   : > { %p3412_p1 = pnand %p3411_p8, %p3410_p12  ;;  %p3418_p5 = scmp.lt.u32.totalorder %s3409_s3, %s3841_s13 }
  0xb1   : > { %p3417_p2 = por %p3416_p0, %p3415_p13 }
  0xb2   : > { %p3413_p3 = pneg %p3412_p1 }
  0xb3   : > { %p3419_p7 = por %p3418_p5, %p3417_p2 }
  0xb5   : > { %p3420_p9 = pnand %p3419_p7, %p3413_p3 }
  0xb7   : > { %3423 = shalt.err (!%p3420_p9)
}
  0xb8   : > { %s3424_s14 = scalar_lea.vmem %s3843_s29, 128  ;;  %s3527_s19 = smov [#allocation2]  }
  0xb9   : > { %p3425_p12 = scmp.ne.s32.totalorder %s3843_s29, %s3424_s14  ;;  %s3429_s12 = sshll.u32 %s3527_s19, 4  ;;  %s3430_s12 = int_to_ptr.vmem [resolvable:$false] %s3429_s12 }
  0xba   : > { %s3431_s9 = scalar_lea.vmem %s3430_s12, 256  ;;  %p3432_p4 = scmp.lt.s32.totalorder %s3843_s29, %s3430_s12 }
  0xbb   : > { %p3427_p1 = pnand %p3425_p12, %p3411_p8  ;;  %p3433_p13 = scmp.lt.s32.totalorder %s3431_s9, %s3424_s14 }
  0xbd   : > { %p3428_p10 = pneg %p3427_p1  ;;  %p3434_p0 = por %p3433_p13, %p3432_p4 }
  0xbf   : > { %p3435_p2 = pnand %p3434_p0, %p3428_p10 }
  0xc1   : > { %3438 = shalt.err (!%p3435_p2)
}
  0xc2   : > { %3077 = dma.hbm_to_vmem [thread:$0]  (!%p3847_p11), %s3841_s13, 128, %s3843_s29, %s538_s16  }
  0xc3   : > { %p4424_p3 = scmp.ne.s32.totalorder %s4413_s28, 0 }
  0xc4   : > { %s3879_s3 = sand.u32 (!%p4424_p3), 1, %s3509_s22  }
  0xc5   : > { %557 = sbr.rel (%p4424_p3) target bundleno = 2940 (0xb7c), region = 84  ;;  %s2738_s25 = sshll.u32 (!%p4424_p3), %s3879_s3, 3 }
  0xc6   : > { %s560_s17 = scalar_lea.sflag (!%p4424_p3), [#allocation3], %s3879_s3  ;;  %s3885_s18 = scalar_lea.vmem (!%p4424_p3), [#allocation2], %s2738_s25 }
  0xcc   : > { %3484 = dma.done.wait (%p3822_p6), %s560_s17, 128  }
  0xcd   : > { %3486 = vsyncadd (%p3822_p6), %s560_s17, 4294967168  ;;  %p4425_p4 = scmp.eq.s32.totalorder %s3640_s27, 0 }
  0xcf   : > { %3488 = dma.done.wait (%p4425_p4), [#allocation6], 512   ;;  %p4426_p10 = pmov %p4425_p4 }
  0xd0   : > { %p4427_p11 = pmov %p4425_p4 }
  0xd1   : > { %3490 = vsyncadd (%p4426_p10), [#allocation6], 4294966784 }
  0xd2   : > { %3492 = dma.done.wait (%p4427_p11), [#allocation9], 32   ;;  %p4428_p8 = pmov %p4425_p4 }
  0xd3   : > { %p4429_p5 = pmov %p4425_p4 }
  0xd4   : > { %3494 = vsyncadd (%p4428_p8), [#allocation9], 4294967264 }
  0xd5   : > { %3496 = dma.done.wait (%p4429_p5), [#allocation12], 32   ;;  %p4430_p7 = pmov %p4425_p4 }
  0xd6   : > { %s2746_s28 = sshll.u32 %s3640_s27, 3  ;;  %s4431_s11 = sld [smem:[#allocation20_spill]]  ;;  %v3141_v0 = vld [vmem:[#allocation5] sm:$0xff]   ;;  %v3142_v1 = vld [vmem:[#allocation5 + $0x8] sm:$0xff]   ;;  %vm707_vm0 = vcmask 261120   ;;  %v3528_v6 = vmov 0.0   ;;  %v801_v52 = vlaneseq }
  0xd7   : > { %3498 = vsyncadd (%p4430_p7), [#allocation12], 4294967264  ;;  %p646_p6 = scmp.lt.s32.totalorder %s2746_s28, 15  ;;  %2871 = vmatprep.subr.bf16.mxu0 %v3141_v0  ;;  %2883 = vmatprep.subr.bf16.mxu1 %v3528_v6  ;;  %v2749_v7 = vld [vmem:[%s4383_s4] ss:$0 sm:$0xff]  ;;  %vm3529_vm1 = vmmov 0  }
  0xd8   : > { %2872 = vmatpush3.bf16.msra.mxu0 %v3141_v0  ;;  %2885 = vmatprep.mubr.msk.bf16.mxu1 %vm3529_vm1, %v3528_v6  ;;  %s3530_s12 = smov 96   ;;  %s3531_s9 = smov 64   ;;  %vm1380_vm2 = vcmask 1043456   ;;  %v3532_v50 = vmov 1966171168   ;;  %v802_v55 = vshrl.u32 %v801_v52, 7 }
  0xd9   : > { %s4447_s28 = smov (!%p646_p6, %s2746_s28), 15  ;;  %2873 = vmatprep.subr.bf16.mxu0 %v3142_v1  ;;  %p651_p9 = scmp.lt.s32.totalorder %s3640_s27, 1  ;;  %v799_v51 = vunpack.c.l.s4 %v3532_v50  ;;  %vm1278_vm4 = vcmask 64512   ;;  %vm2234_vm5 = vcmask 523264   ;;  %vm2484_vm6 = vcmask 1041409  }
  0xda   : > { %s2747_s15 = sshll.u32 %s4447_s28, 2  ;;  %v4009_v61 = vsub.s32 0, %v802_v55  ;;  %s4432_s14 = sld [smem:[#allocation22_spill]]  ;;  %vm2487_vm7 = vcmask 1042434   ;;  %vm2490_vm8 = vcmask 1043459   ;;  %vm2493_vm9 = vcmask 1044484  }
  0xdb   : > { %s652_s17 = scalar_select %p651_p9, %s3640_s27, 1  ;;  %v800_v54 = vunpack.c.0.s8 %v799_v51  ;;  %vm2496_vm10 = vcmask 1045509   ;;  %vm2499_vm11 = vcmask 1046534   ;;  %vm2502_vm12 = vcmask 1047559  }
  0xdc   : > { %s649_s16 = scalar_lea.vmem %s4431_s11, %s2747_s15  ;;  %2874 = vmatpush3.bf16.msra.mxu0 %v3142_v1  ;;  %s4437_s13 = sld [smem:[#allocation26_spill]] }
  0xdd   : > { %v3907_v2 = vld [vmem:[%s649_s16] sm:$0xff]   ;;  %v3909_v3 = vld [vmem:[%s649_s16 + $0x8] sm:$0xff]   ;;  %v3911_v4 = vld [vmem:[%s649_s16 + $0x10] sm:$0xff]   ;;  %2895 = vmatprep.subr.bf16.mxu0 %v3528_v6  ;;  %s2748_s28 = sshll.u32 %s652_s17, 3  ;;  %v803_v56 = vsub.s32 %v800_v54, %v802_v55  ;;  %s4434_s17 = sld [smem:[#allocation24_spill]] }
  0xde   : > { %2875 = vmatprep.mubr.msk.bf16.mxu0 %vm707_vm0, %v3907_v2  ;;  %v3919_v5 = vld [vmem:[%s649_s16 + $0x18] sm:$0xff]   ;;  %s654_s29 = scalar_lea.vmem %s4380_s1, %s2748_s28  ;;  %s4433_s28 = sld [smem:[#allocation23_spill]] }
  0xdf   : > { %2876 = vmatmul.mubr.msk.bf16.vlgmr.msra.gmra.mrb[0].mxu0 %vm707_vm0, %v3909_v3  ;;  %v793_v53 = vld [vmem:[%s654_s29] sm:$0xff]  ;;  %s4435_s29 = sld [smem:[#allocation27_spill]]  ;;  %s2807_s11 = sshll.u32 %s3640_s27, 7 }
  0xe0   : > { %2879 = vmatprep.mubr.msk.bf16.mxu0 %vm707_vm0, %v3911_v4  ;;  %vm794_vm3 = vcmp.eq.f32.partialorder %v793_v53, 0.0  ;;  %s644_s16 = scalar_lea.vmem [#allocation14], %s2738_s25  ;;  %s2562_s27 = scalar_lea.sflag [#allocation4], %s3879_s3 }
  0xe1   : > { %v795_v57 = vsel %vm794_vm3, -1e+09, %v3528_v6  ;;  %s2575_s19 = sshll.u32 %s644_s16, 4  ;;  %p4439_p1 = scmp.ne.s32.totalorder %s4421_s26, 0  ;;  %s4337_s19 = int_to_ptr.vmem [resolvable:$true] %s2575_s19 }
  0xe2   : > { %v804_v58 = vrot.slane %v795_v57, %v803_v56  ;;  %v797_v62 = vcombine.high %v795_v57, %v795_v57  ;;  %s3533_s25 = smov [#allocation14]  }
  0xe4   : > { %v820_v59 = vrot.slane %v804_v58, %v803_v56  ;;  %v812_v0 = vcombine.high %v804_v58, %v804_v58 }
  0xe6   : > { %v842_v60 = vcombine.high %v820_v59, %v820_v59  ;;  %v849_v1 = vrot.slane %v820_v59, %v4009_v61 }
  0xe7   : > { %2880 = vmatmul.mubr.msk.bf16.gmra.mrb[4].mxu0 %vm707_vm0, %v3919_v5 }
  0xe8   : > { %2897 = vmatprep.mubr.msk.bf16.mxu0 %vm3529_vm1, %v3528_v6  ;;  %v857_v63 = vrot.slane %v842_v60, %v4009_v61 }
 0x1b2   : > { %v2877_v8 = vpop.f32.mrb[0].mxu0 }
 0x1b3   : > { %v763_v9 = vadd.f32 %v2877_v8, %v2749_v7  ;;  %v754_v10 = vpop.f32.mrb[1].mxu0  ;;  %v811_v8 = vrot.slane %v797_v62, %v803_v56 }
 0x1b4   : > { %v755_v11 = vadd.f32 %v2749_v7, %v754_v10  ;;  %v2878_v12 = vpop.f32.mrb[2].mxu0 }
 0x1b5   : > { %v3932_v13 = vpack.c.bf16 %v763_v9, %v763_v9  ;;  %v766_v14 = vadd.f32 %v2878_v12, %v2749_v7  ;;  %v757_v15 = vpop.f32.mrb[3].mxu0 }
 0x1b6   : > { %v785_v16 = vpack.c.bf16 %v755_v11, %v755_v11  ;;  %v758_v17 = vadd.f32 %v2749_v7, %v757_v15  ;;  %v834_v15 = vrot.slane %v812_v0, %v803_v56 }
 0x1b7   : > { %985 = vrot.lane.b32.xlu1 %v3932_v13, %s3530_s12  ;;  %v3935_v18 = vpack.c.bf16 %v766_v14, %v766_v14 }
 0x1b8   : > { %887 = vrot.lane.b32.xlu0 %v785_v16, %s3530_s12  ;;  %v3937_v19 = vpack.c.bf16 %v758_v17, %v758_v17 }
 0x1ba   : > { %v2881_v20 = vpop.f32.mrb[4].mxu0 }
 0x1bb   : > { %1034 = vrot.lane.b32.xlu1 %v3935_v18, %s3530_s12  ;;  %v770_v21 = vpop.f32.mrb[5].mxu0  ;;  %v779_v22 = vadd.f32 %v2881_v20, %v2749_v7 }
 0x1bc   : > { %v771_v23 = vadd.f32 %v2749_v7, %v770_v21  ;;  %v2882_v24 = vpop.f32.mrb[6].mxu0  ;;  %936 = vrot.lane.b32.xlu0 %v3937_v19, %s3530_s12 }
 0x1bd   : > { %v773_v25 = vpop.f32.mrb[7].mxu0  ;;  %v782_v27 = vadd.f32 %v2882_v24, %v2749_v7  ;;  %v3943_v29 = vpack.c.bf16 %v779_v22, %v779_v22  ;;  %v853_v24 = vrot.slane %v834_v15, %v4009_v61 }
 0x1be   : > { %v3941_v26 = vpack.c.bf16 %v771_v23, %v771_v23  ;;  %v774_v28 = vadd.f32 %v2749_v7, %v773_v25  ;;  %v827_v23 = vrot.slane %v811_v8, %v803_v56 }
 0x1bf   : > { %v3948_v31 = vpack.c.bf16 %v782_v27, %v782_v27 }
 0x1c0   : > { %v3945_v30 = vpack.c.bf16 %v774_v28, %v774_v28  ;;  %1083 = vrot.lane.b32.xlu0 %v3941_v26, %s3530_s12  ;;  %v865_v27 = vrot.slane %v827_v23, %v4009_v61 }
 0x1c2   : > { %1132 = vrot.lane.b32.xlu1 %v3945_v30, %s3530_s12 }
 0x1c4   : > { %1181 = vrot.lane.b32.xlu0 %v3943_v29, %s3530_s12 }
 0x1c6   : > { %1230 = vrot.lane.b32.xlu1 %v3948_v31, %s3530_s12 }
 0x1ca   : > { %1375 = vrot.lane.b32.xlu1 %v785_v16, %s3531_s9 }
 0x229   : > { %v986_v32 = vpop.permute.xlu1 %985 }
 0x22a   : > { %v991_v33 = vsel %vm707_vm0, %v986_v32, 0  ;;  %v888_v34 = vpop.permute.xlu0 %887 }
 0x22b   : > { %2896 = vmatpush3.bf16.xpose.msra.mxu0 %v991_v33  ;;  %v893_v35 = vsel %vm707_vm0, %v888_v34, 0 }
 0x22c   : > { %2884 = vmatpush3.bf16.xpose.msra.mxu1 %v893_v35  ;;  %2907 = vmatprep.subr.bf16.mxu0 %v3528_v6 }
 0x22d   : > { %2889 = vmatprep.subr.bf16.mxu1 %v3528_v6  ;;  %v1035_v37 = vpop.permute.xlu1 %1034 }
 0x22e   : > { %v937_v36 = vpop.permute.xlu0 %936  ;;  %v1040_v45 = vsel %vm707_vm0, %v1035_v37, 0  ;;  %v843_v37 = vcombine.high %v827_v23, %v827_v23 }
 0x22f   : > { %v942_v39 = vsel %vm707_vm0, %v937_v36, 0  ;;  %v844_v36 = vcombine.high %v834_v15, %v834_v15 }
 0x232   : > { %2898 = vmatmul.mubr.msk.bf16.vlgmr.msra.gmra.mrb[8].mxu0 %vm707_vm0, %v3932_v13  ;;  %v1084_v38 = vpop.permute.xlu0 %1083 }
 0x233   : > { %v1089_v40 = vsel %vm707_vm0, %v1084_v38, 0  ;;  %2886 = vmatmul.mubr.msk.bf16.vlgmr.msra.gmra.mrb[0].mxu1 %vm707_vm0, %v785_v16  ;;  %2909 = vmatprep.mubr.msk.bf16.mxu0 %vm3529_vm1, %v3528_v6 }
 0x234   : > { %v1133_v41 = vpop.permute.xlu1 %1132  ;;  %2890 = vmatpush3.bf16.xpose.msra.mxu1 %v942_v39  ;;  %2908 = vmatpush3.bf16.xpose.msra.mxu0 %v1089_v40 }
 0x235   : > { %2891 = vmatprep.mubr.msk.bf16.mxu1 %vm3529_vm1, %v3528_v6  ;;  %2901 = vmatprep.subr.bf16.mxu1 %v3528_v6  ;;  %v1138_v47 = vsel %vm707_vm0, %v1133_v41, 0 }
 0x236   : > { %v1182_v42 = vpop.permute.xlu0 %1181  ;;  %2919 = vmatprep.subr.bf16.mxu0 %v3528_v6 }
 0x237   : > { %v1187_v43 = vsel %vm707_vm0, %v1182_v42, 0 }
 0x238   : > { %v1231_v44 = vpop.permute.xlu1 %1230 }
 0x239   : > { %v1236_v49 = vsel %vm707_vm0, %v1231_v44, 0  ;;  %v861_v44 = vrot.slane %v844_v36, %v4009_v61 }
 0x23b   : > { %2892 = vmatmul.mubr.msk.bf16.vlgmr.msra.gmra.mrb[4].mxu1 %vm707_vm0, %v3937_v19  ;;  %2910 = vmatmul.mubr.msk.bf16.vlgmr.msra.gmra.mrb[12].mxu0 %vm707_vm0, %v3941_v26 }
 0x23c   : > { %2902 = vmatpush3.bf16.xpose.msra.mxu1 %v1040_v45  ;;  %2920 = vmatpush3.bf16.xpose.msra.mxu0 %v1187_v43  ;;  %v1376_v46 = vpop.permute.xlu1 %1375  ;;  %v873_v45 = vrot.slane %v843_v37, %v4009_v61 }
 0x23d   : > { %2903 = vmatprep.mubr.msk.bf16.mxu1 %vm3529_vm1, %v3528_v6  ;;  %2921 = vmatprep.mubr.msk.bf16.mxu0 %vm3529_vm1, %v3528_v6  ;;  %v1382_v48 = vsel %vm1380_vm2, %v1376_v46, 0  ;;  %v813_v46 = vcombine.high %v811_v8, %v811_v8 }
 0x23e   : > { %2913 = vmatprep.subr.bf16.mxu1 %v3528_v6  ;;  %2931 = vmatprep.subr.bf16.mxu0 %v3528_v6 }
 0x23f   : > { %v841_v54 = vrot.slane %v813_v46, %v803_v56 }
 0x241   : > { %v845_v8 = vcombine.high %v841_v54, %v841_v54 }
 0x243   : > { %2904 = vmatmul.mubr.msk.bf16.vlgmr.msra.gmra.mrb[8].mxu1 %vm707_vm0, %v3935_v18  ;;  %2922 = vmatmul.mubr.msk.bf16.vlgmr.msra.gmra.mrb[16].mxu0 %vm707_vm0, %v3943_v29 }
 0x244   : > { %2914 = vmatpush3.bf16.xpose.msra.mxu1 %v1138_v47  ;;  %2932 = vmatpush3.bf16.msra.mxu0 %v1382_v48 }
 0x245   : > { %2915 = vmatprep.mubr.msk.bf16.mxu1 %vm3529_vm1, %v3528_v6  ;;  %2925 = vmatprep.subr.bf16.mxu1 %v3528_v6 }
 0x246   : > { %2933 = vmatprep.mubr.msk.bf16.mxu0 %vm3529_vm1, %v3528_v6  ;;  %2943 = vmatprep.subr.bf16.mxu0 %v3528_v6 }
 0x24b   : > { %2916 = vmatmul.mubr.msk.bf16.vlgmr.msra.gmra.mrb[12].mxu1 %vm707_vm0, %v3945_v30 }
 0x24c   : > { %2926 = vmatpush3.bf16.xpose.msra.mxu1 %v1236_v49  ;;  %2927 = vmatprep.mubr.msk.bf16.mxu1 %vm3529_vm1, %v3528_v6 }
 0x24d   : > { %2937 = vmatprep.subr.bf16.mxu1 %v3528_v6 }
 0x253   : > { %2928 = vmatmul.mubr.msk.bf16.vlgmr.msra.gmra.mrb[16].mxu1 %vm707_vm0, %v3948_v31 }
 0x254   : > { %2939 = vmatprep.mubr.msk.bf16.mxu1 %vm3529_vm1, %v3528_v6 }
 0x305   : > { %v1027_v7 = vpop.f32.mrb[8].mxu0 }
 0x306   : > { %v4013_v9 = vadd.f32 %v1027_v7, %v857_v63  ;;  %v929_v10 = vpop.f32.mrb[0].mxu1  ;;  %v2899_v11 = vpop.f32.mrb[9].mxu0  ;;  %v869_v63 = vrot.slane %v841_v54, %v4009_v61 }
 0x307   : > { %v2887_v12 = vpop.f32.mrb[1].mxu1  ;;  %v1030_v14 = vpop.f32.mrb[10].mxu0  ;;  %v4015_v16 = vadd.f32 %v929_v10, %v849_v1 }
 0x308   : > { %v932_v17 = vpop.f32.mrb[2].mxu1  ;;  %v2900_v20 = vpop.f32.mrb[11].mxu0  ;;  %v1285_v21 = vsel %vm1278_vm4, %v4013_v9, -inf  ;;  %v877_v12 = vrot.slane %v845_v8, %v4009_v61 }
 0x309   : > { %1286 = vmax.xlane.f32.xlu0 %v1285_v21  ;;  %v2888_v22 = vpop.f32.mrb[3].mxu1  ;;  %v1279_v25 = vsel %vm1278_vm4, %v4015_v16, -inf }
 0x30d   : > { %1280 = vmax.xlane.f32.xlu0 %v1279_v25 }
 0x30e   : > { %v978_v28 = vpop.f32.mrb[4].mxu1  ;;  %v1125_v32 = vpop.f32.mrb[12].mxu0 }
 0x30f   : > { %v979_v33 = vadd.f32 %v978_v28, %v853_v24  ;;  %v2893_v34 = vpop.f32.mrb[5].mxu1  ;;  %v2911_v35 = vpop.f32.mrb[13].mxu0  ;;  %v1126_v40 = vadd.f32 %v1125_v32, %v865_v27 }
 0x310   : > { %v981_v38 = vpop.f32.mrb[6].mxu1  ;;  %v1128_v39 = vpop.f32.mrb[14].mxu0 }
 0x311   : > { %v2894_v41 = vpop.f32.mrb[7].mxu1  ;;  %v2912_v42 = vpop.f32.mrb[15].mxu0  ;;  %v1282_v43 = vsel %vm1278_vm4, %v979_v33, -inf  ;;  %v1291_v47 = vsel %vm1278_vm4, %v1126_v40, -inf }
 0x312   : > { %1283 = vmax.xlane.f32.xlu1 %v1282_v43 }
 0x316   : > { %v1076_v48 = vpop.f32.mrb[8].mxu1  ;;  %1292 = vmax.xlane.f32.xlu1 %v1291_v47  ;;  %v1223_v49 = vpop.f32.mrb[16].mxu0 }
 0x317   : > { %v1077_v50 = vadd.f32 %v1076_v48, %v861_v44  ;;  %v4027_v51 = vadd.f32 %v1223_v49, %v873_v45  ;;  %v2905_v52 = vpop.f32.mrb[9].mxu1  ;;  %v2923_v53 = vpop.f32.mrb[17].mxu0 }
 0x318   : > { %v1079_v55 = vpop.f32.mrb[10].mxu1  ;;  %v1226_v57 = vpop.f32.mrb[18].mxu0 }
 0x319   : > { %v2906_v58 = vpop.f32.mrb[11].mxu1  ;;  %v2924_v59 = vpop.f32.mrb[19].mxu0  ;;  %v1288_v60 = vsel %vm1278_vm4, %v1077_v50, -inf  ;;  %v1297_v62 = vsel %vm1278_vm4, %v4027_v51, -inf }
 0x31a   : > { %1289 = vmax.xlane.f32.xlu0 %v1288_v60  ;;  %1298 = vmax.xlane.f32.xlu1 %v1297_v62 }
 0x31e   : > { %v1174_v0 = vpop.f32.mrb[12].mxu1 }
 0x31f   : > { %v4033_v1 = vadd.f32 %v1174_v0, %v869_v63  ;;  %v2917_v7 = vpop.f32.mrb[13].mxu1 }
 0x320   : > { %v1177_v10 = vpop.f32.mrb[14].mxu1 }
 0x321   : > { %v2918_v56 = vpop.f32.mrb[15].mxu1  ;;  %v1294_v11 = vsel %vm1278_vm4, %v4033_v1, -inf }
 0x322   : > { %1295 = vmax.xlane.f32.xlu0 %v1294_v11 }
 0x326   : > { %v1272_v14 = vpop.f32.mrb[16].mxu1 }
 0x327   : > { %v1273_v15 = vadd.f32 %v1272_v14, %v877_v12  ;;  %v2929_v17 = vpop.f32.mrb[17].mxu1 }
 0x328   : > { %v1275_v20 = vpop.f32.mrb[18].mxu1 }
 0x329   : > { %v2930_v21 = vpop.f32.mrb[19].mxu1  ;;  %v1300_v22 = vsel %vm1278_vm4, %v1273_v15, -inf }
 0x32a   : > { %1301 = vmax.xlane.f32.xlu0 %v1300_v22 }
 0x32b   : > { %1472 = vrot.lane.b32.xlu1 %v3932_v13, %s3531_s9 }
 0x32f   : > { %1520 = vrot.lane.b32.xlu1 %v3935_v18, %s3531_s9 }
 0x340   : > { %1424 = vrot.lane.b32.xlu0 %v3937_v19, %s3531_s9 }
 0x396   : > { %v1287_v23 = vpop.xlane.xlu0 %1286 }
 0x397   : > { %v1305_v61 = vsub.f32 %v4013_v9, %v1287_v23 }
 0x399   : > { %v1315_v24 = vmul.f32 1.442695, %v1305_v61 }
 0x39a   : > { %v1281_v25 = vpop.xlane.xlu0 %1280 }
 0x39b   : > { %3161 = vpow2.f32 %v1315_v24  ;;  %v1303_v27 = vsub.f32 %v4015_v16, %v1281_v25 }
 0x39d   : > { %v1311_v28 = vmul.f32 1.442695, %v1303_v27 }
 0x39f   : > { %3163 = vpow2.f32 %v1311_v28  ;;  %v1284_v32 = vpop.xlane.xlu1 %1283 }
 0x3a0   : > { %v1304_v34 = vsub.f32 %v979_v33, %v1284_v32 }
 0x3a2   : > { %v1313_v35 = vmul.f32 1.442695, %v1304_v34 }
 0x3a3   : > { %v1293_v13 = vpop.xlane.xlu1 %1292 }
 0x3a4   : > { %3165 = vpow2.f32 %v1313_v35  ;;  %v1307_v36 = vsub.f32 %v1126_v40, %v1293_v13 }
 0x3a5   : > { %v4047_v18 = vpop.eup %3161 }
 0x3a6   : > { %v1319_v37 = vmul.f32 1.442695, %v1307_v36  ;;  %v1333_v19 = vsel %vm1278_vm4, %v4047_v18, 0.0 }
 0x3a7   : > { %1334 = vadd.xlane.f32.xlu1 %v1333_v19  ;;  %v1290_v9 = vpop.xlane.xlu0 %1289 }
 0x3a8   : > { %3167 = vpow2.f32 %v1319_v37  ;;  %v1306_v38 = vsub.f32 %v1077_v50, %v1290_v9  ;;  %v1299_v50 = vpop.xlane.xlu1 %1298 }
 0x3a9   : > { %v3164_v39 = vpop.eup %3163  ;;  %v1309_v52 = vsub.f32 %v4027_v51, %v1299_v50 }
 0x3aa   : > { %v1317_v16 = vmul.f32 1.442695, %v1306_v38  ;;  %v1327_v41 = vsel %vm1278_vm4, %v3164_v39, 0.0 }
 0x3ab   : > { %1328 = vadd.xlane.f32.xlu1 %v1327_v41  ;;  %v1323_v53 = vmul.f32 1.442695, %v1309_v52 }
 0x3ac   : > { %3169 = vpow2.f32 %v1317_v16  ;;  %v1473_v63 = vpop.permute.xlu1 %1472 }
 0x3ad   : > { %3171 = vpow2.f32 %v1323_v53  ;;  %v1478_v17 = vsel %vm1380_vm2, %v1473_v63, 0 }
 0x3ae   : > { %v3166_v33 = vpop.eup %3165 }
 0x3af   : > { %v1330_v42 = vsel %vm1278_vm4, %v3166_v33, 0.0  ;;  %v1296_v43 = vpop.xlane.xlu0 %1295 }
 0x3b0   : > { %1331 = vadd.xlane.f32.xlu0 %v1330_v42  ;;  %v1308_v54 = vsub.f32 %v4033_v1, %v1296_v43  ;;  %v1521_v0 = vpop.permute.xlu1 %1520 }
 0x3b1   : > { %v1526_v22 = vsel %vm1380_vm2, %v1521_v0, 0 }
 0x3b2   : > { %v4053_v40 = vpop.eup %3167  ;;  %v1321_v55 = vmul.f32 1.442695, %v1308_v54 }
 0x3b3   : > { %v1339_v44 = vsel %vm1278_vm4, %v4053_v40, 0.0 }
 0x3b4   : > { %1340 = vadd.xlane.f32.xlu1 %v1339_v44  ;;  %3173 = vpow2.f32 %v1321_v55 }
 0x3b6   : > { %v4057_v45 = vpop.eup %3169 }
 0x3b7   : > { %v1302_v46 = vpop.xlane.xlu0 %1301  ;;  %v1336_v47 = vsel %vm1278_vm4, %v4057_v45, 0.0  ;;  %v4069_v59 = vpop.eup %3171 }
 0x3b8   : > { %1337 = vadd.xlane.f32.xlu0 %v1336_v47  ;;  %v1310_v57 = vsub.f32 %v1273_v15, %v1302_v46 }
 0x3ba   : > { %v1325_v58 = vmul.f32 1.442695, %v1310_v57 }
 0x3bb   : > { %v1425_v48 = vpop.permute.xlu0 %1424 }
 0x3bc   : > { %v1430_v49 = vsel %vm1380_vm2, %v1425_v48, 0  ;;  %3175 = vpow2.f32 %v1325_v58  ;;  %v3147_v48 = vld [vmem:[#allocation7] sm:$0xff]  }
 0x3bd   : > { %2938 = vmatpush3.bf16.msra.mxu1 %v1430_v49  ;;  %v3148_v49 = vld [vmem:[#allocation7 + $0x8] sm:$0xff]  }
 0x3be   : > { %2949 = vmatprep.subr.bf16.mxu1 %v3528_v6  ;;  %v4073_v60 = vpop.eup %3173 }
 0x3c5   : > { %1616 = vrot.lane.b32.xlu1 %v3945_v30, %s3531_s9  ;;  %v1345_v30 = vsel %vm1278_vm4, %v4069_v59, 0.0 }
 0x3c6   : > { %v4077_v51 = vpop.eup %3175 }
 0x3c7   : > { %v1348_v62 = vsel %vm1278_vm4, %v4077_v51, 0.0 }
 0x3ce   : > { %1568 = vrot.lane.b32.xlu0 %v3941_v26, %s3531_s9  ;;  %v1342_v26 = vsel %vm1278_vm4, %v4073_v60, 0.0 }
 0x3e9   : > { %1346 = vadd.xlane.f32.xlu1 %v1345_v30 }
 0x3ed   : > { %1343 = vadd.xlane.f32.xlu0 %v1342_v26 }
 0x3f1   : > { %1349 = vadd.xlane.f32.xlu0 %v1348_v62 }
 0x3fa   : > { %1712 = vrot.lane.b32.xlu1 %v3948_v31, %s3531_s9 }
 0x407   : > { %1664 = vrot.lane.b32.xlu0 %v3943_v29, %s3531_s9  ;;  %s4436_s9 = sld [smem:[#allocation25_spill]] }
 0x434   : > { %v1335_v1 = vpop.xlane.xlu1 %1334 }
 0x438   : > { %v1329_v7 = vpop.xlane.xlu1 %1328 }
 0x439   : > { %3177 = vrcp.f32 %v1329_v7 }
 0x43a   : > { %3179 = vrcp.f32 %v1335_v1 }
 0x43d   : > { %v1332_v8 = vpop.xlane.xlu0 %1331 }
 0x43e   : > { %3181 = vrcp.f32 %v1332_v8 }
 0x441   : > { %v1341_v10 = vpop.xlane.xlu1 %1340 }
 0x442   : > { %3183 = vrcp.f32 %v1341_v10 }
 0x443   : > { %v3178_v56 = vpop.eup %3177 }
 0x444   : > { %v1359_v11 = vmul.f32 %v3178_v56, %v3164_v39  ;;  %v3180_v15 = vpop.eup %3179 }
 0x445   : > { %v1338_v12 = vpop.xlane.xlu0 %1337  ;;  %v1361_v20 = vmul.f32 %v3180_v15, %v4047_v18  ;;  %v1617_v34 = vpop.permute.xlu1 %1616 }
 0x446   : > { %v1367_v14 = vpack.c.bf16 %v1359_v11, %v1359_v11  ;;  %3185 = vrcp.f32 %v1338_v12  ;;  %v1622_v13 = vsel %vm1380_vm2, %v1617_v34, 0  ;;  %v1864_v34 = vunpack.c.l.bf16 %v3907_v2 }
 0x447   : > { %v1369_v61 = vpack.c.bf16 %v1361_v20, %v1361_v20 }
 0x448   : > { %v3182_v31 = vpop.eup %3181  ;;  %2934 = vmatmul.mubr.msk.bf16.vlgmr.msra.gmra.mrb[20].mxu0 %vm1278_vm4, %v1367_v14 }
 0x449   : > { %v1360_v29 = vmul.f32 %v3182_v31, %v3166_v33  ;;  %2944 = vmatpush3.bf16.msra.mxu0 %v1478_v17  ;;  %2945 = vmatprep.mubr.msk.bf16.mxu0 %vm3529_vm1, %v3528_v6  ;;  %v1569_v23 = vpop.permute.xlu0 %1568 }
 0x44a   : > { %2955 = vmatprep.subr.bf16.mxu0 %v3528_v6  ;;  %v1574_v25 = vsel %vm1380_vm2, %v1569_v23, 0 }
 0x44b   : > { %v1368_v21 = vpack.c.bf16 %v1360_v29, %v1360_v29 }
 0x44c   : > { %v3184_v24 = vpop.eup %3183 }
 0x44d   : > { %2940 = vmatmul.mubr.msk.bf16.vlgmr.msra.gmra.mrb[20].mxu1 %vm1278_vm4, %v1368_v21  ;;  %v1363_v28 = vmul.f32 %v3184_v24, %v4053_v40 }
 0x44e   : > { %2950 = vmatpush3.bf16.msra.mxu1 %v1526_v22  ;;  %2951 = vmatprep.mubr.msk.bf16.mxu1 %vm3529_vm1, %v3528_v6 }
 0x44f   : > { %2961 = vmatprep.subr.bf16.mxu1 %v3528_v6  ;;  %v1371_v36 = vpack.c.bf16 %v1363_v28, %v1363_v28 }
 0x450   : > { %2946 = vmatmul.mubr.msk.bf16.vlgmr.msra.gmra.mrb[24].mxu0 %vm1278_vm4, %v1369_v61  ;;  %v3186_v27 = vpop.eup %3185 }
 0x451   : > { %2956 = vmatpush3.bf16.msra.mxu0 %v1574_v25  ;;  %2957 = vmatprep.mubr.msk.bf16.mxu0 %vm3529_vm1, %v3528_v6  ;;  %v1362_v32 = vmul.f32 %v3186_v27, %v4057_v45 }
 0x452   : > { %2967 = vmatprep.subr.bf16.mxu0 %v3528_v6 }
 0x453   : > { %v1370_v35 = vpack.c.bf16 %v1362_v32, %v1362_v32  ;;  %v2776_v32 = vld [vmem:[#allocation8] ss:$0 sm:$0xff] }
 0x455   : > { %2952 = vmatmul.mubr.msk.bf16.vlgmr.msra.gmra.mrb[24].mxu1 %vm1278_vm4, %v1370_v35 }
 0x456   : > { %2962 = vmatpush3.bf16.msra.mxu1 %v1622_v13  ;;  %2963 = vmatprep.mubr.msk.bf16.mxu1 %vm3529_vm1, %v3528_v6 }
 0x457   : > { %2973 = vmatprep.subr.bf16.mxu1 %v3528_v6 }
 0x458   : > { %2958 = vmatmul.mubr.msk.bf16.vlgmr.msra.gmra.mrb[28].mxu0 %vm1278_vm4, %v1371_v36  ;;  %v1865_v36 = vunpack.c.h.bf16 %v3907_v2 }
 0x459   : > { %2969 = vmatprep.mubr.msk.bf16.mxu0 %vm3529_vm1, %v3528_v6 }
 0x476   : > { %v1347_v18 = vpop.xlane.xlu1 %1346 }
 0x477   : > { %3187 = vrcp.f32 %v1347_v18 }
 0x47a   : > { %v1344_v37 = vpop.xlane.xlu0 %1343  ;;  %v1713_v40 = vpop.permute.xlu1 %1712 }
 0x47b   : > { %3189 = vrcp.f32 %v1344_v37  ;;  %v1718_v45 = vsel %vm1380_vm2, %v1713_v40, 0 }
 0x47e   : > { %v1350_v19 = vpop.xlane.xlu0 %1349 }
 0x47f   : > { %3191 = vrcp.f32 %v1350_v19 }
 0x481   : > { %v3188_v9 = vpop.eup %3187 }
 0x482   : > { %v1365_v38 = vmul.f32 %v3188_v9, %v4069_v59  ;;  %v1665_v39 = vpop.permute.xlu0 %1664  ;;  %v1866_v9 = vunpack.c.l.bf16 %v3909_v3 }
 0x483   : > { %v1670_v16 = vsel %vm1380_vm2, %v1665_v39, 0 }
 0x484   : > { %v1373_v41 = vpack.c.bf16 %v1365_v38, %v1365_v38  ;;  %2968 = vmatpush3.bf16.msra.mxu0 %v1670_v16 }
 0x485   : > { %v3190_v33 = vpop.eup %3189  ;;  %2979 = vmatprep.subr.bf16.mxu0 %v3147_v48 }
 0x486   : > { %v1364_v42 = vmul.f32 %v3190_v33, %v4073_v60 }
 0x487   : > { %2970 = vmatmul.mubr.msk.bf16.vlgmr.msra.gmra.mrb[32].mxu0 %vm1278_vm4, %v1373_v41  ;;  %v1867_v41 = vunpack.c.h.bf16 %v3909_v3 }
 0x488   : > { %v1372_v43 = vpack.c.bf16 %v1364_v42, %v1364_v42  ;;  %2980 = vmatpush3.bf16.msra.mxu0 %v3147_v48  ;;  %v1868_v48 = vunpack.c.l.bf16 %v3911_v4 }
 0x489   : > { %v3192_v44 = vpop.eup %3191  ;;  %2981 = vmatprep.subr.bf16.mxu0 %v3148_v49 }
 0x48a   : > { %2964 = vmatmul.mubr.msk.bf16.vlgmr.msra.gmra.mrb[28].mxu1 %vm1278_vm4, %v1372_v43  ;;  %v1366_v46 = vmul.f32 %v3192_v44, %v4077_v51 }
 0x48b   : > { %2974 = vmatpush3.bf16.msra.mxu1 %v1718_v45  ;;  %2975 = vmatprep.mubr.msk.bf16.mxu1 %vm3529_vm1, %v3528_v6 }
 0x48c   : > { %v1374_v47 = vpack.c.bf16 %v1366_v46, %v1366_v46  ;;  %2982 = vmatpush3.bf16.msra.mxu0 %v3148_v49 }
 0x492   : > { %2976 = vmatmul.mubr.msk.bf16.vlgmr.msra.gmra.mrb[32].mxu1 %vm1278_vm4, %v1374_v47 }
 0x51b   : > { %v1418_v50 = vpop.f32.mrb[20].mxu0 }
 0x51c   : > { %v2935_v52 = vpop.f32.mrb[21].mxu0 }
 0x51d   : > { %v1421_v53 = vpop.f32.mrb[22].mxu0 }
 0x51e   : > { %v2936_v54 = vpop.f32.mrb[23].mxu0  ;;  %v1869_v53 = vunpack.c.h.bf16 %v3911_v4 }
 0x51f   : > { %v1870_v54 = vunpack.c.l.bf16 %v3919_v5 }
 0x520   : > { %v1466_v55 = vpop.f32.mrb[20].mxu1 }
 0x521   : > { %v1760_v57 = vpack.c.bf16 %v1466_v55, %v1418_v50  ;;  %v2941_v58 = vpop.f32.mrb[21].mxu1 }
 0x522   : > { %v1469_v59 = vpop.f32.mrb[22].mxu1 }
 0x523   : > { %v2942_v30 = vpop.f32.mrb[23].mxu1  ;;  %v1514_v60 = vpop.f32.mrb[24].mxu0  ;;  %2983 = vmatprep.mubr.msk.bf16.mxu0 %vm707_vm0, %v1760_v57 }
 0x524   : > { %v2947_v26 = vpop.f32.mrb[25].mxu0  ;;  %v1871_v30 = vunpack.c.h.bf16 %v3919_v5 }
 0x525   : > { %v1517_v51 = vpop.f32.mrb[26].mxu0 }
 0x526   : > { %v2948_v62 = vpop.f32.mrb[27].mxu0 }
 0x528   : > { %v1562_v63 = vpop.f32.mrb[24].mxu1 }
 0x529   : > { %v1761_v0 = vpack.c.bf16 %v1562_v63, %v1514_v60  ;;  %v2953_v1 = vpop.f32.mrb[25].mxu1 }
 0x52a   : > { %v1565_v7 = vpop.f32.mrb[26].mxu1 }
 0x52b   : > { %v1610_v8 = vpop.f32.mrb[28].mxu0  ;;  %v2954_v10 = vpop.f32.mrb[27].mxu1  ;;  %2984 = vmatmul.mubr.msk.bf16.vlgmr.msra.gmra.mrb[36].mxu0 %vm707_vm0, %v1761_v0 }
 0x52c   : > { %v2959_v56 = vpop.f32.mrb[29].mxu0 }
 0x52d   : > { %v1613_v11 = vpop.f32.mrb[30].mxu0 }
 0x52e   : > { %v2960_v12 = vpop.f32.mrb[31].mxu0 }
 0x55a   : > { %v1706_v14 = vpop.f32.mrb[32].mxu0 }
 0x55b   : > { %v2971_v15 = vpop.f32.mrb[33].mxu0 }
 0x55c   : > { %v1709_v31 = vpop.f32.mrb[34].mxu0 }
 0x55d   : > { %v1658_v17 = vpop.f32.mrb[28].mxu1  ;;  %v2972_v29 = vpop.f32.mrb[35].mxu0 }
 0x55e   : > { %v1762_v20 = vpack.c.bf16 %v1658_v17, %v1610_v8  ;;  %v2965_v21 = vpop.f32.mrb[29].mxu1 }
 0x55f   : > { %v1661_v22 = vpop.f32.mrb[30].mxu1 }
 0x560   : > { %v2966_v23 = vpop.f32.mrb[31].mxu1  ;;  %2987 = vmatprep.mubr.msk.bf16.mxu0 %vm707_vm0, %v1762_v20 }
 0x565   : > { %v1754_v61 = vpop.f32.mrb[32].mxu1 }
 0x566   : > { %v1763_v24 = vpack.c.bf16 %v1754_v61, %v1706_v14  ;;  %v2977_v25 = vpop.f32.mrb[33].mxu1 }
 0x567   : > { %v1757_v27 = vpop.f32.mrb[34].mxu1 }
 0x568   : > { %v2978_v28 = vpop.f32.mrb[35].mxu1  ;;  %2988 = vmatmul.mubr.msk.bf16.gmra.mrb[40].mxu0 %vm707_vm0, %v1763_v24  ;;  %v3149_v27 = vld [vmem:[%s4432_s14] sm:$0xff]  }
 0x569   : > { %2991 = vmatprep.subr.bf16.mxu1 %v3149_v27  ;;  %v3150_v28 = vld [vmem:[%s4432_s14 + $0x8] sm:$0xff]  }
 0x56a   : > { %2992 = vmatpush3.bf16.msra.mxu1 %v3149_v27 }
 0x56b   : > { %2993 = vmatprep.subr.bf16.mxu1 %v3150_v28 }
 0x56e   : > { %2994 = vmatpush3.bf16.msra.mxu1 %v3150_v28 }
 0x56f   : > { %3019 = vmatprep.subr.bf16.mxu1 %v3528_v6 }
 0x5fe   : > { %v2985_v35 = vpop.f32.mrb[36].mxu0 }
 0x5ff   : > { %v1833_v13 = vpop.f32.mrb[37].mxu0  ;;  %v1842_v18 = vadd.f32 %v2985_v35, %v2776_v32 }
 0x600   : > { %v1834_v37 = vadd.f32 %v2776_v32, %v1833_v13  ;;  %v2986_v19 = vpop.f32.mrb[38].mxu0 }
 0x601   : > { %v1836_v38 = vpop.f32.mrb[39].mxu0  ;;  %v1845_v33 = vadd.f32 %v2986_v19, %v2776_v32  ;;  %v1874_v43 = vadd.f32 %v1866_v9, %v1842_v18 }
 0x602   : > { %v1837_v39 = vadd.f32 %v2776_v32, %v1836_v38  ;;  %v1872_v16 = vadd.f32 %v1864_v34, %v1834_v37 }
 0x603   : > { %v1888_v2 = vsel %vm707_vm0, %v1874_v43, 0.0  ;;  %v1875_v45 = vadd.f32 %v1867_v41, %v1845_v33 }
 0x604   : > { %v1882_v42 = vsel %vm707_vm0, %v1872_v16, 0.0  ;;  %v1873_v40 = vadd.f32 %v1865_v36, %v1837_v39 }
 0x605   : > { %1883 = vadd.xlane.f32.xlu0 %v1882_v42  ;;  %v1891_v46 = vsel %vm707_vm0, %v1875_v45, 0.0 }
 0x606   : > { %v1885_v44 = vsel %vm707_vm0, %v1873_v40, 0.0 }
 0x607   : > { %1886 = vadd.xlane.f32.xlu1 %v1885_v44 }
 0x609   : > { %1889 = vadd.xlane.f32.xlu0 %v1888_v2 }
 0x60d   : > { %1892 = vadd.xlane.f32.xlu0 %v1891_v46 }
 0x63b   : > { %v2989_v47 = vpop.f32.mrb[40].mxu0 }
 0x63c   : > { %v1858_v3 = vadd.f32 %v2989_v47, %v2776_v32  ;;  %v1849_v49 = vpop.f32.mrb[41].mxu0 }
 0x63d   : > { %v1850_v50 = vadd.f32 %v2776_v32, %v1849_v49  ;;  %v2990_v52 = vpop.f32.mrb[42].mxu0 }
 0x63e   : > { %v1861_v55 = vadd.f32 %v2990_v52, %v2776_v32  ;;  %v1852_v57 = vpop.f32.mrb[43].mxu0  ;;  %v1878_v51 = vadd.f32 %v1870_v54, %v1858_v3 }
 0x63f   : > { %v1853_v58 = vadd.f32 %v2776_v32, %v1852_v57  ;;  %v1876_v59 = vadd.f32 %v1868_v48, %v1850_v50 }
 0x640   : > { %v1879_v63 = vadd.f32 %v1871_v30, %v1861_v55  ;;  %v1900_v0 = vsel %vm707_vm0, %v1878_v51, 0.0  ;;  %v2783_v30 = vld [vmem:[#allocation10] ss:$0 sm:$0xff] }
 0x641   : > { %v1894_v60 = vsel %vm707_vm0, %v1876_v59, 0.0  ;;  %v1877_v26 = vadd.f32 %v1869_v53, %v1853_v58 }
 0x642   : > { %1895 = vadd.xlane.f32.xlu1 %v1894_v60  ;;  %v1903_v4 = vsel %vm707_vm0, %v1879_v63, 0.0 }
 0x643   : > { %v1897_v62 = vsel %vm707_vm0, %v1877_v26, 0.0 }
 0x644   : > { %1898 = vadd.xlane.f32.xlu0 %v1897_v62 }
 0x646   : > { %1901 = vadd.xlane.f32.xlu1 %v1900_v0  ;;  %v2784_v0 = vld [vmem:[#allocation11] ss:$0 sm:$0xff] }
 0x648   : > { %1904 = vadd.xlane.f32.xlu0 %v1903_v4 }
 0x692   : > { %v1884_v1 = vpop.xlane.xlu0 %1883 }
 0x693   : > { %v1907_v7 = vmul.f32 0.03125, %v1884_v1 }
 0x694   : > { %v1887_v8 = vpop.xlane.xlu1 %1886 }
 0x695   : > { %v4141_v10 = vsub.f32 %v1872_v16, %v1907_v7  ;;  %v1908_v5 = vmul.f32 0.03125, %v1887_v8 }
 0x696   : > { %v1890_v56 = vpop.xlane.xlu0 %1889 }
 0x697   : > { %v4143_v11 = vsub.f32 %v1873_v40, %v1908_v5  ;;  %v1909_v12 = vmul.f32 0.03125, %v1890_v56  ;;  %v1923_v14 = vmul.f32 %v4141_v10, %v4141_v10 }
 0x699   : > { %v4147_v15 = vsub.f32 %v1874_v43, %v1909_v12  ;;  %v1931_v31 = vsel %vm707_vm0, %v1923_v14, 0.0  ;;  %v1924_v17 = vmul.f32 %v4143_v11, %v4143_v11 }
 0x69a   : > { %1932 = vadd.xlane.f32.xlu1 %v1931_v31  ;;  %v1893_v29 = vpop.xlane.xlu0 %1892 }
 0x69b   : > { %v1910_v20 = vmul.f32 0.03125, %v1893_v29  ;;  %v1934_v21 = vsel %vm707_vm0, %v1924_v17, 0.0  ;;  %v1925_v22 = vmul.f32 %v4147_v15, %v4147_v15 }
 0x69c   : > { %1935 = vadd.xlane.f32.xlu0 %v1934_v21 }
 0x69d   : > { %v4155_v23 = vsub.f32 %v1875_v45, %v1910_v20  ;;  %v1937_v61 = vsel %vm707_vm0, %v1925_v22, 0.0 }
 0x69e   : > { %1938 = vadd.xlane.f32.xlu1 %v1937_v61 }
 0x69f   : > { %v1926_v24 = vmul.f32 %v4155_v23, %v4155_v23 }
 0x6a1   : > { %v1940_v25 = vsel %vm707_vm0, %v1926_v24, 0.0 }
 0x6a2   : > { %1941 = vadd.xlane.f32.xlu0 %v1940_v25 }
 0x6cf   : > { %v1896_v32 = vpop.xlane.xlu1 %1895 }
 0x6d0   : > { %v1911_v34 = vmul.f32 0.03125, %v1896_v32 }
 0x6d1   : > { %v1899_v35 = vpop.xlane.xlu0 %1898 }
 0x6d2   : > { %v4168_v13 = vsub.f32 %v1876_v59, %v1911_v34  ;;  %v1912_v36 = vmul.f32 0.03125, %v1899_v35 }
 0x6d3   : > { %v1902_v18 = vpop.xlane.xlu1 %1901 }
 0x6d4   : > { %v4170_v37 = vsub.f32 %v1877_v26, %v1912_v36  ;;  %v1913_v19 = vmul.f32 0.03125, %v1902_v18  ;;  %v1927_v9 = vmul.f32 %v4168_v13, %v4168_v13 }
 0x6d5   : > { %v1905_v38 = vpop.xlane.xlu0 %1904 }
 0x6d6   : > { %v4174_v39 = vsub.f32 %v1878_v51, %v1913_v19  ;;  %v1914_v16 = vmul.f32 0.03125, %v1905_v38  ;;  %v1943_v41 = vsel %vm707_vm0, %v1927_v9, 0.0  ;;  %v1928_v33 = vmul.f32 %v4170_v37, %v4170_v37 }
 0x6d7   : > { %1944 = vadd.xlane.f32.xlu1 %v1943_v41 }
 0x6d8   : > { %v4179_v42 = vsub.f32 %v1879_v63, %v1914_v16  ;;  %v1946_v40 = vsel %vm707_vm0, %v1928_v33, 0.0  ;;  %v1929_v43 = vmul.f32 %v4174_v39, %v4174_v39 }
 0x6d9   : > { %1947 = vadd.xlane.f32.xlu0 %v1946_v40 }
 0x6da   : > { %v1949_v44 = vsel %vm707_vm0, %v1929_v43, 0.0  ;;  %v1930_v2 = vmul.f32 %v4179_v42, %v4179_v42 }
 0x6db   : > { %1950 = vadd.xlane.f32.xlu1 %v1949_v44 }
 0x6dc   : > { %v1952_v45 = vsel %vm707_vm0, %v1930_v2, 0.0 }
 0x6dd   : > { %1953 = vadd.xlane.f32.xlu0 %v1952_v45 }
 0x727   : > { %v1933_v46 = vpop.xlane.xlu1 %1932 }
 0x728   : > { %v1955_v47 = vmul.f32 0.03125, %v1933_v46  ;;  %v3152_v46 = vld [vmem:[%s4433_s28 + $0x8] sm:$0xff]  }
 0x729   : > { %v1936_v48 = vpop.xlane.xlu0 %1935 }
 0x72a   : > { %v1963_v3 = vadd.f32 1e-12, %v1955_v47  ;;  %v1956_v49 = vmul.f32 0.03125, %v1936_v48  ;;  %v3153_v47 = vld [vmem:[%s4433_s28 + $0x10] sm:$0xff]   ;;  %v3154_v48 = vld [vmem:[%s4433_s28 + $0x18] sm:$0xff]  }
 0x72b   : > { %v1939_v50 = vpop.xlane.xlu1 %1938 }
 0x72c   : > { %3193 = vrsqrt.f32 %v1963_v3  ;;  %v1964_v52 = vadd.f32 1e-12, %v1956_v49  ;;  %v1957_v53 = vmul.f32 0.03125, %v1939_v50  ;;  %v4238_v3 = vld [vmem:[#allocation13] ss:$0 sm:$0xff] }
 0x72e   : > { %3195 = vrsqrt.f32 %v1964_v52  ;;  %v1965_v54 = vadd.f32 1e-12, %v1957_v53 }
 0x72f   : > { %v1942_v55 = vpop.xlane.xlu0 %1941 }
 0x730   : > { %3197 = vrsqrt.f32 %v1965_v54  ;;  %v1958_v57 = vmul.f32 0.03125, %v1942_v55 }
 0x732   : > { %v1966_v58 = vadd.f32 1e-12, %v1958_v57 }
 0x734   : > { %3199 = vrsqrt.f32 %v1966_v58 }
 0x736   : > { %v3194_v59 = vpop.eup %3193 }
 0x737   : > { %v1979_v60 = vmul.f32 %v3194_v59, %v4141_v10 }
 0x738   : > { %v3196_v26 = vpop.eup %3195 }
 0x739   : > { %v1980_v51 = vmul.f32 %v3196_v26, %v4143_v11  ;;  %v1993_v62 = vmul.f32 %v2783_v30, %v1979_v60 }
 0x73a   : > { %v3198_v63 = vpop.eup %3197 }
 0x73b   : > { %v1981_v4 = vmul.f32 %v3198_v63, %v4147_v15  ;;  %v1994_v1 = vmul.f32 %v2783_v30, %v1980_v51  ;;  %v4191_v7 = vadd.f32 %v2784_v0, %v1993_v62 }
 0x73d   : > { %v4193_v8 = vadd.f32 %v2784_v0, %v1994_v1  ;;  %v1995_v56 = vmul.f32 %v2783_v30, %v1981_v4 }
 0x73e   : > { %v3200_v5 = vpop.eup %3199 }
 0x73f   : > { %v1982_v12 = vmul.f32 %v3200_v5, %v4155_v23  ;;  %v2015_v10 = vpack.c.bf16 %v4193_v8, %v4191_v7  ;;  %v4199_v11 = vadd.f32 %v2784_v0, %v1995_v56 }
 0x741   : > { %v1996_v14 = vmul.f32 %v2783_v30, %v1982_v12  ;;  %2995 = vmatprep.mubr.msk.bf16.mxu1 %vm707_vm0, %v2015_v10 }
 0x743   : > { %v4201_v31 = vadd.f32 %v2784_v0, %v1996_v14 }
 0x745   : > { %v2016_v15 = vpack.c.bf16 %v4201_v31, %v4199_v11 }
 0x747   : > { %2996 = vmatmul.mubr.msk.bf16.vlgmr.msra.gmra.mrb[36].mxu1 %vm707_vm0, %v2016_v15 }
 0x764   : > { %v1945_v17 = vpop.xlane.xlu1 %1944 }
 0x765   : > { %v1959_v29 = vmul.f32 0.03125, %v1945_v17 }
 0x766   : > { %v1948_v20 = vpop.xlane.xlu0 %1947 }
 0x767   : > { %v1967_v21 = vadd.f32 1e-12, %v1959_v29  ;;  %v1960_v22 = vmul.f32 0.03125, %v1948_v20 }
 0x768   : > { %v1951_v23 = vpop.xlane.xlu1 %1950 }
 0x769   : > { %3201 = vrsqrt.f32 %v1967_v21  ;;  %v1968_v61 = vadd.f32 1e-12, %v1960_v22  ;;  %v1961_v24 = vmul.f32 0.03125, %v1951_v23 }
 0x76a   : > { %v1954_v25 = vpop.xlane.xlu0 %1953 }
 0x76b   : > { %3203 = vrsqrt.f32 %v1968_v61  ;;  %v1969_v27 = vadd.f32 1e-12, %v1961_v24  ;;  %v1962_v28 = vmul.f32 0.03125, %v1954_v25 }
 0x76d   : > { %3205 = vrsqrt.f32 %v1969_v27  ;;  %v1970_v32 = vadd.f32 1e-12, %v1962_v28 }
 0x76f   : > { %3207 = vrsqrt.f32 %v1970_v32 }
 0x773   : > { %v3202_v34 = vpop.eup %3201 }
 0x774   : > { %v1983_v35 = vmul.f32 %v3202_v34, %v4168_v13 }
 0x775   : > { %v3204_v36 = vpop.eup %3203 }
 0x776   : > { %v1984_v18 = vmul.f32 %v3204_v36, %v4170_v37  ;;  %v1997_v19 = vmul.f32 %v2783_v30, %v1983_v35 }
 0x777   : > { %v3206_v9 = vpop.eup %3205 }
 0x778   : > { %v1985_v38 = vmul.f32 %v3206_v9, %v4174_v39  ;;  %v1998_v16 = vmul.f32 %v2783_v30, %v1984_v18  ;;  %v4210_v40 = vadd.f32 %v2784_v0, %v1997_v19 }
 0x779   : > { %v3208_v41 = vpop.eup %3207 }
 0x77a   : > { %v1986_v33 = vmul.f32 %v3208_v41, %v4179_v42  ;;  %v4212_v43 = vadd.f32 %v2784_v0, %v1998_v16  ;;  %v1999_v44 = vmul.f32 %v2783_v30, %v1985_v38  ;;  %v3151_v42 = vld [vmem:[%s4433_s28] sm:$0xff]  }
 0x77b   : > { %3003 = vmatprep.subr.bf16.mxu0 %v3151_v42 }
 0x77c   : > { %v2017_v2 = vpack.c.bf16 %v4212_v43, %v4210_v40  ;;  %v2000_v13 = vmul.f32 %v2783_v30, %v1986_v33  ;;  %v4217_v37 = vadd.f32 %v2784_v0, %v1999_v44  ;;  %3004 = vmatpush3.bf16.msra.mxu0 %v3151_v42 }
 0x77d   : > { %3005 = vmatprep.subr.bf16.mxu0 %v3152_v46 }
 0x77e   : > { %2999 = vmatprep.mubr.msk.bf16.mxu1 %vm707_vm0, %v2017_v2  ;;  %v4219_v45 = vadd.f32 %v2784_v0, %v2000_v13 }
 0x780   : > { %v2018_v39 = vpack.c.bf16 %v4219_v45, %v4217_v37  ;;  %3006 = vmatpush3.bf16.msra.mxu0 %v3152_v46 }
 0x781   : > { %3007 = vmatprep.subr.bf16.mxu0 %v3153_v47 }
 0x782   : > { %3000 = vmatmul.mubr.msk.bf16.gmra.mrb[40].mxu1 %vm707_vm0, %v2018_v39 }
 0x783   : > { %3023 = vmatprep.mubr.msk.bf16.mxu1 %vm3529_vm1, %v3528_v6 }
 0x784   : > { %3008 = vmatpush3.bf16.msra.mxu0 %v3153_v47 }
 0x785   : > { %3009 = vmatprep.subr.bf16.mxu0 %v3154_v48 }
 0x788   : > { %3010 = vmatpush3.bf16.msra.mxu0 %v3154_v48 }
 0x81a   : > { %v2997_v49 = vpop.f32.mrb[36].mxu1 }
 0x81b   : > { %v2097_v50 = vadd.f32 %v2997_v49, %v4238_v3  ;;  %v2088_v52 = vpop.f32.mrb[37].mxu1 }
 0x81c   : > { %v2089_v53 = vadd.f32 %v4238_v3, %v2088_v52  ;;  %v2998_v54 = vpop.f32.mrb[38].mxu1 }
 0x81d   : > { %v2129_v55 = vmul.f32 0.044715, %v2097_v50  ;;  %v2100_v57 = vadd.f32 %v2998_v54, %v4238_v3  ;;  %v2091_v58 = vpop.f32.mrb[39].mxu1  ;;  %v2121_v28 = vmul.f32 0.5, %v2097_v50 }
 0x81e   : > { %v2127_v59 = vmul.f32 0.044715, %v2089_v53  ;;  %v2092_v30 = vadd.f32 %v4238_v3, %v2091_v58  ;;  %v2119_v35 = vmul.f32 0.5, %v2089_v53 }
 0x81f   : > { %v2137_v60 = vmul.f32 %v2129_v55, %v2097_v50  ;;  %v2130_v26 = vmul.f32 0.044715, %v2100_v57  ;;  %v2122_v32 = vmul.f32 0.5, %v2100_v57 }
 0x820   : > { %v2135_v51 = vmul.f32 %v2127_v59, %v2089_v53  ;;  %v2128_v62 = vmul.f32 0.044715, %v2092_v30  ;;  %v2120_v36 = vmul.f32 0.5, %v2092_v30 }
 0x821   : > { %v2145_v63 = vmul.f32 %v2137_v60, %v2097_v50  ;;  %v2138_v0 = vmul.f32 %v2130_v26, %v2100_v57 }
 0x822   : > { %v2143_v4 = vmul.f32 %v2135_v51, %v2089_v53  ;;  %v2136_v1 = vmul.f32 %v2128_v62, %v2092_v30 }
 0x823   : > { %v2153_v5 = vadd.f32 %v2145_v63, %v2097_v50  ;;  %v2146_v56 = vmul.f32 %v2138_v0, %v2100_v57 }
 0x824   : > { %v2151_v12 = vadd.f32 %v2143_v4, %v2089_v53  ;;  %v2144_v10 = vmul.f32 %v2136_v1, %v2092_v30 }
 0x825   : > { %v2161_v14 = vmul.f32 0.7978846, %v2153_v5  ;;  %v2154_v15 = vadd.f32 %v2146_v56, %v2100_v57 }
 0x826   : > { %v2159_v17 = vmul.f32 0.7978846, %v2151_v12  ;;  %v2152_v29 = vadd.f32 %v2144_v10, %v2092_v30 }
 0x827   : > { %3209 = vtanh.f32 %v2161_v14  ;;  %v2162_v20 = vmul.f32 0.7978846, %v2154_v15 }
 0x828   : > { %3211 = vtanh.f32 %v2159_v17  ;;  %v2160_v21 = vmul.f32 0.7978846, %v2152_v29 }
 0x829   : > { %3213 = vtanh.f32 %v2162_v20 }
 0x82a   : > { %3215 = vtanh.f32 %v2160_v21 }
 0x831   : > { %v3210_v22 = vpop.eup %3209 }
 0x832   : > { %v3212_v23 = vpop.eup %3211  ;;  %v2177_v61 = vadd.f32 1.0, %v3210_v22 }
 0x833   : > { %v3214_v24 = vpop.eup %3213  ;;  %v2175_v25 = vadd.f32 1.0, %v3212_v23 }
 0x834   : > { %v3216_v27 = vpop.eup %3215  ;;  %v2178_v34 = vadd.f32 1.0, %v3214_v24  ;;  %v2185_v19 = vmul.f32 %v2177_v61, %v2121_v28 }
 0x835   : > { %v2176_v18 = vadd.f32 1.0, %v3216_v27  ;;  %v2183_v38 = vmul.f32 %v2175_v25, %v2119_v35  ;;  %v2792_v35 = vld [vmem:[%s4434_s17] ss:$0 sm:$0xff]  ;;  %s4438_s17 = sld [smem:[#allocation28_spill]] }
 0x836   : > { %v2186_v9 = vmul.f32 %v2178_v34, %v2122_v32 }
 0x837   : > { %v2184_v16 = vmul.f32 %v2176_v18, %v2120_v36 }
 0x838   : > { %v2192_v41 = vpack.c.bf16 %v2186_v9, %v2185_v19 }
 0x839   : > { %v2191_v33 = vpack.c.bf16 %v2184_v16, %v2183_v38 }
 0x83b   : > { %3011 = vmatprep.mubr.msk.bf16.mxu0 %vm2234_vm5, %v2191_v33  ;;  %s4335_s15 = scalar_lea.hbm %s4438_s17, %s2807_s11 }
 0x83c   : > { %3012 = vmatmul.mubr.msk.bf16.vlgmr.msra.gmra.mrb[44].mxu0 %vm2234_vm5, %v2192_v41 }
 0x855   : > { %v3001_v44 = vpop.f32.mrb[40].mxu1 }
 0x856   : > { %v2113_v2 = vadd.f32 %v3001_v44, %v4238_v3  ;;  %v2104_v13 = vpop.f32.mrb[41].mxu1 }
 0x857   : > { %v2105_v39 = vadd.f32 %v4238_v3, %v2104_v13  ;;  %v3002_v42 = vpop.f32.mrb[42].mxu1 }
 0x858   : > { %v2133_v46 = vmul.f32 0.044715, %v2113_v2  ;;  %v2116_v47 = vadd.f32 %v3002_v42, %v4238_v3  ;;  %v2107_v48 = vpop.f32.mrb[43].mxu1  ;;  %v2125_v29 = vmul.f32 0.5, %v2113_v2 }
 0x859   : > { %v2131_v49 = vmul.f32 0.044715, %v2105_v39  ;;  %v2108_v50 = vadd.f32 %v4238_v3, %v2107_v48  ;;  %v2123_v22 = vmul.f32 0.5, %v2105_v39 }
 0x85a   : > { %v2141_v52 = vmul.f32 %v2133_v46, %v2113_v2  ;;  %v2134_v53 = vmul.f32 0.044715, %v2116_v47  ;;  %v2126_v20 = vmul.f32 0.5, %v2116_v47 }
 0x85b   : > { %v2139_v54 = vmul.f32 %v2131_v49, %v2105_v39  ;;  %v2132_v55 = vmul.f32 0.044715, %v2108_v50  ;;  %v2124_v23 = vmul.f32 0.5, %v2108_v50 }
 0x85c   : > { %v2149_v57 = vmul.f32 %v2141_v52, %v2113_v2  ;;  %v2142_v58 = vmul.f32 %v2134_v53, %v2116_v47 }
 0x85d   : > { %v2147_v59 = vmul.f32 %v2139_v54, %v2105_v39  ;;  %v2140_v30 = vmul.f32 %v2132_v55, %v2108_v50 }
 0x85e   : > { %v2157_v60 = vadd.f32 %v2149_v57, %v2113_v2  ;;  %v2150_v26 = vmul.f32 %v2142_v58, %v2116_v47 }
 0x85f   : > { %v2155_v51 = vadd.f32 %v2147_v59, %v2105_v39  ;;  %v2148_v62 = vmul.f32 %v2140_v30, %v2108_v50 }
 0x860   : > { %v2165_v63 = vmul.f32 0.7978846, %v2157_v60  ;;  %v2158_v0 = vadd.f32 %v2150_v26, %v2116_v47 }
 0x861   : > { %v2163_v4 = vmul.f32 0.7978846, %v2155_v51  ;;  %v2156_v1 = vadd.f32 %v2148_v62, %v2108_v50 }
 0x862   : > { %3217 = vtanh.f32 %v2165_v63  ;;  %v2166_v5 = vmul.f32 0.7978846, %v2158_v0 }
 0x863   : > { %3219 = vtanh.f32 %v2163_v4  ;;  %v2164_v3 = vmul.f32 0.7978846, %v2156_v1 }
 0x864   : > { %3221 = vtanh.f32 %v2166_v5 }
 0x865   : > { %3223 = vtanh.f32 %v2164_v3 }
 0x86c   : > { %v3218_v56 = vpop.eup %3217 }
 0x86d   : > { %v3220_v12 = vpop.eup %3219  ;;  %v2181_v10 = vadd.f32 1.0, %v3218_v56 }
 0x86e   : > { %v3222_v14 = vpop.eup %3221  ;;  %v2179_v15 = vadd.f32 1.0, %v3220_v12 }
 0x86f   : > { %v3224_v17 = vpop.eup %3223  ;;  %v2182_v21 = vadd.f32 1.0, %v3222_v14  ;;  %v2189_v24 = vmul.f32 %v2181_v10, %v2125_v29 }
 0x870   : > { %v2180_v61 = vadd.f32 1.0, %v3224_v17  ;;  %v2187_v27 = vmul.f32 %v2179_v15, %v2123_v22 }
 0x871   : > { %v2190_v25 = vmul.f32 %v2182_v21, %v2126_v20 }
 0x872   : > { %v2188_v28 = vmul.f32 %v2180_v61, %v2124_v23 }
 0x873   : > { %v2194_v32 = vpack.c.bf16 %v2190_v25, %v2189_v24 }
 0x874   : > { %v2193_v34 = vpack.c.bf16 %v2188_v28, %v2187_v27 }
 0x876   : > { %3015 = vmatprep.mubr.msk.bf16.mxu0 %vm2234_vm5, %v2193_v34 }
 0x877   : > { %3016 = vmatmul.mubr.msk.bf16.gmra.mrb[48].mxu0 %vm2234_vm5, %v2194_v32 }
 0x90f   : > { %v3013_v36 = vpop.f32.mrb[44].mxu0 }
 0x910   : > { %v2290_v18 = vadd.f32 %v3013_v36, %v2792_v35  ;;  %v2281_v19 = vpop.f32.mrb[45].mxu0 }
 0x911   : > { %v2282_v9 = vadd.f32 %v2792_v35, %v2281_v19  ;;  %v3014_v38 = vpop.f32.mrb[46].mxu0 }
 0x912   : > { %v2293_v16 = vadd.f32 %v3014_v38, %v2792_v35  ;;  %v2284_v41 = vpop.f32.mrb[47].mxu0  ;;  %v2314_v33 = vadd.f32 %v2290_v18, %v4199_v11 }
 0x913   : > { %v2285_v44 = vadd.f32 %v2792_v35, %v2284_v41  ;;  %v2312_v2 = vadd.f32 %v2282_v9, %v4191_v7 }
 0x914   : > { %v2328_v13 = vsel %vm707_vm0, %v2314_v33, 0.0  ;;  %v2315_v39 = vadd.f32 %v2293_v16, %v4201_v31 }
 0x915   : > { %2329 = vadd.xlane.f32.xlu0 %v2328_v13  ;;  %v2322_v42 = vsel %vm707_vm0, %v2312_v2, 0.0  ;;  %v2313_v46 = vadd.f32 %v2285_v44, %v4193_v8  ;;  %v3156_v13 = vld [vmem:[%s4435_s29 + $0x8] sm:$0xff]  }
 0x916   : > { %2323 = vadd.xlane.f32.xlu1 %v2322_v42  ;;  %v2331_v47 = vsel %vm707_vm0, %v2315_v39, 0.0 }
 0x917   : > { %v2325_v48 = vsel %vm707_vm0, %v2313_v46, 0.0 }
 0x919   : > { %2332 = vadd.xlane.f32.xlu0 %v2331_v47 }
 0x91a   : > { %2326 = vadd.xlane.f32.xlu1 %v2325_v48 }
 0x94a   : > { %v3017_v11 = vpop.f32.mrb[48].mxu0 }
 0x94b   : > { %v2306_v49 = vadd.f32 %v3017_v11, %v2792_v35  ;;  %v2297_v50 = vpop.f32.mrb[49].mxu0 }
 0x94c   : > { %v2298_v7 = vadd.f32 %v2792_v35, %v2297_v50  ;;  %v3018_v52 = vpop.f32.mrb[50].mxu0 }
 0x94d   : > { %v2309_v53 = vadd.f32 %v3018_v52, %v2792_v35  ;;  %v2300_v54 = vpop.f32.mrb[51].mxu0  ;;  %v2318_v58 = vadd.f32 %v2306_v49, %v4217_v37 }
 0x94e   : > { %v2301_v31 = vadd.f32 %v2792_v35, %v2300_v54  ;;  %v2316_v55 = vadd.f32 %v2298_v7, %v4210_v40 }
 0x94f   : > { %v2319_v30 = vadd.f32 %v2309_v53, %v4219_v45  ;;  %v2340_v60 = vsel %vm707_vm0, %v2318_v58, 0.0 }
 0x950   : > { %v2334_v57 = vsel %vm707_vm0, %v2316_v55, 0.0  ;;  %v2317_v8 = vadd.f32 %v2301_v31, %v4212_v43 }
 0x951   : > { %2335 = vadd.xlane.f32.xlu1 %v2334_v57  ;;  %v2343_v26 = vsel %vm707_vm0, %v2319_v30, 0.0 }
 0x952   : > { %v2337_v59 = vsel %vm707_vm0, %v2317_v8, 0.0 }
 0x953   : > { %2338 = vadd.xlane.f32.xlu0 %v2337_v59 }
 0x955   : > { %2341 = vadd.xlane.f32.xlu1 %v2340_v60 }
 0x957   : > { %2344 = vadd.xlane.f32.xlu0 %v2343_v26 }
 0x9a2   : > { %v2330_v51 = vpop.xlane.xlu0 %2329 }
 0x9a3   : > { %v2348_v40 = vmul.f32 0.03125, %v2330_v51  ;;  %v2324_v62 = vpop.xlane.xlu1 %2323 }
 0x9a4   : > { %v2346_v63 = vmul.f32 0.03125, %v2324_v62  ;;  %v2802_v62 = vld [vmem:[%s4437_s13] ss:$0 sm:$0xff]  ;;  %s3443_s13 = sshll.u32 %s3533_s25, 4  ;;  %s3444_s13 = int_to_ptr.vmem [resolvable:$false] %s3443_s13 }
 0x9a5   : > { %v4271_v0 = vsub.f32 %v2314_v33, %v2348_v40  ;;  %s3445_s12 = scalar_lea.vmem %s3444_s13, 256  ;;  %p3446_p2 = scmp.lt.s32.totalorder %s4337_s19, %s3444_s13 }
 0x9a6   : > { %v4273_v43 = vsub.f32 %v2312_v2, %v2346_v63  ;;  %v2333_v37 = vpop.xlane.xlu0 %2332  ;;  %v3155_v2 = vld [vmem:[%s4435_s29] sm:$0xff]  }
 0x9a7   : > { %v2349_v4 = vmul.f32 0.03125, %v2333_v37  ;;  %v2327_v1 = vpop.xlane.xlu1 %2326  ;;  %v2364_v45 = vmul.f32 %v4271_v0, %v4271_v0  ;;  %3020 = vmatpush3.bf16.msra.mxu1 %v3155_v2 }
 0x9a8   : > { %v2347_v5 = vmul.f32 0.03125, %v2327_v1  ;;  %v2362_v3 = vmul.f32 %v4273_v43, %v4273_v43  ;;  %3021 = vmatprep.subr.bf16.mxu1 %v3528_v6 }
 0x9a9   : > { %v4279_v56 = vsub.f32 %v2315_v39, %v2349_v4  ;;  %v2376_v12 = vsel %vm707_vm0, %v2364_v45, 0.0 }
 0x9aa   : > { %v2355_v10 = vsub.f32 %v2313_v46, %v2347_v5  ;;  %2377 = vadd.xlane.f32.xlu0 %v2376_v12  ;;  %v2370_v14 = vsel %vm707_vm0, %v2362_v3, 0.0 }
 0x9ab   : > { %2371 = vadd.xlane.f32.xlu1 %v2370_v14  ;;  %v2365_v15 = vmul.f32 %v4279_v56, %v4279_v56  ;;  %3022 = vmatpush3.bf16.msra.mxu1 %v3156_v13 }
 0x9ac   : > { %v2363_v17 = vmul.f32 %v2355_v10, %v2355_v10 }
 0x9ad   : > { %v2379_v29 = vsel %vm707_vm0, %v2365_v15, 0.0 }
 0x9ae   : > { %2380 = vadd.xlane.f32.xlu0 %v2379_v29  ;;  %v2373_v20 = vsel %vm707_vm0, %v2363_v17, 0.0 }
 0x9af   : > { %2374 = vadd.xlane.f32.xlu1 %v2373_v20 }
 0x9de   : > { %v2336_v21 = vpop.xlane.xlu1 %2335 }
 0x9df   : > { %v2350_v22 = vmul.f32 0.03125, %v2336_v21 }
 0x9e0   : > { %v2339_v23 = vpop.xlane.xlu0 %2338 }
 0x9e1   : > { %v4287_v61 = vsub.f32 %v2316_v55, %v2350_v22  ;;  %v2351_v24 = vmul.f32 0.03125, %v2339_v23 }
 0x9e2   : > { %v2342_v25 = vpop.xlane.xlu1 %2341 }
 0x9e3   : > { %v4289_v27 = vsub.f32 %v2317_v8, %v2351_v24  ;;  %v2352_v28 = vmul.f32 0.03125, %v2342_v25  ;;  %v2366_v32 = vmul.f32 %v4287_v61, %v4287_v61  ;;  %v2801_v8 = vld [vmem:[%s4436_s9] ss:$0 sm:$0xff] }
 0x9e4   : > { %v2345_v34 = vpop.xlane.xlu0 %2344 }
 0x9e5   : > { %v4293_v35 = vsub.f32 %v2318_v58, %v2352_v28  ;;  %v2353_v36 = vmul.f32 0.03125, %v2345_v34  ;;  %v2382_v18 = vsel %vm707_vm0, %v2366_v32, 0.0  ;;  %v2367_v19 = vmul.f32 %v4289_v27, %v4289_v27 }
 0x9e6   : > { %2383 = vadd.xlane.f32.xlu1 %v2382_v18 }
 0x9e7   : > { %v4298_v9 = vsub.f32 %v2319_v30, %v2353_v36  ;;  %v2385_v38 = vsel %vm707_vm0, %v2367_v19, 0.0  ;;  %v2368_v16 = vmul.f32 %v4293_v35, %v4293_v35 }
 0x9e8   : > { %2386 = vadd.xlane.f32.xlu0 %v2385_v38 }
 0x9e9   : > { %v2388_v41 = vsel %vm707_vm0, %v2368_v16, 0.0  ;;  %v2369_v33 = vmul.f32 %v4298_v9, %v4298_v9 }
 0x9ea   : > { %2389 = vadd.xlane.f32.xlu1 %v2388_v41 }
 0x9eb   : > { %v2391_v44 = vsel %vm707_vm0, %v2369_v33, 0.0 }
 0x9ec   : > { %2392 = vadd.xlane.f32.xlu0 %v2391_v44 }
 0xa37   : > { %v2378_v46 = vpop.xlane.xlu0 %2377 }
 0xa38   : > { %v2372_v39 = vpop.xlane.xlu1 %2371  ;;  %v2396_v48 = vmul.f32 0.03125, %v2378_v46 }
 0xa39   : > { %v2394_v49 = vmul.f32 0.03125, %v2372_v39 }
 0xa3a   : > { %v2404_v7 = vadd.f32 1e-12, %v2396_v48 }
 0xa3b   : > { %v2381_v50 = vpop.xlane.xlu0 %2380  ;;  %v2402_v53 = vadd.f32 1e-12, %v2394_v49 }
 0xa3c   : > { %v2375_v42 = vpop.xlane.xlu1 %2374  ;;  %v2397_v52 = vmul.f32 0.03125, %v2381_v50 }
 0xa3d   : > { %v2395_v47 = vmul.f32 0.03125, %v2375_v42 }
 0xa3e   : > { %v2405_v54 = vadd.f32 1e-12, %v2397_v52 }
 0xa3f   : > { %v2403_v11 = vadd.f32 1e-12, %v2395_v47 }
 0xa41   : > { %3225 = vrsqrt.f32 %v2403_v11 }
 0xa42   : > { %3227 = vrsqrt.f32 %v2404_v7 }
 0xa43   : > { %3229 = vrsqrt.f32 %v2402_v53 }
 0xa44   : > { %3231 = vrsqrt.f32 %v2405_v54 }
 0xa4b   : > { %v3226_v6 = vpop.eup %3225 }
 0xa4c   : > { %v2419_v31 = vmul.f32 %v3226_v6, %v2355_v10  ;;  %v3228_v55 = vpop.eup %3227 }
 0xa4d   : > { %v3230_v57 = vpop.eup %3229  ;;  %v2420_v58 = vmul.f32 %v3228_v55, %v4271_v0 }
 0xa4e   : > { %v2433_v59 = vmul.f32 %v2801_v8, %v2419_v31  ;;  %v3232_v26 = vpop.eup %3231  ;;  %v2418_v51 = vmul.f32 %v3230_v57, %v4273_v43 }
 0xa4f   : > { %v2434_v4 = vmul.f32 %v2801_v8, %v2420_v58  ;;  %v2421_v5 = vmul.f32 %v3232_v26, %v4279_v56 }
 0xa50   : > { %v2447_v1 = vadd.f32 %v2802_v62, %v2433_v59  ;;  %v2432_v12 = vmul.f32 %v2801_v8, %v2418_v51 }
 0xa51   : > { %v2448_v17 = vadd.f32 %v2802_v62, %v2434_v4  ;;  %v2435_v29 = vmul.f32 %v2801_v8, %v2421_v5 }
 0xa52   : > { %v2455_v15 = vpack.c.bf16 %v2447_v1, %v2447_v1  ;;  %v2446_v21 = vadd.f32 %v2802_v62, %v2432_v12 }
 0xa53   : > { %v2456_v23 = vpack.c.bf16 %v2448_v17, %v2448_v17  ;;  %v2449_v24 = vadd.f32 %v2802_v62, %v2435_v29 }
 0xa54   : > { %v2476_v22 = vunpack.c.l.b16 %v2455_v15  ;;  %v2454_v25 = vpack.c.bf16 %v2446_v21, %v2446_v21 }
 0xa55   : > { %v2477_v36 = vunpack.c.l.b16 %v2456_v23  ;;  %v2457_v18 = vpack.c.bf16 %v2449_v24, %v2449_v24 }
 0xa56   : > { %v2483_v28 = vrot.slane %v2476_v22, 7  ;;  %v2475_v19 = vunpack.c.l.b16 %v2454_v25 }
 0xa57   : > { %v2486_v42 = vrot.slane %v2477_v36, 6  ;;  %v2478_v46 = vunpack.c.l.b16 %v2457_v18 }
 0xa58   : > { %v2485_v33 = vsel %vm2484_vm6, %v2483_v28, %v2475_v19 }
 0xa59   : > { %v2488_v49 = vsel %vm2487_vm7, %v2486_v42, %v2485_v33  ;;  %v2489_v53 = vrot.slane %v2478_v46, 5 }
 0xa5b   : > { %v2491_v55 = vsel %vm2490_vm8, %v2489_v53, %v2488_v49 }
 0xa73   : > { %v2384_v30 = vpop.xlane.xlu1 %2383 }
 0xa74   : > { %v2398_v60 = vmul.f32 0.03125, %v2384_v30 }
 0xa75   : > { %v2387_v40 = vpop.xlane.xlu0 %2386 }
 0xa76   : > { %v2406_v63 = vadd.f32 1e-12, %v2398_v60  ;;  %v2399_v37 = vmul.f32 0.03125, %v2387_v40 }
 0xa77   : > { %v2390_v45 = vpop.xlane.xlu1 %2389 }
 0xa78   : > { %3233 = vrsqrt.f32 %v2406_v63  ;;  %v2407_v0 = vadd.f32 1e-12, %v2399_v37  ;;  %v2400_v3 = vmul.f32 0.03125, %v2390_v45 }
 0xa79   : > { %v2393_v10 = vpop.xlane.xlu0 %2392 }
 0xa7a   : > { %3235 = vrsqrt.f32 %v2407_v0  ;;  %v2408_v14 = vadd.f32 1e-12, %v2400_v3  ;;  %v2401_v43 = vmul.f32 0.03125, %v2393_v10 }
 0xa7c   : > { %3237 = vrsqrt.f32 %v2408_v14  ;;  %v2409_v20 = vadd.f32 1e-12, %v2401_v43 }
 0xa7e   : > { %3239 = vrsqrt.f32 %v2409_v20 }
 0xa82   : > { %v3234_v56 = vpop.eup %3233 }
 0xa83   : > { %v2422_v32 = vmul.f32 %v3234_v56, %v4287_v61 }
 0xa84   : > { %v3236_v34 = vpop.eup %3235 }
 0xa85   : > { %v2436_v38 = vmul.f32 %v2801_v8, %v2422_v32  ;;  %v2423_v16 = vmul.f32 %v3236_v34, %v4289_v27 }
 0xa86   : > { %v3238_v41 = vpop.eup %3237 }
 0xa87   : > { %v2450_v44 = vadd.f32 %v2802_v62, %v2436_v38  ;;  %v2437_v2 = vmul.f32 %v2801_v8, %v2423_v16  ;;  %v2424_v13 = vmul.f32 %v3238_v41, %v4293_v35 }
 0xa88   : > { %v3240_v39 = vpop.eup %3239 }
 0xa89   : > { %v2458_v47 = vpack.c.bf16 %v2450_v44, %v2450_v44  ;;  %v2451_v61 = vadd.f32 %v2802_v62, %v2437_v2  ;;  %v2438_v48 = vmul.f32 %v2801_v8, %v2424_v13  ;;  %v2425_v11 = vmul.f32 %v3240_v39, %v4298_v9 }
 0xa8b   : > { %v2479_v50 = vunpack.c.l.b16 %v2458_v47  ;;  %v2459_v7 = vpack.c.bf16 %v2451_v61, %v2451_v61  ;;  %v2452_v27 = vadd.f32 %v2802_v62, %v2438_v48  ;;  %v2439_v52 = vmul.f32 %v2801_v8, %v2425_v11 }
 0xa8d   : > { %v2492_v54 = vrot.slane %v2479_v50, 4  ;;  %v2480_v6 = vunpack.c.l.b16 %v2459_v7  ;;  %v2460_v31 = vpack.c.bf16 %v2452_v27, %v2452_v27  ;;  %v2453_v35 = vadd.f32 %v2802_v62, %v2439_v52  ;;  %v2466_v62 = vld [vmem:[%s3885_s18] sm:$0xff]  ;;  %s3439_s18 = scalar_lea.vmem %s4337_s19, 128 }
 0xa8e   : > { %p3440_p12 = scmp.ne.s32.totalorder %s4337_s19, %s3439_s18  ;;  %p3447_p3 = scmp.lt.s32.totalorder %s3445_s12, %s3439_s18 }
 0xa8f   : > { %v2494_v57 = vsel %vm2493_vm9, %v2492_v54, %v2491_v55  ;;  %v2495_v58 = vrot.slane %v2480_v6, 3  ;;  %v2481_v9 = vunpack.c.l.b16 %v2460_v31  ;;  %v2461_v59 = vpack.c.bf16 %v2453_v35, %v2453_v35 }
 0xa90   : > { %p3441_p13 = pnand %p3440_p12, %p4439_p1  ;;  %p3448_p4 = por %p3447_p3, %p3446_p2 }
 0xa91   : > { %v2498_v30 = vrot.slane %v2481_v9, 2  ;;  %v2482_v60 = vunpack.c.l.b16 %v2461_v59  ;;  %v2497_v26 = vsel %vm2496_vm10, %v2495_v58, %v2494_v57 }
 0xa92   : > { %p3442_p0 = pneg %p3441_p13 }
 0xa93   : > { %v2501_v8 = vrot.slane %v2482_v60, 1  ;;  %v2500_v51 = vsel %vm2499_vm11, %v2498_v30, %v2497_v26 }
 0xa94   : > { %p3449_p10 = pnand %p3448_p4, %p3442_p0 }
 0xa95   : > { %v2503_v40 = vsel %vm2502_vm12, %v2501_v8, %v2500_v51 }
 0xa96   : > { %v2504_v63 = vpack.c.b16 %v2503_v40, %v2503_v40 }
 0xa98   : > { %3024 = vmatmul.mubr.msk.bf16.vlgmr.msra.gmra.mrb[44].mxu1 %vm707_vm0, %v2504_v63 }
 0xb6b   : > { %v2554_v37 = vpop.f32.mrb[44].mxu1 }
 0xb6c   : > { %v2555_v4 = vadd.f32 %v2554_v37, %v2466_v62  ;;  %v3025_v1 = vpop.f32.mrb[45].mxu1 }
 0xb6d   : > { %v2557_v45 = vpop.f32.mrb[46].mxu1 }
 0xb6e   : > { %2560 = vst [vmem:[%s644_s16] sm:$0xff] %v2555_v4  ;;  %v3026_v5 = vpop.f32.mrb[47].mxu1 }
 0xb6f   : > { %3452 = shalt.err (!%p3449_p10)
}
 0xb70   : > { %s3453_s3 = scalar_lea.hbm %s4335_s15, 128  ;;  %s3457_s9 = scalar_lea.hbm %s4438_s17, 256 }
 0xb71   : > { %p3454_p11 = scmp.ne.s32.totalorder %s4335_s15, %s3453_s3  ;;  %p3458_p7 = scmp.lt.u32.totalorder %s4335_s15, %s4438_s17 }
 0xb72   : > { %p3459_p6 = scmp.lt.u32.totalorder %s3457_s9, %s3453_s3  ;;  %p3461_p12 = scmp.lt.u32.totalorder %s3453_s3, %s4335_s15 }
 0xb73   : > { %p3455_p8 = pnand %p3454_p11, %p4439_p1 }
 0xb74   : > { %p3460_p9 = por %p3459_p6, %p3458_p7 }
 0xb75   : > { %p3456_p5 = pneg %p3455_p8 }
 0xb76   : > { %p3462_p13 = por %p3461_p12, %p3460_p9 }
 0xb78   : > { %p3463_p0 = pnand %p3462_p13, %p3456_p5 }
 0xb7a   : > { %3466 = shalt.err (!%p3463_p0)
}
 0xb7b   : > { %3053 = dma.vmem_to_hbm [thread:$0]  (%p4439_p1), %s4337_s19, 128, %s4335_s15, %s2562_s27  }
 0xb7c PF: > { %s2587_s18 = sand.u32 1, %s3505_s21   ;;  %p4440_p2 = scmp.ne.s32.totalorder %s4422_s30, 0 }
 0xb7d   : > { %p4441_p3 = scmp.ge.s32.totalorder %s3517_s24, 2  ;;  %s2588_s12 = scalar_lea.sflag [#allocation4], %s2587_s18 }
 0xb7f   : > { %p3079_p4 = pnand %p4441_p3, %p4440_p2 }
 0xb81   : > { %3500 = dma.done.wait (!%p3079_p4), %s2588_s12, 128  }
 0xb82   : > { %3502 = vsyncadd (!%p3079_p4), %s2588_s12, 4294967168  ;;  %p32_p10 = scmp.ge.s32.totalorder %s3803_s0, 4   ;;  %s4442_s21 = smov %s3509_s22 }
 0xb83   : > { %s4443_s22 = smov %s3513_s23  ;;  %s4444_s23 = smov %s3814_s20 }
 0xb84   : > { %s4445_s24 = smov %s3803_s0  ;;  %34 = sbr.rel (!%p32_p10) target bundleno = 18 (0x12), region = 159 }
 0xb8b   :  { %2593 = vsyncpa [#allocation3], 1 }
 0xb8c   :  { %2595 = vsyncpa [#allocation3 + $0x1], 1 }
 0xb8d   :  { %2596 = vsyncpa [#allocation6], 1 }
 0xb8e   :  { %2597 = vsyncpa [#allocation9], 1 }
 0xb8f   :  { %2598 = vsyncpa [#allocation12], 1 }
 0xb90   :  { %2599 = vsyncpa [#allocation4], 1 }
 0xb91   :  { %2601 = vsyncpa [#allocation4 + $0x1], 1 }

</bundles_post_ra>
